<compile_context>
chip_gen: v7x
topology: tpu7x:2x2x1
jax: 0.10.0
libtpu: 0.0.40
codegen_flags: <defaults>
</compile_context>

<pallas_src>
import jax
import jax.numpy as jnp
import numpy as np
from jax.experimental import pallas as pl
from jax.experimental.pallas import tpu as pltpu

SIGMA = 0.1
BN_EPS = 1e-5
LANE = 128


def _round_up(n, m):
    return ((n + m - 1) // m) * m


def autoencoder_kernel(
    x_ref, noise_ref,
    bn1_a_ref, bn1_c_ref,
    w_enc_ref, b_enc_ref,
    w_dec_ref, b_dec_ref,
    w_hid_ref, b_hid_ref,
    w_out_ref, b_out_ref,
    o_ref,
):
    bf16 = jnp.bfloat16
    x = x_ref[...]                                               # (tb, F) f32

    # BatchNorm1d(F), eval mode, pre-folded: h = x*a + c  (single FMA)
    h = x * bn1_a_ref[...] + bn1_c_ref[...]

    # GaussianNoise (relative):  h + noise*(sigma*h) == h * (1 + sigma*noise)
    h = h * (1.0 + SIGMA * noise_ref[...])

    # encoder Linear(F, H) + ReLU  (bf16 operands, f32 accumulation)
    e = jnp.dot(h.astype(bf16), w_enc_ref[...],
                preferred_element_type=jnp.float32) + b_enc_ref[...]
    e = jnp.maximum(e, 0.0)

    # decoder: Dropout(0.2) -> identity (eval); Linear(H, F)
    d = jnp.dot(e.astype(bf16), w_dec_ref[...],
                preferred_element_type=jnp.float32) + b_dec_ref[...]

    # cat([d, x_input], 1) @ W_hidden  as a single K=2F matmul.
    # BatchNorm1d(H) (eval) is pre-folded into w_hid / b_hid.
    c = jnp.concatenate([d, x], axis=1).astype(bf16)             # (tb, 2F)
    hd = jnp.dot(c, w_hid_ref[...],
                 preferred_element_type=jnp.float32) + b_hid_ref[...]

    # Dropout -> identity (eval); Linear(H, O_pad). self.act (Sigmoid) is never
    # applied in the reference forward, so it is not applied here either.
    y = jnp.dot(hd.astype(bf16), w_out_ref[...],
                preferred_element_type=jnp.float32) + b_out_ref[...]
    o_ref[...] = y.astype(o_ref.dtype)


def autoencoder_forward(x, noise, prep, *, tb=128):
    """x, noise: (B, F) f32.  prep: output of prepare_params()."""
    B, F = x.shape
    H = prep["w_enc"].shape[1]
    O_pad = prep["w_out"].shape[1]
    O = prep["num_outputs"]

    # Large batch tile for MXU occupancy; keep it a multiple of 8.
    tb = _round_up(max(8, min(tb, B)), 8)
    B_pad = _round_up(B, tb)
    if B_pad != B:
        pad = B_pad - B
        x = jnp.pad(x, ((0, pad), (0, 0)))
        noise = jnp.pad(noise, ((0, pad), (0, 0)))

    weight_args = (
        prep["bn1_a"], prep["bn1_c"],
        prep["w_enc"], prep["b_enc"],
        prep["w_dec"], prep["b_dec"],
        prep["w_hid"], prep["b_hid"],
        prep["w_out"], prep["b_out"],
    )
    args = (x, noise) + weight_args

    flops = 2 * B_pad * (F * H + H * F + 2 * F * H + H * O_pad)
    bytes_accessed = int(sum(int(np.prod(a.shape)) * a.dtype.itemsize for a in args)
                         + B_pad * O_pad * 4)
    cost = pl.CostEstimate(flops=flops, transcendentals=0,
                           bytes_accessed=bytes_accessed)
    cparams = pltpu.CompilerParams(
        dimension_semantics=("parallel",),          # >=2 grid steps -> both v7x TCs
        vmem_limit_bytes=48 * 1024 * 1024,          # raise scoped VMEM, keep headroom
    )

    def build(single_buffer_weights):
        def weight_spec(shape):
            kwargs = {}
            if single_buffer_weights:
                # Constant-index weights: double-buffering them is pure VMEM waste.
                kwargs["pipeline_mode"] = pl.Buffered(1)
            return pl.BlockSpec(shape, lambda i: (0,) * len(shape), **kwargs)

        in_specs = [
            pl.BlockSpec((tb, F), lambda i: (i, 0)),     # x
            pl.BlockSpec((tb, F), lambda i: (i, 0)),     # noise
        ] + [weight_spec(a.shape) for a in weight_args]

        return pl.pallas_call(
            autoencoder_kernel,
            out_shape=jax.ShapeDtypeStruct((B_pad, O_pad), jnp.float32),
            grid=(B_pad // tb,),
            in_specs=in_specs,
            out_specs=pl.BlockSpec((tb, O_pad), lambda i: (i, 0)),
            compiler_params=cparams,
            cost_estimate=cost,
        )

    try:
        out = jax.block_until_ready(build(True)(*args))
    except Exception:
        # Fallback if pipeline_mode=pl.Buffered(1) is not supported by this jax/Mosaic build.
        out = jax.block_until_ready(build(False)(*args))

    return out[:B, :O]


def init_raw_params(key, input_size, output_size, hidden=640):
    """Deterministic synthetic init matching the PyTorch module's __init__ shapes."""
    ks = jax.random.split(key, 4)

    def linear(k, fan_in, fan_out):
        bound = 1.0 / np.sqrt(fan_in)
        kw, kb = jax.random.split(k)
        w_t = jax.random.uniform(kw, (fan_in, fan_out), jnp.float32, -bound, bound)
        b = jax.random.uniform(kb, (1, fan_out), jnp.float32, -bound, bound)
        return w_t, b

    F, O, H = input_size, output_size, hidden
    w_enc, b_enc = linear(ks[0], F, H)          # encoder Linear(F, 640)
    w_dec, b_dec = linear(ks[1], H, F)          # decoder Linear(640, F)
    w_hid, b_hid = linear(ks[2], 2 * F, H)      # hidden Linear(2F, 640)
    w_out, b_out = linear(ks[3], H, O)          # hidden2 Linear(640, O)
    f32 = jnp.float32
    return dict(
        # BatchNorm1d defaults: gamma=1, beta=0, running_mean=0, running_var=1
        bn1_g=jnp.ones((1, F), f32), bn1_b=jnp.zeros((1, F), f32),
        bn1_rm=jnp.zeros((1, F), f32), bn1_rv=jnp.ones((1, F), f32),
        w_enc=w_enc, b_enc=b_enc,
        w_dec=w_dec, b_dec=b_dec,
        w_hid=w_hid, b_hid=b_hid,
        bn2_g=jnp.ones((1, H), f32), bn2_b=jnp.zeros((1, H), f32),
        bn2_rm=jnp.zeros((1, H), f32), bn2_rv=jnp.ones((1, H), f32),
        w_out=w_out, b_out=b_out,
    )


def prepare_params(raw):
    """One-time parameter prep: fold BN1 to scale/shift, fold BN2 into the hidden
    layer, pad the output projection to a lane-dense width, cast matmul weights to bf16."""
    f32, bf16 = jnp.float32, jnp.bfloat16
    a1 = raw["bn1_g"] * jax.lax.rsqrt(raw["bn1_rv"] + BN_EPS)
    c1 = raw["bn1_b"] - raw["bn1_rm"] * a1
    a2 = raw["bn2_g"] * jax.lax.rsqrt(raw["bn2_rv"] + BN_EPS)
    c2 = raw["bn2_b"] - raw["bn2_rm"] * a2
    w_hid = raw["w_hid"] * a2                       # scale columns by BN2 scale
    b_hid = raw["b_hid"] * a2 + c2
    H, O = raw["w_out"].shape
    O_pad = _round_up(max(O, LANE), LANE)
    w_out = jnp.zeros((H, O_pad), f32).at[:, :O].set(raw["w_out"])
    b_out = jnp.zeros((1, O_pad), f32).at[:, :O].set(raw["b_out"])
    return dict(
        bn1_a=a1.astype(f32), bn1_c=c1.astype(f32),
        w_enc=raw["w_enc"].astype(bf16), b_enc=raw["b_enc"].astype(f32),
        w_dec=raw["w_dec"].astype(bf16), b_dec=raw["b_dec"].astype(f32),
        w_hid=w_hid.astype(bf16), b_hid=b_hid.astype(f32),
        w_out=w_out.astype(bf16), b_out=b_out.astype(f32),
        num_outputs=int(O),
    )


def reference_forward_f32(x, noise, p):
    """Pure-JAX full-f32 mirror of the PyTorch eval-mode forward (unfolded structure)."""
    hi = jax.lax.Precision.HIGHEST
    h = (x - p["bn1_rm"]) / jnp.sqrt(p["bn1_rv"] + BN_EPS) * p["bn1_g"] + p["bn1_b"]
    h = h + noise * (SIGMA * h)
    e = jnp.maximum(jnp.dot(h, p["w_enc"], precision=hi) + p["b_enc"], 0.0)
    d = jnp.dot(e, p["w_dec"], precision=hi) + p["b_dec"]
    c = jnp.concatenate([d, x], axis=1)
    hd = jnp.dot(c, p["w_hid"], precision=hi) + p["b_hid"]
    hd = (hd - p["bn2_rm"]) / jnp.sqrt(p["bn2_rv"] + BN_EPS) * p["bn2_g"] + p["bn2_b"]
    return jnp.dot(hd, p["w_out"], precision=hi) + p["b_out"]


def reference_forward_prepared(x, noise, pp):
    """Pure-JAX mirror of the kernel math (folded BN, bf16 matmul operands)."""
    bf16 = jnp.bfloat16
    h = x * pp["bn1_a"] + pp["bn1_c"]
    h = h * (1.0 + SIGMA * noise)
    e = jnp.dot(h.astype(bf16), pp["w_enc"], preferred_element_type=jnp.float32) + pp["b_enc"]
    e = jnp.maximum(e, 0.0)
    d = jnp.dot(e.astype(bf16), pp["w_dec"], preferred_element_type=jnp.float32) + pp["b_dec"]
    c = jnp.concatenate([d, x], axis=1).astype(bf16)
    hd = jnp.dot(c, pp["w_hid"], preferred_element_type=jnp.float32) + pp["b_hid"]
    y = jnp.dot(hd.astype(bf16), pp["w_out"], preferred_element_type=jnp.float32) + pp["b_out"]
    return y[:, :pp["num_outputs"]]


if __name__ == "__main__":
    B, INPUT_SIZE, OUTPUT_SIZE = 256, 32, 8

    key = jax.random.PRNGKey(0)
    k_x, k_noise, k_params = jax.random.split(key, 3)

    x = jax.random.normal(k_x, (B, INPUT_SIZE), jnp.float32)
    # GaussianNoise draws standard-normal noise of x's shape (applied unconditionally
    # in this module's forward); generated deterministically here and passed in.
    noise = jax.random.normal(k_noise, (B, INPUT_SIZE), jnp.float32)

    raw_params = init_raw_params(k_params, INPUT_SIZE, OUTPUT_SIZE)
    prep = prepare_params(raw_params)

    y = autoencoder_forward(x, noise, prep, tb=128)
    y = jax.block_until_ready(y)

    # Tight check vs. an exact mirror of the kernel math (same folded params / bf16 dots).
    y_bf = reference_forward_prepared(x, noise, prep)
    np.testing.assert_allclose(np.asarray(y), np.asarray(y_bf), rtol=2e-3, atol=2e-3)

    # Loose check vs. the full-f32 original-structure reference (bf16 matmul rounding only).
    y_f32 = reference_forward_f32(x, noise, raw_params)
    np.testing.assert_allclose(np.asarray(y), np.asarray(y_f32), rtol=5e-2, atol=5e-2)

    print("KERNEL_OK")
</pallas_src>

<mosaic_0001>
module attributes {stable_mosaic.version = 11 : i64} {
  func.func @autoencoder_kernel(%arg0: i32, %arg1: memref<128x32xf32, #tpu.memory_space<vmem>>, %arg2: memref<128x32xf32, #tpu.memory_space<vmem>>, %arg3: memref<1x32xf32, #tpu.memory_space<vmem>>, %arg4: memref<1x32xf32, #tpu.memory_space<vmem>>, %arg5: memref<32x640xbf16, #tpu.memory_space<vmem>>, %arg6: memref<1x640xf32, #tpu.memory_space<vmem>>, %arg7: memref<640x32xbf16, #tpu.memory_space<vmem>>, %arg8: memref<1x32xf32, #tpu.memory_space<vmem>>, %arg9: memref<64x640xbf16, #tpu.memory_space<vmem>>, %arg10: memref<1x640xf32, #tpu.memory_space<vmem>>, %arg11: memref<640x128xbf16, #tpu.memory_space<vmem>>, %arg12: memref<1x128xf32, #tpu.memory_space<vmem>>, %arg13: memref<128x128xf32, #tpu.memory_space<vmem>>) attributes {dimension_semantics = [#tpu.dimension_semantics<parallel>], iteration_bounds = array<i64: 2>, scalar_prefetch = 0 : i64, scratch_operands = 0 : i64, tpu.core_type = #tpu.core_type<tc>, window_params = [{transform_indices = @transform_0, window_bounds = array<i64: 128, 32>}, {transform_indices = @transform_1, window_bounds = array<i64: 128, 32>}, {pipeline_mode = #tpu.pipeline_mode<synchronous>, transform_indices = @transform_2, window_bounds = array<i64: 1, 32>}, {pipeline_mode = #tpu.pipeline_mode<synchronous>, transform_indices = @transform_3, window_bounds = array<i64: 1, 32>}, {pipeline_mode = #tpu.pipeline_mode<synchronous>, transform_indices = @transform_4, window_bounds = array<i64: 32, 640>}, {pipeline_mode = #tpu.pipeline_mode<synchronous>, transform_indices = @transform_5, window_bounds = array<i64: 1, 640>}, {pipeline_mode = #tpu.pipeline_mode<synchronous>, transform_indices = @transform_6, window_bounds = array<i64: 640, 32>}, {pipeline_mode = #tpu.pipeline_mode<synchronous>, transform_indices = @transform_7, window_bounds = array<i64: 1, 32>}, {pipeline_mode = #tpu.pipeline_mode<synchronous>, transform_indices = @transform_8, window_bounds = array<i64: 64, 640>}, {pipeline_mode = #tpu.pipeline_mode<synchronous>, transform_indices = @transform_9, window_bounds = array<i64: 1, 640>}, {pipeline_mode = #tpu.pipeline_mode<synchronous>, transform_indices = @transform_10, window_bounds = array<i64: 640, 128>}, {pipeline_mode = #tpu.pipeline_mode<synchronous>, transform_indices = @transform_11, window_bounds = array<i64: 1, 128>}, {transform_indices = @transform_12, window_bounds = array<i64: 128, 128>}]} {
    %c0 = arith.constant 0 : index
    %c0_0 = arith.constant 0 : index
    %0 = vector.load %arg1[%c0, %c0_0] : memref<128x32xf32, #tpu.memory_space<vmem>>, vector<128x32xf32>
    %c0_1 = arith.constant 0 : index
    %c0_2 = arith.constant 0 : index
    %1 = vector.load %arg3[%c0_1, %c0_2] : memref<1x32xf32, #tpu.memory_space<vmem>>, vector<1x32xf32>
    %2 = vector.broadcast %1 : vector<1x32xf32> to vector<128x32xf32>
    %3 = arith.mulf %0, %2 : vector<128x32xf32>
    %c0_3 = arith.constant 0 : index
    %c0_4 = arith.constant 0 : index
    %4 = vector.load %arg4[%c0_3, %c0_4] : memref<1x32xf32, #tpu.memory_space<vmem>>, vector<1x32xf32>
    %5 = vector.broadcast %4 : vector<1x32xf32> to vector<128x32xf32>
    %6 = arith.addf %3, %5 : vector<128x32xf32>
    %c0_5 = arith.constant 0 : index
    %c0_6 = arith.constant 0 : index
    %7 = vector.load %arg2[%c0_5, %c0_6] : memref<128x32xf32, #tpu.memory_space<vmem>>, vector<128x32xf32>
    %cst = arith.constant 1.000000e-01 : f32
    %8 = vector.broadcast %cst : f32 to vector<128x32xf32>
    %9 = arith.mulf %8, %7 : vector<128x32xf32>
    %cst_7 = arith.constant 1.000000e+00 : f32
    %10 = vector.broadcast %cst_7 : f32 to vector<128x32xf32>
    %11 = arith.addf %10, %9 : vector<128x32xf32>
    %12 = arith.mulf %6, %11 : vector<128x32xf32>
    %13 = arith.truncf %12 : vector<128x32xf32> to vector<128x32xbf16>
    %c0_8 = arith.constant 0 : index
    %c0_9 = arith.constant 0 : index
    %14 = vector.load %arg5[%c0_8, %c0_9] : memref<32x640xbf16, #tpu.memory_space<vmem>>, vector<32x640xbf16>
    %cst_10 = arith.constant dense<0.000000e+00> : vector<128x640xf32>
    %15 = tpu.matmul %13, %14, %cst_10 {dimension_numbers = #tpu.dot_dimension_numbers<[1], [0], [0], [1], [0, 0, 1, 1], [], []>} : vector<128x32xbf16>, vector<32x640xbf16>, vector<128x640xf32> -> vector<128x640xf32>
    %c0_11 = arith.constant 0 : index
    %c0_12 = arith.constant 0 : index
    %16 = vector.load %arg6[%c0_11, %c0_12] : memref<1x640xf32, #tpu.memory_space<vmem>>, vector<1x640xf32>
    %17 = vector.broadcast %16 : vector<1x640xf32> to vector<128x640xf32>
    %18 = arith.addf %15, %17 : vector<128x640xf32>
    %cst_13 = arith.constant 0.000000e+00 : f32
    %19 = vector.broadcast %cst_13 : f32 to vector<128x640xf32>
    %20 = arith.maximumf %18, %19 : vector<128x640xf32>
    %21 = arith.truncf %20 : vector<128x640xf32> to vector<128x640xbf16>
    %c0_14 = arith.constant 0 : index
    %c0_15 = arith.constant 0 : index
    %22 = vector.load %arg7[%c0_14, %c0_15] : memref<640x32xbf16, #tpu.memory_space<vmem>>, vector<640x32xbf16>
    %cst_16 = arith.constant dense<0.000000e+00> : vector<128x32xf32>
    %23 = tpu.matmul %21, %22, %cst_16 {dimension_numbers = #tpu.dot_dimension_numbers<[1], [0], [0], [1], [0, 0, 1, 1], [], []>} : vector<128x640xbf16>, vector<640x32xbf16>, vector<128x32xf32> -> vector<128x32xf32>
    %c0_17 = arith.constant 0 : index
    %c0_18 = arith.constant 0 : index
    %24 = vector.load %arg8[%c0_17, %c0_18] : memref<1x32xf32, #tpu.memory_space<vmem>>, vector<1x32xf32>
    %25 = vector.broadcast %24 : vector<1x32xf32> to vector<128x32xf32>
    %26 = arith.addf %23, %25 : vector<128x32xf32>
    %27 = tpu.concatenate %26, %0 in 1 : vector<128x32xf32>, vector<128x32xf32> -> vector<128x64xf32>
    %28 = arith.truncf %27 : vector<128x64xf32> to vector<128x64xbf16>
    %c0_19 = arith.constant 0 : index
    %c0_20 = arith.constant 0 : index
    %29 = vector.load %arg9[%c0_19, %c0_20] : memref<64x640xbf16, #tpu.memory_space<vmem>>, vector<64x640xbf16>
    %cst_21 = arith.constant dense<0.000000e+00> : vector<128x640xf32>
    %30 = tpu.matmul %28, %29, %cst_21 {dimension_numbers = #tpu.dot_dimension_numbers<[1], [0], [0], [1], [0, 0, 1, 1], [], []>} : vector<128x64xbf16>, vector<64x640xbf16>, vector<128x640xf32> -> vector<128x640xf32>
    %c0_22 = arith.constant 0 : index
    %c0_23 = arith.constant 0 : index
    %31 = vector.load %arg10[%c0_22, %c0_23] : memref<1x640xf32, #tpu.memory_space<vmem>>, vector<1x640xf32>
    %32 = vector.broadcast %31 : vector<1x640xf32> to vector<128x640xf32>
    %33 = arith.addf %30, %32 : vector<128x640xf32>
    %34 = arith.truncf %33 : vector<128x640xf32> to vector<128x640xbf16>
    %c0_24 = arith.constant 0 : index
    %c0_25 = arith.constant 0 : index
    %35 = vector.load %arg11[%c0_24, %c0_25] : memref<640x128xbf16, #tpu.memory_space<vmem>>, vector<640x128xbf16>
    %cst_26 = arith.constant dense<0.000000e+00> : vector<128x128xf32>
    %36 = tpu.matmul %34, %35, %cst_26 {dimension_numbers = #tpu.dot_dimension_numbers<[1], [0], [0], [1], [0, 0, 1, 1], [], []>} : vector<128x640xbf16>, vector<640x128xbf16>, vector<128x128xf32> -> vector<128x128xf32>
    %c0_27 = arith.constant 0 : index
    %c0_28 = arith.constant 0 : index
    %37 = vector.load %arg12[%c0_27, %c0_28] : memref<1x128xf32, #tpu.memory_space<vmem>>, vector<1x128xf32>
    %38 = vector.broadcast %37 : vector<1x128xf32> to vector<128x128xf32>
    %39 = arith.addf %36, %38 : vector<128x128xf32>
    %c0_29 = arith.constant 0 : index
    %c0_30 = arith.constant 0 : index
    %40 = vector.load %arg13[%c0_29, %c0_30] : memref<128x128xf32, #tpu.memory_space<vmem>>, vector<128x128xf32>
    tpu.vector_store %arg13[%c0_29, %c0_30], %39 {strides = array<i32>} : memref<128x128xf32, #tpu.memory_space<vmem>>, vector<128x128xf32>,
    return
  }
  func.func @transform_0(%arg0: i32) -> (i32, i32) {
    %c0_i32 = arith.constant 0 : i32
    %c0_i32_0 = arith.constant 0 : i32
    return %arg0, %c0_i32 : i32, i32
  }
  func.func @transform_1(%arg0: i32) -> (i32, i32) {
    %c0_i32 = arith.constant 0 : i32
    %c0_i32_0 = arith.constant 0 : i32
    return %arg0, %c0_i32 : i32, i32
  }
  func.func @transform_2(%arg0: i32) -> (i32, i32) {
    %c0_i32 = arith.constant 0 : i32
    %c0_i32_0 = arith.constant 0 : i32
    %c0_i32_1 = arith.constant 0 : i32
    return %c0_i32, %c0_i32_0 : i32, i32
  }
  func.func @transform_3(%arg0: i32) -> (i32, i32) {
    %c0_i32 = arith.constant 0 : i32
    %c0_i32_0 = arith.constant 0 : i32
    %c0_i32_1 = arith.constant 0 : i32
    return %c0_i32, %c0_i32_0 : i32, i32
  }
  func.func @transform_4(%arg0: i32) -> (i32, i32) {
    %c0_i32 = arith.constant 0 : i32
    %c0_i32_0 = arith.constant 0 : i32
    %c0_i32_1 = arith.constant 0 : i32
    return %c0_i32, %c0_i32_0 : i32, i32
  }
  func.func @transform_5(%arg0: i32) -> (i32, i32) {
    %c0_i32 = arith.constant 0 : i32
    %c0_i32_0 = arith.constant 0 : i32
    %c0_i32_1 = arith.constant 0 : i32
    return %c0_i32, %c0_i32_0 : i32, i32
  }
  func.func @transform_6(%arg0: i32) -> (i32, i32) {
    %c0_i32 = arith.constant 0 : i32
    %c0_i32_0 = arith.constant 0 : i32
    %c0_i32_1 = arith.constant 0 : i32
    return %c0_i32, %c0_i32_0 : i32, i32
  }
  func.func @transform_7(%arg0: i32) -> (i32, i32) {
    %c0_i32 = arith.constant 0 : i32
    %c0_i32_0 = arith.constant 0 : i32
    %c0_i32_1 = arith.constant 0 : i32
    return %c0_i32, %c0_i32_0 : i32, i32
  }
  func.func @transform_8(%arg0: i32) -> (i32, i32) {
    %c0_i32 = arith.constant 0 : i32
    %c0_i32_0 = arith.constant 0 : i32
    %c0_i32_1 = arith.constant 0 : i32
    return %c0_i32, %c0_i32_0 : i32, i32
  }
  func.func @transform_9(%arg0: i32) -> (i32, i32) {
    %c0_i32 = arith.constant 0 : i32
    %c0_i32_0 = arith.constant 0 : i32
    %c0_i32_1 = arith.constant 0 : i32
    return %c0_i32, %c0_i32_0 : i32, i32
  }
  func.func @transform_10(%arg0: i32) -> (i32, i32) {
    %c0_i32 = arith.constant 0 : i32
    %c0_i32_0 = arith.constant 0 : i32
    %c0_i32_1 = arith.constant 0 : i32
    return %c0_i32, %c0_i32_0 : i32, i32
  }
  func.func @transform_11(%arg0: i32) -> (i32, i32) {
    %c0_i32 = arith.constant 0 : i32
    %c0_i32_0 = arith.constant 0 : i32
    %c0_i32_1 = arith.constant 0 : i32
    return %c0_i32, %c0_i32_0 : i32, i32
  }
  func.func @transform_12(%arg0: i32) -> (i32, i32) {
    %c0_i32 = arith.constant 0 : i32
    %c0_i32_0 = arith.constant 0 : i32
    return %arg0, %c0_i32 : i32, i32
  }
}

module attributes {stable_mosaic.version = 11 : i64} {
  func.func @autoencoder_kernel(%arg0: i32, %arg1: memref<128x32xf32, #tpu.memory_space<vmem>>, %arg2: memref<128x32xf32, #tpu.memory_space<vmem>>, %arg3: memref<1x32xf32, #tpu.memory_space<vmem>>, %arg4: memref<1x32xf32, #tpu.memory_space<vmem>>, %arg5: memref<32x640xbf16, #tpu.memory_space<vmem>>, %arg6: memref<1x640xf32, #tpu.memory_space<vmem>>, %arg7: memref<640x32xbf16, #tpu.memory_space<vmem>>, %arg8: memref<1x32xf32, #tpu.memory_space<vmem>>, %arg9: memref<64x640xbf16, #tpu.memory_space<vmem>>, %arg10: memref<1x640xf32, #tpu.memory_space<vmem>>, %arg11: memref<640x128xbf16, #tpu.memory_space<vmem>>, %arg12: memref<1x128xf32, #tpu.memory_space<vmem>>, %arg13: memref<128x128xf32, #tpu.memory_space<vmem>>) attributes {dimension_semantics = [#tpu.dimension_semantics<parallel>], iteration_bounds = array<i64: 2>, scalar_prefetch = 0 : i64, scratch_operands = 0 : i64, tpu.core_type = #tpu.core_type<tc>, window_params = [{transform_indices = @transform_0, window_bounds = array<i64: 128, 32>}, {transform_indices = @transform_1, window_bounds = array<i64: 128, 32>}, {pipeline_mode = #tpu.pipeline_mode<synchronous>, transform_indices = @transform_2, window_bounds = array<i64: 1, 32>}, {pipeline_mode = #tpu.pipeline_mode<synchronous>, transform_indices = @transform_3, window_bounds = array<i64: 1, 32>}, {pipeline_mode = #tpu.pipeline_mode<synchronous>, transform_indices = @transform_4, window_bounds = array<i64: 32, 640>}, {pipeline_mode = #tpu.pipeline_mode<synchronous>, transform_indices = @transform_5, window_bounds = array<i64: 1, 640>}, {pipeline_mode = #tpu.pipeline_mode<synchronous>, transform_indices = @transform_6, window_bounds = array<i64: 640, 32>}, {pipeline_mode = #tpu.pipeline_mode<synchronous>, transform_indices = @transform_7, window_bounds = array<i64: 1, 32>}, {pipeline_mode = #tpu.pipeline_mode<synchronous>, transform_indices = @transform_8, window_bounds = array<i64: 64, 640>}, {pipeline_mode = #tpu.pipeline_mode<synchronous>, transform_indices = @transform_9, window_bounds = array<i64: 1, 640>}, {pipeline_mode = #tpu.pipeline_mode<synchronous>, transform_indices = @transform_10, window_bounds = array<i64: 640, 128>}, {pipeline_mode = #tpu.pipeline_mode<synchronous>, transform_indices = @transform_11, window_bounds = array<i64: 1, 128>}, {transform_indices = @transform_12, window_bounds = array<i64: 128, 128>}]} {
    %c0 = arith.constant 0 : index
    %c0_0 = arith.constant 0 : index
    %0 = vector.load %arg1[%c0, %c0_0] : memref<128x32xf32, #tpu.memory_space<vmem>>, vector<128x32xf32>
    %c0_1 = arith.constant 0 : index
    %c0_2 = arith.constant 0 : index
    %1 = vector.load %arg3[%c0_1, %c0_2] : memref<1x32xf32, #tpu.memory_space<vmem>>, vector<1x32xf32>
    %2 = vector.broadcast %1 : vector<1x32xf32> to vector<128x32xf32>
    %3 = arith.mulf %0, %2 : vector<128x32xf32>
    %c0_3 = arith.constant 0 : index
    %c0_4 = arith.constant 0 : index
    %4 = vector.load %arg4[%c0_3, %c0_4] : memref<1x32xf32, #tpu.memory_space<vmem>>, vector<1x32xf32>
    %5 = vector.broadcast %4 : vector<1x32xf32> to vector<128x32xf32>
    %6 = arith.addf %3, %5 : vector<128x32xf32>
    %c0_5 = arith.constant 0 : index
    %c0_6 = arith.constant 0 : index
    %7 = vector.load %arg2[%c0_5, %c0_6] : memref<128x32xf32, #tpu.memory_space<vmem>>, vector<128x32xf32>
    %cst = arith.constant 1.000000e-01 : f32
    %8 = vector.broadcast %cst : f32 to vector<128x32xf32>
    %9 = arith.mulf %8, %7 : vector<128x32xf32>
    %cst_7 = arith.constant 1.000000e+00 : f32
    %10 = vector.broadcast %cst_7 : f32 to vector<128x32xf32>
    %11 = arith.addf %10, %9 : vector<128x32xf32>
    %12 = arith.mulf %6, %11 : vector<128x32xf32>
    %13 = arith.truncf %12 : vector<128x32xf32> to vector<128x32xbf16>
    %c0_8 = arith.constant 0 : index
    %c0_9 = arith.constant 0 : index
    %14 = vector.load %arg5[%c0_8, %c0_9] : memref<32x640xbf16, #tpu.memory_space<vmem>>, vector<32x640xbf16>
    %cst_10 = arith.constant dense<0.000000e+00> : vector<128x640xf32>
    %15 = tpu.matmul %13, %14, %cst_10 {dimension_numbers = #tpu.dot_dimension_numbers<[1], [0], [0], [1], [0, 0, 1, 1], [], []>} : vector<128x32xbf16>, vector<32x640xbf16>, vector<128x640xf32> -> vector<128x640xf32>
    %c0_11 = arith.constant 0 : index
    %c0_12 = arith.constant 0 : index
    %16 = vector.load %arg6[%c0_11, %c0_12] : memref<1x640xf32, #tpu.memory_space<vmem>>, vector<1x640xf32>
    %17 = vector.broadcast %16 : vector<1x640xf32> to vector<128x640xf32>
    %18 = arith.addf %15, %17 : vector<128x640xf32>
    %cst_13 = arith.constant 0.000000e+00 : f32
    %19 = vector.broadcast %cst_13 : f32 to vector<128x640xf32>
    %20 = arith.maximumf %18, %19 : vector<128x640xf32>
    %21 = arith.truncf %20 : vector<128x640xf32> to vector<128x640xbf16>
    %c0_14 = arith.constant 0 : index
    %c0_15 = arith.constant 0 : index
    %22 = vector.load %arg7[%c0_14, %c0_15] : memref<640x32xbf16, #tpu.memory_space<vmem>>, vector<640x32xbf16>
    %cst_16 = arith.constant dense<0.000000e+00> : vector<128x32xf32>
    %23 = tpu.matmul %21, %22, %cst_16 {dimension_numbers = #tpu.dot_dimension_numbers<[1], [0], [0], [1], [0, 0, 1, 1], [], []>} : vector<128x640xbf16>, vector<640x32xbf16>, vector<128x32xf32> -> vector<128x32xf32>
    %c0_17 = arith.constant 0 : index
    %c0_18 = arith.constant 0 : index
    %24 = vector.load %arg8[%c0_17, %c0_18] : memref<1x32xf32, #tpu.memory_space<vmem>>, vector<1x32xf32>
    %25 = vector.broadcast %24 : vector<1x32xf32> to vector<128x32xf32>
    %26 = arith.addf %23, %25 : vector<128x32xf32>
    %27 = tpu.concatenate %26, %0 in 1 : vector<128x32xf32>, vector<128x32xf32> -> vector<128x64xf32>
    %28 = arith.truncf %27 : vector<128x64xf32> to vector<128x64xbf16>
    %c0_19 = arith.constant 0 : index
    %c0_20 = arith.constant 0 : index
    %29 = vector.load %arg9[%c0_19, %c0_20] : memref<64x640xbf16, #tpu.memory_space<vmem>>, vector<64x640xbf16>
    %cst_21 = arith.constant dense<0.000000e+00> : vector<128x640xf32>
    %30 = tpu.matmul %28, %29, %cst_21 {dimension_numbers = #tpu.dot_dimension_numbers<[1], [0], [0], [1], [0, 0, 1, 1], [], []>} : vector<128x64xbf16>, vector<64x640xbf16>, vector<128x640xf32> -> vector<128x640xf32>
    %c0_22 = arith.constant 0 : index
    %c0_23 = arith.constant 0 : index
    %31 = vector.load %arg10[%c0_22, %c0_23] : memref<1x640xf32, #tpu.memory_space<vmem>>, vector<1x640xf32>
    %32 = vector.broadcast %31 : vector<1x640xf32> to vector<128x640xf32>
    %33 = arith.addf %30, %32 : vector<128x640xf32>
    %34 = arith.truncf %33 : vector<128x640xf32> to vector<128x640xbf16>
    %c0_24 = arith.constant 0 : index
    %c0_25 = arith.constant 0 : index
    %35 = vector.load %arg11[%c0_24, %c0_25] : memref<640x128xbf16, #tpu.memory_space<vmem>>, vector<640x128xbf16>
    %cst_26 = arith.constant dense<0.000000e+00> : vector<128x128xf32>
    %36 = tpu.matmul %34, %35, %cst_26 {dimension_numbers = #tpu.dot_dimension_numbers<[1], [0], [0], [1], [0, 0, 1, 1], [], []>} : vector<128x640xbf16>, vector<640x128xbf16>, vector<128x128xf32> -> vector<128x128xf32>
    %c0_27 = arith.constant 0 : index
    %c0_28 = arith.constant 0 : index
    %37 = vector.load %arg12[%c0_27, %c0_28] : memref<1x128xf32, #tpu.memory_space<vmem>>, vector<1x128xf32>
    %38 = vector.broadcast %37 : vector<1x128xf32> to vector<128x128xf32>
    %39 = arith.addf %36, %38 : vector<128x128xf32>
    %c0_29 = arith.constant 0 : index
    %c0_30 = arith.constant 0 : index
    %40 = vector.load %arg13[%c0_29, %c0_30] : memref<128x128xf32, #tpu.memory_space<vmem>>, vector<128x128xf32>
    tpu.vector_store %arg13[%c0_29, %c0_30], %39 {strides = array<i32>} : memref<128x128xf32, #tpu.memory_space<vmem>>, vector<128x128xf32>,
    return
  }
  func.func @transform_0(%arg0: i32) -> (i32, i32) {
    %c0_i32 = arith.constant 0 : i32
    %c0_i32_0 = arith.constant 0 : i32
    return %arg0, %c0_i32 : i32, i32
  }
  func.func @transform_1(%arg0: i32) -> (i32, i32) {
    %c0_i32 = arith.constant 0 : i32
    %c0_i32_0 = arith.constant 0 : i32
    return %arg0, %c0_i32 : i32, i32
  }
  func.func @transform_2(%arg0: i32) -> (i32, i32) {
    %c0_i32 = arith.constant 0 : i32
    %c0_i32_0 = arith.constant 0 : i32
    %c0_i32_1 = arith.constant 0 : i32
    return %c0_i32, %c0_i32_0 : i32, i32
  }
  func.func @transform_3(%arg0: i32) -> (i32, i32) {
    %c0_i32 = arith.constant 0 : i32
    %c0_i32_0 = arith.constant 0 : i32
    %c0_i32_1 = arith.constant 0 : i32
    return %c0_i32, %c0_i32_0 : i32, i32
  }
  func.func @transform_4(%arg0: i32) -> (i32, i32) {
    %c0_i32 = arith.constant 0 : i32
    %c0_i32_0 = arith.constant 0 : i32
    %c0_i32_1 = arith.constant 0 : i32
    return %c0_i32, %c0_i32_0 : i32, i32
  }
  func.func @transform_5(%arg0: i32) -> (i32, i32) {
    %c0_i32 = arith.constant 0 : i32
    %c0_i32_0 = arith.constant 0 : i32
    %c0_i32_1 = arith.constant 0 : i32
    return %c0_i32, %c0_i32_0 : i32, i32
  }
  func.func @transform_6(%arg0: i32) -> (i32, i32) {
    %c0_i32 = arith.constant 0 : i32
    %c0_i32_0 = arith.constant 0 : i32
    %c0_i32_1 = arith.constant 0 : i32
    return %c0_i32, %c0_i32_0 : i32, i32
  }
  func.func @transform_7(%arg0: i32) -> (i32, i32) {
    %c0_i32 = arith.constant 0 : i32
    %c0_i32_0 = arith.constant 0 : i32
    %c0_i32_1 = arith.constant 0 : i32
    return %c0_i32, %c0_i32_0 : i32, i32
  }
  func.func @transform_8(%arg0: i32) -> (i32, i32) {
    %c0_i32 = arith.constant 0 : i32
    %c0_i32_0 = arith.constant 0 : i32
    %c0_i32_1 = arith.constant 0 : i32
    return %c0_i32, %c0_i32_0 : i32, i32
  }
  func.func @transform_9(%arg0: i32) -> (i32, i32) {
    %c0_i32 = arith.constant 0 : i32
    %c0_i32_0 = arith.constant 0 : i32
    %c0_i32_1 = arith.constant 0 : i32
    return %c0_i32, %c0_i32_0 : i32, i32
  }
  func.func @transform_10(%arg0: i32) -> (i32, i32) {
    %c0_i32 = arith.constant 0 : i32
    %c0_i32_0 = arith.constant 0 : i32
    %c0_i32_1 = arith.constant 0 : i32
    return %c0_i32, %c0_i32_0 : i32, i32
  }
  func.func @transform_11(%arg0: i32) -> (i32, i32) {
    %c0_i32 = arith.constant 0 : i32
    %c0_i32_0 = arith.constant 0 : i32
    %c0_i32_1 = arith.constant 0 : i32
    return %c0_i32, %c0_i32_0 : i32, i32
  }
  func.func @transform_12(%arg0: i32) -> (i32, i32) {
    %c0_i32 = arith.constant 0 : i32
    %c0_i32_0 = arith.constant 0 : i32
    return %arg0, %c0_i32 : i32, i32
  }
}

</mosaic_0001>

<bundles_post_ra>
// kernel: tpu_custom_call.1
= control target key start
LH: loop header
LB: loop body
LE: loop exit
PB: predicated region body
PF: predicated region fallthrough
CT: control target
= control target key end

     0   :  { %17 = vsyncpa [#allocation3], 0  ;;  %s5130_s0 = inlined_call_operand.vmem [shape: f32[256,32], index: 0, kind: input, shape index: {}]   ;;  %s5131_s1 = inlined_call_operand.vmem [shape: f32[256,32], index: 1, kind: input, shape index: {}]   ;;  %s5132_s2 = inlined_call_operand.vmem [shape: f32[1,32], index: 2, kind: input, shape index: {}]   ;;  %s5133_s3 = inlined_call_operand.vmem [shape: f32[1,32], index: 3, kind: input, shape index: {}]   ;;  %s5134_s4 = inlined_call_operand.vmem [shape: bf16[32,640], index: 4, kind: input, shape index: {}]   ;;  %s5135_s5 = inlined_call_operand.vmem [shape: f32[1,640], index: 5, kind: input, shape index: {}]   ;;  %s5136_s6 = inlined_call_operand.vmem [shape: bf16[640,32], index: 6, kind: input, shape index: {}]   ;;  %s5137_s7 = inlined_call_operand.vmem [shape: f32[1,32], index: 7, kind: input, shape index: {}]   ;;  %s5138_s8 = inlined_call_operand.vmem [shape: bf16[64,640], index: 8, kind: input, shape index: {}]   ;;  %s5139_s9 = inlined_call_operand.vmem [shape: f32[1,640], index: 9, kind: input, shape index: {}]   ;;  %s5140_s10 = inlined_call_operand.vmem [shape: bf16[640,128], index: 10, kind: input, shape index: {}]   ;;  %s5141_s11 = inlined_call_operand.vmem [shape: f32[1,128], index: 11, kind: input, shape index: {}]   ;;  %s5142_s12 = inlined_call_operand.hbm [shape: f32[256,128], index: 12, kind: output, shape index: {}]  }
   0x1   :  { %19 = vsyncpa [#allocation3 + $0x1], 0  ;;  %s4036_s21 = smov 0   ;;  %s4038_s22 = smov 0  }
   0x2   :  { %s4040_s23 = smov 0   ;;  %s4042_s24 = smov 0  }
   0x3 LB: > { %5147 = sst [smem:[#allocation5_spill]] %s3960_s23  ;;  %s4057_s25 = sadd.s32 4294967295, %s3964_s24   ;;  %s3964_s24 = sphi %s4042_s24, %s5154_s24   ;;  %s3960_s23 = sphi %s4040_s23, %s5156_s23   ;;  %s3956_s22 = sphi %s4038_s22, %s5158_s22   ;;  %s3952_s21 = sphi %s4036_s21, %s5157_s21  }
   0x4   : > { %s3102_s26 = sadd.s32 4294967294, %s3964_s24   ;;  %s4061_s27 = sadd.s32 1, %s3964_s24  }
   0x5   : > { %5148 = sst [smem:[#allocation6_spill]] %s4061_s27  ;;  %s294_s28 = sadd.s32 1, %s3960_s23 }
   0x6   : > { %s291_s29 = ssub.s32 %s3964_s24, %s4061_s27  ;;  %p304_p0 = scmp.ne.s32.totalorder %s3960_s23, %s3956_s22 }
   0x7   : > { %p292_p1 = scmp.eq.s32.totalorder %s291_s29, 0  ;;  %p305_p2 = scmp.eq.s32.totalorder %s4057_s25, 1 }
   0x8   : > { %p310_p3 = scmp.ne.s32.totalorder %s3956_s22, %s3952_s21  ;;  %p311_p4 = scmp.eq.s32.totalorder %s3102_s26, 1 }
   0x9   : > { %s4072_s30 = scalar_select %p292_p1, %s3960_s23, %s294_s28  }
   0xa   : > { %p4074_p5 = por %p305_p2, %p304_p0  ;;  %p4078_p6 = por %p311_p4, %p310_p3 }
   0xb   : > { %5149 = sst [smem:[#allocation7_spill]] %s4072_s30  ;;  %p3105_p7 = scmp.ge.s32.totalorder %s3964_s24, 1 }
   0xc   : > { %s5151_s14 = scalar_select %p4078_p6, 1, 0 }
   0xd   : > { %p377_p8 = scmp.lt.s32.totalorder %s3964_s24, 3 }
   0xe   : > { %5152 = sst [smem:[#allocation8_spill]] %s5151_s14 }
   0xf   : > { %p378_p9 = pnand %p3105_p7, %p377_p8 }
  0x10   : > { %v3780_v0 = vld [vmem:[%s5134_s4 + $0x4] ss:$20 sps:$4 sm:$0xff] (!%p378_p9)   ;;  %s3107_s17 = sshll.u32 (!%p378_p9), %s4057_s25, 4  ;;  %v3782_v1 = vld [vmem:[%s5134_s4] ss:$20 sps:$4 sm:$0xff] (!%p378_p9)   ;;  %v3966_v2 = vmov (!%p378_p9), 0  }
  0x11   : > { %381 = sbr.rel (%p378_p9) target bundleno = 1083 (0x43b), region = 68  ;;  %720 = vmatprep.mubr.bf16.mxu0 (!%p378_p9), %v3966_v2  ;;  %p425_p10 = scmp.lt.s32.totalorder (!%p378_p9), %s3107_s17, 31  ;;  %833 = vmatprep.mubr.bf16.mxu1 (!%p378_p9), %v3966_v2  ;;  %v3783_v3 = vld [vmem:[%s5134_s4 + $0xc] ss:$20 sps:$4 sm:$0xff] (!%p378_p9)   ;;  %v3787_v5 = vld [vmem:[%s5134_s4 + $0x8] ss:$20 sps:$4 sm:$0xff] (!%p378_p9)  }
  0x12   : > { %688 = vmatprep.subr.bf16.mxu0 (!%p378_p9), %v3780_v0  ;;  %v3785_v4 = vld [vmem:[%s5134_s4 + $0x2c] ss:$20 sps:$4 sm:$0xff] (!%p378_p9)   ;;  %v3788_v6 = vld [vmem:[%s5134_s4 + $0x28] ss:$20 sps:$4 sm:$0xff] (!%p378_p9)   ;;  %801 = vmatprep.subr.bf16.mxu1 (!%p378_p9), %v3783_v3  ;;  %v3791_v8 = vld [vmem:[%s5134_s4 + $0x30] ss:$20 sps:$4 sm:$0xff] (!%p378_p9)  }
  0x13   : > { %689 = vmatpush1.bf16.msra.mxu0 (!%p378_p9), %v3782_v1  ;;  %v3789_v7 = vld [vmem:[%s5134_s4 + $0x34] ss:$20 sps:$4 sm:$0xff] (!%p378_p9)   ;;  %802 = vmatpush1.bf16.msra.mxu1 (!%p378_p9), %v3787_v5  ;;  %v3792_v9 = vld [vmem:[%s5134_s4 + $0x10] ss:$20 sps:$4 sm:$0xff] (!%p378_p9)   ;;  %v4117_v10 = vld [vmem:[%s5132_s2] ss:$0 sm:$0xff] (!%p378_p9) }
  0x14   : > { %690 = vmatprep.subr.bf16.mxu0 (!%p378_p9), %v3785_v4  ;;  %803 = vmatprep.subr.bf16.mxu1 (!%p378_p9), %v3789_v7  ;;  %v3794_v11 = vld [vmem:[%s5136_s6 + $0x40] sm:$0xff] (!%p378_p9)   ;;  %vm663_vm0 = vcmask (!%p378_p9), 261120   ;;  %v3793_v45 = vld [vmem:[%s5134_s4 + $0x38] ss:$20 sps:$4 sm:$0xff] (!%p378_p9)   ;;  %v3798_v4 = vld [vmem:[%s5136_s6 + $0x50] sm:$0xff] (!%p378_p9)   ;;  %s3967_s23 = smov (!%p378_p9), 32  }
  0x15   : > { %v4135_v12 = vld [vmem:[%s5133_s3] ss:$0 sm:$0xff] (!%p378_p9)  ;;  %v3796_v63 = vld [vmem:[%s5136_s6 + $0x48] sm:$0xff] (!%p378_p9)   ;;  %vm1992_vm1 = vcmask (!%p378_p9), 523264   ;;  %s3968_s14 = smov (!%p378_p9), [#allocation2]  }
  0x16   : > { %v3795_v55 = vld [vmem:[%s5136_s6] sm:$0xff] (!%p378_p9)   ;;  %v3797_v1 = vld [vmem:[%s5136_s6 + $0x8] sm:$0xff] (!%p378_p9)  }
  0x17   : > { %691 = vmatpush1.bf16.msra.mxu0 (!%p378_p9), %v3788_v6  ;;  %804 = vmatpush1.bf16.msra.mxu1 (!%p378_p9), %v3791_v8 }
  0x18   : > { %s5160_s17 = smov (!%p425_p10, %s3107_s17), 31  ;;  %3589 = vmatprep.subr.bf16.mxu0 %v3792_v9  ;;  %3289 = vmatprep.subr.bf16.mxu1 %v3794_v11 }
  0x19   : > { %s3108_s15 = sshll.u32 %s5160_s17, 3 }
  0x1a   : > { %s4125_s20 = scalar_lea.vmem %s5130_s0, %s3108_s15  ;;  %s4130_s17 = scalar_lea.vmem %s5131_s1, %s3108_s15 }
  0x1b   : > { %v4138_v13 = vld [vmem:[%s4125_s20] sm:$0xff]  ;;  %v4141_v14 = vld [vmem:[%s4125_s20 + $0x8] sm:$0xff]  ;;  %v4150_v20 = vld [vmem:[%s4125_s20 + $0x10] sm:$0xff]  ;;  %s3906_s15 = sshll.u32 %s3968_s14, 4  ;;  %s3907_s15 = int_to_ptr.vmem [resolvable:$false] %s3906_s15 }
  0x1c   : > { %v500_v15 = vld [vmem:[%s4130_s17] sm:$0xff]  ;;  %v461_v16 = vmul.f32 %v4117_v10, %v4138_v13  ;;  %v462_v17 = vmul.f32 %v4117_v10, %v4141_v14  ;;  %v501_v18 = vld [vmem:[%s4130_s17 + $0x8] sm:$0xff]  ;;  %v4153_v21 = vld [vmem:[%s4125_s20 + $0x18] sm:$0xff]  ;;  %v463_v23 = vmul.f32 %v4117_v10, %v4150_v20  ;;  %s3908_s16 = scalar_lea.vmem %s3907_s15, 4096 }
  0x1d   : > { %v516_v19 = vmul.f32 0.1, %v500_v15  ;;  %v517_v22 = vmul.f32 0.1, %v501_v18  ;;  %v464_v24 = vmul.f32 %v4117_v10, %v4153_v21  ;;  %v502_v25 = vld [vmem:[%s4130_s17 + $0x10] sm:$0xff]  ;;  %v503_v26 = vld [vmem:[%s4130_s17 + $0x18] sm:$0xff] }
  0x1e   : > { %v484_v27 = vadd.f32 %v4135_v12, %v461_v16  ;;  %v485_v28 = vadd.f32 %v4135_v12, %v462_v17  ;;  %v518_v30 = vmul.f32 0.1, %v502_v25  ;;  %v519_v32 = vmul.f32 0.1, %v503_v26  ;;  %v504_v35 = vld [vmem:[%s4130_s17 + $0x20] sm:$0xff]  ;;  %v4170_v41 = vld [vmem:[%s4125_s20 + $0x28] sm:$0xff] }
  0x1f   : > { %v532_v29 = vadd.f32 1.0, %v516_v19  ;;  %v533_v31 = vadd.f32 1.0, %v517_v22  ;;  %v486_v34 = vadd.f32 %v4135_v12, %v463_v23  ;;  %v487_v37 = vadd.f32 %v4135_v12, %v464_v24  ;;  %v4167_v40 = vld [vmem:[%s4125_s20 + $0x20] sm:$0xff]  ;;  %v505_v42 = vld [vmem:[%s4130_s17 + $0x28] sm:$0xff]  ;;  %v506_v51 = vld [vmem:[%s4130_s17 + $0x30] sm:$0xff] }
  0x20   : > { %v534_v38 = vadd.f32 1.0, %v518_v30  ;;  %v535_v39 = vadd.f32 1.0, %v519_v32  ;;  %v520_v44 = vmul.f32 0.1, %v504_v35  ;;  %v465_v46 = vmul.f32 %v4117_v10, %v4167_v40  ;;  %v4190_v53 = vld [vmem:[%s4125_s20 + $0x30] sm:$0xff]  ;;  %v507_v54 = vld [vmem:[%s4130_s17 + $0x38] sm:$0xff] }
  0x21   : > { %v548_v33 = vmul.f32 %v532_v29, %v484_v27  ;;  %v549_v36 = vmul.f32 %v533_v31, %v485_v28  ;;  %v466_v49 = vmul.f32 %v4117_v10, %v4170_v41  ;;  %v521_v50 = vmul.f32 0.1, %v505_v42  ;;  %v4198_v57 = vld [vmem:[%s4125_s20 + $0x38] sm:$0xff]  ;;  %v508_v62 = vld [vmem:[%s4130_s17 + $0x40] sm:$0xff]  ;;  %v509_v8 = vld [vmem:[%s4130_s17 + $0x48] sm:$0xff] }
  0x22   : > { %v550_v47 = vmul.f32 %v534_v38, %v486_v34  ;;  %v551_v48 = vmul.f32 %v535_v39, %v487_v37  ;;  %v536_v52 = vadd.f32 1.0, %v520_v44  ;;  %v488_v56 = vadd.f32 %v4135_v12, %v465_v46  ;;  %v4225_v16 = vld [vmem:[%s4125_s20 + $0x40] sm:$0xff]  ;;  %v3799_v17 = vld [vmem:[%s5136_s6 + $0x10] sm:$0xff]   ;;  %v3800_v18 = vld [vmem:[%s5136_s6 + $0x58] sm:$0xff]  }
  0x23   : > { %v4173_v43 = vpack.c.bf16 %v549_v36, %v548_v33  ;;  %v489_v59 = vadd.f32 %v4135_v12, %v466_v49  ;;  %v537_v60 = vadd.f32 1.0, %v521_v50  ;;  %v522_v61 = vmul.f32 0.1, %v506_v51  ;;  %v4234_v19 = vld [vmem:[%s4125_s20 + $0x48] sm:$0xff]  ;;  %v510_v26 = vld [vmem:[%s4130_s17 + $0x50] sm:$0xff]  ;;  %v3801_v27 = vld [vmem:[%s5136_s6 + $0x18] sm:$0xff]  }
  0x24   : > { %v4200_v58 = vpack.c.bf16 %v551_v48, %v550_v47  ;;  %v523_v0 = vmul.f32 0.1, %v507_v54  ;;  %v467_v3 = vmul.f32 %v4117_v10, %v4190_v53  ;;  %v552_v5 = vmul.f32 %v536_v52, %v488_v56  ;;  %v3804_v28 = vld [vmem:[%s5136_s6 + $0xc0] sm:$0xff]   ;;  %v511_v30 = vld [vmem:[%s4130_s17 + $0x58] sm:$0xff]  ;;  %v4263_v38 = vld [vmem:[%s4125_s20 + $0x50] sm:$0xff] }
  0x25   : > { %3123 = vmatmul.mubr.msk.bf16.vlgmr.msra.gmra.mrb[0].mxu0 %vm663_vm0, %v4173_v43  ;;  %3131 = vmatmul.mubr.msk.bf16.vlgmr.msra.gmra.mrb[0].mxu1 %vm663_vm0, %v4173_v43  ;;  %v553_v6 = vmul.f32 %v537_v60, %v489_v59  ;;  %v468_v7 = vmul.f32 %v4117_v10, %v4198_v57  ;;  %v538_v11 = vadd.f32 1.0, %v522_v61  ;;  %v525_v25 = vmul.f32 0.1, %v509_v8  ;;  %v3802_v31 = vld [vmem:[%s5136_s6 + $0x60] sm:$0xff]   ;;  %v4269_v44 = vld [vmem:[%s4125_s20 + $0x58] sm:$0xff]  ;;  %v3807_v46 = vld [vmem:[%s5136_s6 + $0x68] sm:$0xff]  }
  0x26   : > { %3590 = vmatpush3.bf16.msra.mxu0 %v3792_v9  ;;  %730 = vmatprep.mubr.bf16.mxu0 %v3966_v2  ;;  %v524_v9 = vmul.f32 0.1, %v508_v62  ;;  %v539_v15 = vadd.f32 1.0, %v523_v0  ;;  %v490_v23 = vadd.f32 %v4135_v12, %v467_v3  ;;  %v469_v29 = vmul.f32 %v4117_v10, %v4225_v16  ;;  %v512_v35 = vld [vmem:[%s4130_s17 + $0x60] sm:$0xff]  ;;  %v3809_v52 = vld [vmem:[%s5136_s6 + $0x28] sm:$0xff]  }
  0x27   : > { %843 = vmatprep.mubr.bf16.mxu1 %v3966_v2  ;;  %3591 = vmatprep.subr.bf16.mxu0 %v3793_v45  ;;  %v4236_v22 = vpack.c.bf16 %v553_v6, %v552_v5  ;;  %v491_v24 = vadd.f32 %v4135_v12, %v468_v7  ;;  %v470_v34 = vmul.f32 %v4117_v10, %v4234_v19  ;;  %v526_v36 = vmul.f32 0.1, %v510_v26  ;;  %v3803_v39 = vld [vmem:[%s5136_s6 + $0x20] sm:$0xff]  }
  0x28   : > { %3290 = vmatpush3.bf16.msra.mxu1 %v3795_v55  ;;  %v554_v32 = vmul.f32 %v538_v11, %v490_v23  ;;  %v540_v37 = vadd.f32 1.0, %v524_v9  ;;  %v541_v42 = vadd.f32 1.0, %v525_v25  ;;  %v492_v48 = vadd.f32 %v4135_v12, %v469_v29  ;;  %v3813_v55 = vld [vmem:[%s5136_s6 + $0x70] sm:$0xff]   ;;  %v4296_v62 = vld [vmem:[%s4125_s20 + $0x60] sm:$0xff]  ;;  %v515_v25 = vld [vmem:[%s4130_s17 + $0x78] sm:$0xff] }
  0x29   : > { %3291 = vmatprep.subr.bf16.mxu1 %v3796_v63  ;;  %v555_v33 = vmul.f32 %v539_v15, %v491_v24  ;;  %v493_v49 = vadd.f32 %v4135_v12, %v470_v34  ;;  %v527_v50 = vmul.f32 0.1, %v511_v30  ;;  %v528_v51 = vmul.f32 0.1, %v512_v35  ;;  %v3815_v63 = vld [vmem:[%s5136_s6 + $0x30] sm:$0xff]   ;;  %v4319_v24 = vld [vmem:[%s4125_s20 + $0x78] sm:$0xff] }
  0x2a   : > { %3592 = vmatpush3.bf16.msra.mxu0 %v3793_v45  ;;  %v513_v45 = vld [vmem:[%s4130_s17 + $0x68] sm:$0xff]  ;;  %v471_v54 = vmul.f32 %v4117_v10, %v4263_v38  ;;  %v556_v56 = vmul.f32 %v540_v37, %v492_v48  ;;  %v472_v60 = vmul.f32 %v4117_v10, %v4269_v44  ;;  %v473_v9 = vmul.f32 %v4117_v10, %v4296_v62  ;;  %v514_v23 = vld [vmem:[%s4130_s17 + $0x70] sm:$0xff] }
  0x2b   : > { %3353 = vmatprep.subr.bf16.mxu0 %v3804_v28  ;;  %v4275_v47 = vpack.c.bf16 %v555_v33, %v554_v32  ;;  %v557_v59 = vmul.f32 %v541_v42, %v493_v49  ;;  %v529_v61 = vmul.f32 0.1, %v513_v45  ;;  %v543_v3 = vadd.f32 1.0, %v527_v50  ;;  %v3806_v48 = vld [vmem:[%s5136_s6 + $0xc8] sm:$0xff]   ;;  %v3810_v50 = vld [vmem:[%s5136_s6 + $0xd0] sm:$0xff]  }
  0x2c   : > { %3292 = vmatpush3.bf16.msra.mxu1 %v3797_v1  ;;  %v494_v0 = vadd.f32 %v4135_v12, %v471_v54  ;;  %v542_v1 = vadd.f32 1.0, %v526_v36  ;;  %v495_v6 = vadd.f32 %v4135_v12, %v472_v60  ;;  %v544_v7 = vadd.f32 1.0, %v528_v51  ;;  %v3808_v49 = vld [vmem:[%s5136_s6 + $0x88] sm:$0xff]   ;;  %v3812_v51 = vld [vmem:[%s5136_s6 + $0xd8] sm:$0xff]  }
  0x2d   : > { %3124 = vmatmul.mubr.msk.bf16.gmra.mrb[4].mxu0 %vm663_vm0, %v4200_v58  ;;  %3132 = vmatmul.mubr.msk.bf16.gmra.mrb[4].mxu1 %vm663_vm0, %v4200_v58  ;;  %v568_v5 = vpack.c.bf16 %v557_v59, %v556_v56  ;;  %v545_v8 = vadd.f32 1.0, %v529_v61  ;;  %v530_v30 = vmul.f32 0.1, %v514_v23  ;;  %v476_v33 = vmul.f32 %v4117_v10, %v4319_v24  ;;  %v3820_v54 = vld [vmem:[%s5136_s6 + $0xa8] sm:$0xff]   ;;  %v3823_v56 = vld [vmem:[%s5136_s6 + $0xb0] sm:$0xff]   ;;  %v3819_v59 = vld [vmem:[%s5136_s6 + $0x78] sm:$0xff]  }
  0x2e   : > { %740 = vmatprep.mubr.bf16.mxu0 %v3966_v2  ;;  %853 = vmatprep.mubr.bf16.mxu1 %v3966_v2  ;;  %v558_v11 = vmul.f32 %v542_v1, %v494_v0  ;;  %v559_v15 = vmul.f32 %v543_v3, %v495_v6  ;;  %v531_v34 = vmul.f32 0.1, %v515_v25  ;;  %v3821_v60 = vld [vmem:[%s5136_s6 + $0x38] sm:$0xff]   ;;  %v4406_v0 = vld [vmem:[%s5136_s6 + $0x100] sm:$0xff]   ;;  %v3740_v1 = vpack.i.bf16 %v4141_v14, %v4138_v13 }
  0x2f   : > { %3293 = vmatprep.subr.bf16.mxu1 %v3798_v4  ;;  %v4303_v4 = vld [vmem:[%s4125_s20 + $0x68] sm:$0xff]  ;;  %v546_v35 = vadd.f32 1.0, %v530_v30  ;;  %v3824_v61 = vld [vmem:[%s5136_s6 + $0xf8] sm:$0xff]   ;;  %v3750_v3 = vpack.i.bf16 %v4170_v41, %v4167_v40  ;;  %v3755_v6 = vpack.i.bf16 %v4198_v57, %v4190_v53  ;;  %v3760_v13 = vpack.i.bf16 %v4234_v19, %v4225_v16  ;;  %v4432_v57 = vld [vmem:[%s5135_s5] sm:$0x1f] }
  0x30   : > { %3294 = vmatpush3.bf16.msra.mxu1 %v3799_v17  ;;  %v474_v17 = vmul.f32 %v4117_v10, %v4303_v4  ;;  %v569_v26 = vpack.c.bf16 %v559_v15, %v558_v11  ;;  %v547_v42 = vadd.f32 1.0, %v531_v34  ;;  %3741 = vrot.lane.b32.xlu0 %v3740_v1, %s3967_s23 }
  0x31   : > { %3295 = vmatprep.subr.bf16.mxu1 %v3800_v18  ;;  %v4315_v18 = vld [vmem:[%s4125_s20 + $0x70] sm:$0xff]  ;;  %3751 = vrot.lane.b32.xlu1 %v3750_v3, %s3967_s23  ;;  %s3278_s20 = sshll.u32 %s4057_s25, 11 }
  0x32   : > { %v497_v28 = vadd.f32 %v4135_v12, %v474_v17  ;;  %v475_v29 = vmul.f32 %v4117_v10, %v4315_v18  ;;  %v3775_v14 = vpack.i.bf16 %v4319_v24, %v4315_v18  ;;  %s5079_s29 = scalar_lea.hbm %s5142_s12, %s3278_s20 }
  0x34   : > { %3296 = vmatpush3.bf16.msra.mxu1 %v3801_v27  ;;  %v496_v27 = vadd.f32 %v4135_v12, %v473_v9  ;;  %v561_v32 = vmul.f32 %v545_v8, %v497_v28  ;;  %v498_v37 = vadd.f32 %v4135_v12, %v475_v29 }
  0x35   : > { %3125 = vmatmul.mubr.msk.bf16.gmra.mrb[8].mxu0 %vm663_vm0, %v4236_v22  ;;  %3133 = vmatmul.mubr.msk.bf16.gmra.mrb[8].mxu1 %vm663_vm0, %v4236_v22 }
  0x36   : > { %750 = vmatprep.mubr.bf16.mxu0 %v3966_v2  ;;  %863 = vmatprep.mubr.bf16.mxu1 %v3966_v2  ;;  %v562_v45 = vmul.f32 %v546_v35, %v498_v37 }
  0x37   : > { %3297 = vmatprep.subr.bf16.mxu1 %v3802_v31  ;;  %v560_v31 = vmul.f32 %v544_v7, %v496_v27  ;;  %3756 = vrot.lane.b32.xlu1 %v3755_v6, %s3967_s23  ;;  %v3765_v7 = vpack.i.bf16 %v4269_v44, %v4263_v38 }
  0x38   : > { %3298 = vmatpush3.bf16.msra.mxu1 %v3803_v39  ;;  %v499_v39 = vadd.f32 %v4135_v12, %v476_v33  ;;  %v3805_v12 = vld [vmem:[%s5136_s6 + $0x80] sm:$0xff]  }
  0x39   : > { %3299 = vmatprep.subr.bf16.mxu1 %v3807_v46  ;;  %v570_v36 = vpack.c.bf16 %v561_v32, %v560_v31 }
  0x3a   : > { %v563_v46 = vmul.f32 %v547_v42, %v499_v39 }
  0x3b   : > { %3766 = vrot.lane.b32.xlu1 %v3765_v7, %s3967_s23 }
  0x3c   : > { %3300 = vmatpush3.bf16.msra.mxu1 %v3809_v52  ;;  %v571_v10 = vpack.c.bf16 %v563_v46, %v562_v45  ;;  %v3817_v52 = vld [vmem:[%s5136_s6 + $0xa0] sm:$0xff]  }
  0x3d   : > { %3126 = vmatmul.mubr.msk.bf16.gmra.mrb[12].mxu0 %vm663_vm0, %v4275_v47  ;;  %3134 = vmatmul.mubr.msk.bf16.gmra.mrb[12].mxu1 %vm663_vm0, %v4275_v47 }
  0x3e   : > { %760 = vmatprep.mubr.bf16.mxu0 %v3966_v2  ;;  %873 = vmatprep.mubr.bf16.mxu1 %v3966_v2 }
  0x3f   : > { %3301 = vmatprep.subr.bf16.mxu1 %v3813_v55  ;;  %v3822_v55 = vld [vmem:[%s5136_s6 + $0xf0] sm:$0xff]   ;;  %3776 = vrot.lane.b32.xlu1 %v3775_v14, %s3967_s23 }
  0x40   : > { %3302 = vmatpush3.bf16.msra.mxu1 %v3815_v63  ;;  %v3825_v63 = vld [vmem:[%s5136_s6 + $0xb8] sm:$0xff]  }
  0x41   : > { %3303 = vmatprep.subr.bf16.mxu1 %v3819_v59 }
  0x44   : > { %3304 = vmatpush3.bf16.msra.mxu1 %v3821_v60 }
  0x45   : > { %3127 = vmatmul.mubr.msk.bf16.gmra.mrb[16].mxu0 %vm663_vm0, %v568_v5  ;;  %3135 = vmatmul.mubr.msk.bf16.gmra.mrb[16].mxu1 %vm663_vm0, %v568_v5 }
  0x46   : > { %770 = vmatprep.mubr.bf16.mxu0 %v3966_v2  ;;  %883 = vmatprep.mubr.bf16.mxu1 %v3966_v2 }
  0x47   : > { %3609 = vmatprep.subr.bf16.mxu1 %v4406_v0 }
  0x4d   : > { %3128 = vmatmul.mubr.msk.bf16.gmra.mrb[20].mxu0 %vm663_vm0, %v569_v26  ;;  %3136 = vmatmul.mubr.msk.bf16.gmra.mrb[20].mxu1 %vm663_vm0, %v569_v26 }
  0x4e   : > { %780 = vmatprep.mubr.bf16.mxu0 %v3966_v2  ;;  %893 = vmatprep.mubr.bf16.mxu1 %v3966_v2 }
  0x55   : > { %3129 = vmatmul.mubr.msk.bf16.gmra.mrb[24].mxu0 %vm663_vm0, %v570_v36  ;;  %3137 = vmatmul.mubr.msk.bf16.gmra.mrb[24].mxu1 %vm663_vm0, %v570_v36 }
  0x56   : > { %790 = vmatprep.mubr.bf16.mxu0 %v3966_v2  ;;  %903 = vmatprep.mubr.bf16.mxu1 %v3966_v2 }
  0x5d   : > { %3130 = vmatmul.mubr.msk.bf16.gmra.mrb[28].mxu0 %vm663_vm0, %v571_v10  ;;  %3138 = vmatmul.mubr.msk.bf16.gmra.mrb[28].mxu1 %vm663_vm0, %v571_v10 }
  0x5e   : > { %3593 = vmatprep.mubr.msk.bf16.mxu0 %vm663_vm0, %v4173_v43  ;;  %v3811_v43 = vld [vmem:[%s5136_s6 + $0x90] sm:$0xff]  }
  0x65   : > { %3594 = vmatmul.mubr.msk.bf16.vlgmr.msra.gmra.mrb[32].mxu0 %vm663_vm0, %v4200_v58  ;;  %v3814_v58 = vld [vmem:[%s5136_s6 + $0x98] sm:$0xff]  }
  0x66   : > { %3597 = vmatprep.mubr.msk.bf16.mxu0 %vm663_vm0, %v4236_v22  ;;  %3354 = vmatpush3.bf16.msra.mxu0 %v3805_v12  ;;  %v3816_v22 = vld [vmem:[%s5136_s6 + $0xe0] sm:$0xff]  }
  0x67   : > { %3355 = vmatprep.subr.bf16.mxu0 %v3806_v48 }
  0x6a   : > { %3356 = vmatpush3.bf16.msra.mxu0 %v3808_v49 }
  0x6b   : > { %3357 = vmatprep.subr.bf16.mxu0 %v3810_v50 }
  0x6d   : > { %3598 = vmatmul.mubr.msk.bf16.gmra.mrb[36].mxu0 %vm663_vm0, %v4275_v47  ;;  %v3818_v47 = vld [vmem:[%s5136_s6 + $0xe8] sm:$0xff]  }
  0x6e   : > { %3601 = vmatprep.mubr.msk.bf16.mxu0 %vm663_vm0, %v568_v5  ;;  %3358 = vmatpush3.bf16.msra.mxu0 %v3811_v43  ;;  %v3745_v5 = vpack.i.bf16 %v4153_v21, %v4150_v20  ;;  %v3770_v20 = vpack.i.bf16 %v4303_v4, %v4296_v62  ;;  %v586_v21 = vlaneseq }
  0x6f   : > { %3359 = vmatprep.subr.bf16.mxu0 %v3812_v51 }
  0x70   : > { %3746 = vrot.lane.b32.xlu0 %v3745_v5, %s3967_s23  ;;  %v4425_v40 = vshrl.u32 %v586_v21, 7 }
  0x72   : > { %3360 = vmatpush3.bf16.msra.mxu0 %v3814_v58  ;;  %v588_v41 = vsub.s32 0, %v4425_v40  ;;  %v596_v53 = vsub.s32 2, %v4425_v40  ;;  %v592_v16 = vsub.s32 1, %v4425_v40  ;;  %v600_v19 = vsub.s32 3, %v4425_v40 }
  0x73   : > { %3361 = vmatprep.subr.bf16.mxu0 %v3816_v22 }
  0x74   : > { %3761 = vrot.lane.b32.xlu0 %v3760_v13, %s3967_s23  ;;  %v4439_v38 = vrot.slane %v4432_v57, %v588_v41  ;;  %v4444_v44 = vrot.slane %v4432_v57, %v596_v53  ;;  %v4449_v62 = vrot.slane %v4432_v57, %v592_v16  ;;  %v4454_v4 = vrot.slane %v4432_v57, %v600_v19 }
  0x75   : > { %3602 = vmatmul.mubr.msk.bf16.gmra.mrb[40].mxu0 %vm663_vm0, %v569_v26 }
  0x76   : > { %3605 = vmatprep.mubr.msk.bf16.mxu0 %vm663_vm0, %v570_v36  ;;  %3362 = vmatpush3.bf16.msra.mxu0 %v3817_v52  ;;  %v3827_v52 = vld [vmem:[%s5136_s6 + $0x108] sm:$0xff]  }
  0x77   : > { %3363 = vmatprep.subr.bf16.mxu0 %v3818_v47 }
  0x78   : > { %3771 = vrot.lane.b32.xlu0 %v3770_v20, %s3967_s23  ;;  %v3828_v20 = vld [vmem:[%s5136_s6 + $0x110] sm:$0xff]   ;;  %s421_s23 = sand.u32 1, %s3956_s22  }
  0x79   : > { %s3106_s30 = sshll.u32 %s421_s23, 7  ;;  %s5089_s25 = scalar_lea.sflag [#allocation3], %s421_s23 }
  0x7a   : > { %3364 = vmatpush3.bf16.msra.mxu0 %v3820_v54  ;;  %s5050_s19 = scalar_lea.vmem [#allocation2], %s3106_s30 }
  0x7b   : > { %3365 = vmatprep.subr.bf16.mxu0 %v3822_v55  ;;  %s3028_s17 = sshll.u32 %s5050_s19, 4  ;;  %s5081_s17 = int_to_ptr.vmem [resolvable:$true] %s3028_s17 }
  0x7c   : > { %s3902_s27 = scalar_lea.vmem %s5081_s17, 2048  ;;  %p3909_p0 = scmp.lt.s32.totalorder %s5081_s17, %s3907_s15 }
  0x7d   : > { %3606 = vmatmul.mubr.msk.bf16.gmra.mrb[44].mxu0 %vm663_vm0, %v571_v10  ;;  %p3903_p11 = scmp.ne.s32.totalorder %s5081_s17, %s3902_s27  ;;  %p3910_p1 = scmp.lt.s32.totalorder %s3908_s16, %s3902_s27 }
  0x7e   : > { %3366 = vmatpush3.bf16.msra.mxu0 %v3823_v56 }
  0x7f   : > { %3367 = vmatprep.subr.bf16.mxu0 %v3824_v61  ;;  %p3904_p12 = pnand %p3903_p11, %p4074_p5  ;;  %p3911_p2 = por %p3910_p1, %p3909_p0 }
  0x81   : > { %p3905_p13 = pneg %p3904_p12 }
  0x82   : > { %3368 = vmatpush3.bf16.msra.mxu0 %v3825_v63 }
  0x83   : > { %p3912_p3 = pnand %p3911_p2, %p3905_p13 }
  0xf8   : > { %v722_v8 = vpop.f32.mrb[0].mxu0  ;;  %v835_v9 = vpop.f32.mrb[0].mxu1 }
  0xf9   : > { %v723_v11 = vadd.f32 %v722_v8, %v4439_v38  ;;  %v724_v15 = vpop.f32.mrb[1].mxu0  ;;  %v836_v17 = vadd.f32 %v835_v9, %v4444_v44  ;;  %v837_v18 = vpop.f32.mrb[1].mxu1 }
  0xfa   : > { %v725_v23 = vadd.f32 %v724_v15, %v4449_v62  ;;  %v726_v24 = vpop.f32.mrb[2].mxu0  ;;  %v838_v25 = vadd.f32 %v837_v18, %v4454_v4  ;;  %v839_v26 = vpop.f32.mrb[2].mxu1 }
  0xfb   : > { %v727_v27 = vadd.f32 %v726_v24, %v4439_v38  ;;  %v1013_v28 = vmax.f32 %v836_v17, 0.0  ;;  %v728_v29 = vpop.f32.mrb[3].mxu0  ;;  %v840_v30 = vadd.f32 %v839_v26, %v4444_v44  ;;  %v841_v31 = vpop.f32.mrb[3].mxu1  ;;  %v1011_v35 = vmax.f32 %v723_v11, 0.0 }
  0xfc   : > { %v729_v32 = vadd.f32 %v728_v29, %v4449_v62  ;;  %v1014_v33 = vmax.f32 %v838_v25, 0.0  ;;  %v842_v34 = vadd.f32 %v841_v31, %v4454_v4  ;;  %v1012_v39 = vmax.f32 %v725_v23, 0.0 }
  0xfd   : > { %v1016_v36 = vmax.f32 %v727_v27, 0.0  ;;  %v1018_v37 = vmax.f32 %v840_v30, 0.0 }
  0xfe   : > { %v1017_v42 = vmax.f32 %v729_v32, 0.0  ;;  %v1019_v45 = vmax.f32 %v842_v34, 0.0 }
  0xff   : > { %v1091_v46 = vpack.c.bf16 %v1016_v36, %v1011_v35  ;;  %v1093_v10 = vpack.c.bf16 %v1018_v37, %v1013_v28  ;;  %v3829_v28 = vld [vmem:[%s5136_s6 + $0x118] sm:$0xff]  }
 0x100   : > { %v1092_v12 = vpack.c.bf16 %v1017_v42, %v1012_v39  ;;  %v1094_v48 = vpack.c.bf16 %v1019_v45, %v1014_v33  ;;  %v732_v49 = vpop.f32.mrb[4].mxu0  ;;  %v845_v50 = vpop.f32.mrb[4].mxu1 }
 0x101   : > { %v733_v43 = vadd.f32 %v732_v49, %v4439_v38  ;;  %v734_v51 = vpop.f32.mrb[5].mxu0  ;;  %v846_v58 = vadd.f32 %v845_v50, %v4444_v44  ;;  %v847_v22 = vpop.f32.mrb[5].mxu1 }
 0x102   : > { %v735_v47 = vadd.f32 %v734_v51, %v4449_v62  ;;  %v736_v54 = vpop.f32.mrb[6].mxu0  ;;  %1490 = vmatprep.mubr.bf16.mxu1 %v1092_v12  ;;  %v848_v55 = vadd.f32 %v847_v22, %v4454_v4  ;;  %v849_v56 = vpop.f32.mrb[6].mxu1  ;;  %1587 = vmatprep.mubr.bf16.mxu0 %v1094_v48  ;;  %v3830_v48 = vld [vmem:[%s5136_s6 + $0x120] sm:$0xff]  }
 0x103   : > { %v737_v59 = vadd.f32 %v736_v54, %v4439_v38  ;;  %v1023_v60 = vmax.f32 %v846_v58, 0.0  ;;  %v738_v61 = vpop.f32.mrb[7].mxu0  ;;  %1491 = vmatmul.mubr.bf16.vlgmr.msra.gmra.mrb[32].mxu1 %v1091_v46  ;;  %v850_v63 = vadd.f32 %v849_v56, %v4444_v44  ;;  %v851_v1 = vpop.f32.mrb[7].mxu1  ;;  %1588 = vmatmul.mubr.bf16.vlgmr.msra.gmra.mrb[48].mxu0 %v1093_v10  ;;  %v1021_v7 = vmax.f32 %v733_v43, 0.0 }
 0x104   : > { %v739_v3 = vadd.f32 %v738_v61, %v4449_v62  ;;  %v1024_v5 = vmax.f32 %v848_v55, 0.0  ;;  %3610 = vmatpush3.bf16.msra.mxu1 %v4406_v0  ;;  %v852_v6 = vadd.f32 %v851_v1, %v4454_v4  ;;  %v1022_v21 = vmax.f32 %v735_v47, 0.0  ;;  %v3831_v61 = vld [vmem:[%s5136_s6 + $0x128] sm:$0xff]  }
 0x105   : > { %v1026_v13 = vmax.f32 %v737_v59, 0.0  ;;  %v1028_v14 = vmax.f32 %v850_v63, 0.0  ;;  %3611 = vmatprep.subr.bf16.mxu1 %v3827_v52 }
 0x106   : > { %v1027_v8 = vmax.f32 %v739_v3, 0.0  ;;  %v1029_v9 = vmax.f32 %v852_v6, 0.0 }
 0x107   : > { %v1096_v11 = vpack.c.bf16 %v1026_v13, %v1021_v7  ;;  %v1098_v15 = vpack.c.bf16 %v1028_v14, %v1023_v60 }
 0x108   : > { %v1097_v17 = vpack.c.bf16 %v1027_v8, %v1022_v21  ;;  %v1099_v18 = vpack.c.bf16 %v1029_v9, %v1024_v5  ;;  %v742_v23 = vpop.f32.mrb[8].mxu0  ;;  %v855_v24 = vpop.f32.mrb[8].mxu1  ;;  %3612 = vmatpush3.bf16.msra.mxu1 %v3827_v52 }
 0x109   : > { %v743_v0 = vadd.f32 %v742_v23, %v4439_v38  ;;  %v744_v25 = vpop.f32.mrb[9].mxu0  ;;  %v856_v26 = vadd.f32 %v855_v24, %v4444_v44  ;;  %v857_v27 = vpop.f32.mrb[9].mxu1  ;;  %3613 = vmatprep.subr.bf16.mxu1 %v3828_v20 }
 0x10a   : > { %v745_v29 = vadd.f32 %v744_v25, %v4449_v62  ;;  %v746_v30 = vpop.f32.mrb[10].mxu0  ;;  %1498 = vmatprep.mubr.bf16.mxu1 %v1097_v17  ;;  %v858_v31 = vadd.f32 %v857_v27, %v4454_v4  ;;  %v859_v32 = vpop.f32.mrb[10].mxu1  ;;  %1595 = vmatprep.mubr.bf16.mxu0 %v1099_v18  ;;  %v3832_v18 = vld [vmem:[%s5136_s6 + $0x130] sm:$0xff]  }
 0x10b   : > { %v747_v33 = vadd.f32 %v746_v30, %v4439_v38  ;;  %v1033_v34 = vmax.f32 %v856_v26, 0.0  ;;  %v748_v35 = vpop.f32.mrb[11].mxu0  ;;  %1499 = vmatmul.mubr.bf16.gmra.mrb[36].mxu1 %v1096_v11  ;;  %v860_v36 = vadd.f32 %v859_v32, %v4444_v44  ;;  %v861_v37 = vpop.f32.mrb[11].mxu1  ;;  %1596 = vmatmul.mubr.bf16.gmra.mrb[52].mxu0 %v1098_v15  ;;  %v1031_v46 = vmax.f32 %v743_v0, 0.0 }
 0x10c   : > { %v749_v39 = vadd.f32 %v748_v35, %v4449_v62  ;;  %v1034_v42 = vmax.f32 %v858_v31, 0.0  ;;  %v862_v45 = vadd.f32 %v861_v37, %v4454_v4  ;;  %3614 = vmatpush3.bf16.msra.mxu1 %v3828_v20  ;;  %v1032_v49 = vmax.f32 %v745_v29, 0.0  ;;  %v3833_v35 = vld [vmem:[%s5136_s6 + $0x138] sm:$0xff]  }
 0x10d   : > { %v1036_v10 = vmax.f32 %v747_v33, 0.0  ;;  %v1038_v12 = vmax.f32 %v860_v36, 0.0  ;;  %3615 = vmatprep.subr.bf16.mxu1 %v3829_v28 }
 0x10e   : > { %v1037_v50 = vmax.f32 %v749_v39, 0.0  ;;  %v1039_v43 = vmax.f32 %v862_v45, 0.0 }
 0x10f   : > { %v1101_v51 = vpack.c.bf16 %v1036_v10, %v1031_v46  ;;  %v1103_v58 = vpack.c.bf16 %v1038_v12, %v1033_v34 }
 0x110   : > { %v1102_v22 = vpack.c.bf16 %v1037_v50, %v1032_v49  ;;  %v1104_v52 = vpack.c.bf16 %v1039_v43, %v1034_v42  ;;  %v752_v47 = vpop.f32.mrb[12].mxu0  ;;  %v865_v54 = vpop.f32.mrb[12].mxu1  ;;  %3616 = vmatpush3.bf16.msra.mxu1 %v3829_v28 }
 0x111   : > { %v753_v55 = vadd.f32 %v752_v47, %v4439_v38  ;;  %v754_v56 = vpop.f32.mrb[13].mxu0  ;;  %v866_v59 = vadd.f32 %v865_v54, %v4444_v44  ;;  %v867_v60 = vpop.f32.mrb[13].mxu1  ;;  %3617 = vmatprep.subr.bf16.mxu1 %v3830_v48 }
 0x112   : > { %v755_v63 = vadd.f32 %v754_v56, %v4449_v62  ;;  %v756_v1 = vpop.f32.mrb[14].mxu0  ;;  %1506 = vmatprep.mubr.bf16.mxu1 %v1102_v22  ;;  %v868_v3 = vadd.f32 %v867_v60, %v4454_v4  ;;  %v869_v5 = vpop.f32.mrb[14].mxu1  ;;  %1603 = vmatprep.mubr.bf16.mxu0 %v1104_v52 }
 0x113   : > { %v757_v6 = vadd.f32 %v756_v1, %v4439_v38  ;;  %v1043_v7 = vmax.f32 %v866_v59, 0.0  ;;  %v758_v13 = vpop.f32.mrb[15].mxu0  ;;  %1507 = vmatmul.mubr.bf16.gmra.mrb[40].mxu1 %v1101_v51  ;;  %v870_v14 = vadd.f32 %v869_v5, %v4444_v44  ;;  %v871_v20 = vpop.f32.mrb[15].mxu1  ;;  %1604 = vmatmul.mubr.bf16.gmra.mrb[56].mxu0 %v1103_v58  ;;  %v1041_v11 = vmax.f32 %v753_v55, 0.0 }
 0x114   : > { %v759_v21 = vadd.f32 %v758_v13, %v4449_v62  ;;  %v1044_v8 = vmax.f32 %v868_v3, 0.0  ;;  %v872_v9 = vadd.f32 %v871_v20, %v4454_v4  ;;  %3618 = vmatpush3.bf16.msra.mxu1 %v3830_v48  ;;  %v1042_v23 = vmax.f32 %v755_v63, 0.0 }
 0x115   : > { %v1046_v15 = vmax.f32 %v757_v6, 0.0  ;;  %v1048_v17 = vmax.f32 %v870_v14, 0.0  ;;  %3619 = vmatprep.subr.bf16.mxu1 %v3831_v61 }
 0x116   : > { %v1047_v24 = vmax.f32 %v759_v21, 0.0  ;;  %v1049_v0 = vmax.f32 %v872_v9, 0.0 }
 0x117   : > { %v1106_v25 = vpack.c.bf16 %v1046_v15, %v1041_v11  ;;  %v1108_v26 = vpack.c.bf16 %v1048_v17, %v1043_v7 }
 0x118   : > { %v1107_v27 = vpack.c.bf16 %v1047_v24, %v1042_v23  ;;  %v1109_v28 = vpack.c.bf16 %v1049_v0, %v1044_v8  ;;  %v762_v29 = vpop.f32.mrb[16].mxu0  ;;  %v875_v30 = vpop.f32.mrb[16].mxu1  ;;  %3620 = vmatpush3.bf16.msra.mxu1 %v3831_v61 }
 0x119   : > { %v763_v31 = vadd.f32 %v762_v29, %v4439_v38  ;;  %v764_v32 = vpop.f32.mrb[17].mxu0  ;;  %v876_v33 = vadd.f32 %v875_v30, %v4444_v44  ;;  %v877_v34 = vpop.f32.mrb[17].mxu1  ;;  %3621 = vmatprep.subr.bf16.mxu1 %v3832_v18 }
 0x11a   : > { %v765_v36 = vadd.f32 %v764_v32, %v4449_v62  ;;  %v766_v37 = vpop.f32.mrb[18].mxu0  ;;  %1514 = vmatprep.mubr.bf16.mxu1 %v1107_v27  ;;  %v878_v39 = vadd.f32 %v877_v34, %v4454_v4  ;;  %v879_v42 = vpop.f32.mrb[18].mxu1  ;;  %1611 = vmatprep.mubr.bf16.mxu0 %v1109_v28 }
 0x11b   : > { %v767_v45 = vadd.f32 %v766_v37, %v4439_v38  ;;  %v1053_v46 = vmax.f32 %v876_v33, 0.0  ;;  %v768_v10 = vpop.f32.mrb[19].mxu0  ;;  %1515 = vmatmul.mubr.bf16.gmra.mrb[44].mxu1 %v1106_v25  ;;  %v880_v12 = vadd.f32 %v879_v42, %v4444_v44  ;;  %v881_v48 = vpop.f32.mrb[19].mxu1  ;;  %1612 = vmatmul.mubr.bf16.gmra.mrb[60].mxu0 %v1108_v26  ;;  %v1051_v51 = vmax.f32 %v763_v31, 0.0 }
 0x11c   : > { %v769_v49 = vadd.f32 %v768_v10, %v4449_v62  ;;  %v1054_v50 = vmax.f32 %v878_v39, 0.0  ;;  %v882_v43 = vadd.f32 %v881_v48, %v4454_v4  ;;  %3622 = vmatpush3.bf16.msra.mxu1 %v3832_v18  ;;  %v1052_v52 = vmax.f32 %v765_v36, 0.0 }
 0x11d   : > { %v1056_v58 = vmax.f32 %v767_v45, 0.0  ;;  %v1058_v22 = vmax.f32 %v880_v12, 0.0  ;;  %3623 = vmatprep.subr.bf16.mxu1 %v3833_v35 }
 0x11e   : > { %v1057_v47 = vmax.f32 %v769_v49, 0.0  ;;  %v1059_v54 = vmax.f32 %v882_v43, 0.0 }
 0x11f   : > { %v1111_v55 = vpack.c.bf16 %v1056_v58, %v1051_v51  ;;  %v1113_v56 = vpack.c.bf16 %v1058_v22, %v1053_v46 }
 0x120   : > { %v1112_v59 = vpack.c.bf16 %v1057_v47, %v1052_v52  ;;  %v1114_v60 = vpack.c.bf16 %v1059_v54, %v1054_v50  ;;  %v772_v61 = vpop.f32.mrb[20].mxu0  ;;  %v885_v63 = vpop.f32.mrb[20].mxu1  ;;  %3624 = vmatpush3.bf16.msra.mxu1 %v3833_v35 }
 0x121   : > { %v773_v1 = vadd.f32 %v772_v61, %v4439_v38  ;;  %v774_v3 = vpop.f32.mrb[21].mxu0  ;;  %v886_v5 = vadd.f32 %v885_v63, %v4444_v44  ;;  %v887_v6 = vpop.f32.mrb[21].mxu1 }
 0x122   : > { %v775_v7 = vadd.f32 %v774_v3, %v4449_v62  ;;  %v776_v13 = vpop.f32.mrb[22].mxu0  ;;  %1522 = vmatprep.mubr.bf16.mxu1 %v1112_v59  ;;  %v888_v14 = vadd.f32 %v887_v6, %v4454_v4  ;;  %v889_v20 = vpop.f32.mrb[22].mxu1  ;;  %1619 = vmatprep.mubr.bf16.mxu0 %v1114_v60 }
 0x123   : > { %v777_v21 = vadd.f32 %v776_v13, %v4439_v38  ;;  %v1063_v8 = vmax.f32 %v886_v5, 0.0  ;;  %v778_v9 = vpop.f32.mrb[23].mxu0  ;;  %1523 = vmatmul.mubr.bf16.gmra.mrb[48].mxu1 %v1111_v55  ;;  %v890_v11 = vadd.f32 %v889_v20, %v4444_v44  ;;  %v891_v15 = vpop.f32.mrb[23].mxu1  ;;  %1620 = vmatmul.mubr.bf16.gmra.mrb[64].mxu0 %v1113_v56  ;;  %v1061_v24 = vmax.f32 %v773_v1, 0.0 }
 0x124   : > { %v779_v17 = vadd.f32 %v778_v9, %v4449_v62  ;;  %v1064_v18 = vmax.f32 %v888_v14, 0.0  ;;  %v892_v23 = vadd.f32 %v891_v15, %v4454_v4  ;;  %v1062_v26 = vmax.f32 %v775_v7, 0.0 }
 0x125   : > { %v1066_v0 = vmax.f32 %v777_v21, 0.0  ;;  %v1068_v25 = vmax.f32 %v890_v11, 0.0  ;;  %v604_v20 = vsub.s32 4, %v4425_v40 }
 0x126   : > { %v1067_v27 = vmax.f32 %v779_v17, 0.0  ;;  %v1069_v28 = vmax.f32 %v892_v23, 0.0 }
 0x127   : > { %v1116_v29 = vpack.c.bf16 %v1066_v0, %v1061_v24  ;;  %v1118_v30 = vpack.c.bf16 %v1068_v25, %v1063_v8 }
 0x128   : > { %v1117_v31 = vpack.c.bf16 %v1067_v27, %v1062_v26  ;;  %v1119_v32 = vpack.c.bf16 %v1069_v28, %v1064_v18  ;;  %v782_v33 = vpop.f32.mrb[24].mxu0  ;;  %v895_v34 = vpop.f32.mrb[24].mxu1 }
 0x129   : > { %v783_v35 = vadd.f32 %v782_v33, %v4439_v38  ;;  %v784_v36 = vpop.f32.mrb[25].mxu0  ;;  %v896_v37 = vadd.f32 %v895_v34, %v4444_v44  ;;  %v897_v39 = vpop.f32.mrb[25].mxu1 }
 0x12a   : > { %v785_v42 = vadd.f32 %v784_v36, %v4449_v62  ;;  %v786_v45 = vpop.f32.mrb[26].mxu0  ;;  %1530 = vmatprep.mubr.bf16.mxu1 %v1117_v31  ;;  %v898_v46 = vadd.f32 %v897_v39, %v4454_v4  ;;  %v899_v10 = vpop.f32.mrb[26].mxu1  ;;  %1627 = vmatprep.mubr.bf16.mxu0 %v1119_v32 }
 0x12b   : > { %v787_v12 = vadd.f32 %v786_v45, %v4439_v38  ;;  %v1073_v48 = vmax.f32 %v896_v37, 0.0  ;;  %v788_v49 = vpop.f32.mrb[27].mxu0  ;;  %1531 = vmatmul.mubr.bf16.gmra.mrb[52].mxu1 %v1116_v29  ;;  %v900_v50 = vadd.f32 %v899_v10, %v4444_v44  ;;  %v901_v43 = vpop.f32.mrb[27].mxu1  ;;  %1628 = vmatmul.mubr.bf16.gmra.mrb[68].mxu0 %v1118_v30  ;;  %v1071_v52 = vmax.f32 %v783_v35, 0.0 }
 0x12c   : > { %v789_v51 = vadd.f32 %v788_v49, %v4449_v62  ;;  %v1074_v58 = vmax.f32 %v898_v46, 0.0  ;;  %v902_v22 = vadd.f32 %v901_v43, %v4454_v4  ;;  %v1072_v55 = vmax.f32 %v785_v42, 0.0 }
 0x12d   : > { %v1076_v47 = vmax.f32 %v787_v12, 0.0  ;;  %v1078_v54 = vmax.f32 %v900_v50, 0.0  ;;  %v4546_v30 = vrot.slane %v4432_v57, %v604_v20 }
 0x12e   : > { %v1077_v56 = vmax.f32 %v789_v51, 0.0  ;;  %v1079_v59 = vmax.f32 %v902_v22, 0.0 }
 0x12f   : > { %v1121_v60 = vpack.c.bf16 %v1076_v47, %v1071_v52  ;;  %v1123_v61 = vpack.c.bf16 %v1078_v54, %v1073_v48 }
 0x130   : > { %v1122_v63 = vpack.c.bf16 %v1077_v56, %v1072_v55  ;;  %v1124_v1 = vpack.c.bf16 %v1079_v59, %v1074_v58  ;;  %v792_v3 = vpop.f32.mrb[28].mxu0  ;;  %v905_v5 = vpop.f32.mrb[28].mxu1 }
 0x131   : > { %v793_v6 = vadd.f32 %v792_v3, %v4439_v38  ;;  %v794_v7 = vpop.f32.mrb[29].mxu0  ;;  %v906_v13 = vadd.f32 %v905_v5, %v4444_v44  ;;  %v907_v14 = vpop.f32.mrb[29].mxu1 }
 0x132   : > { %v795_v21 = vadd.f32 %v794_v7, %v4449_v62  ;;  %v796_v8 = vpop.f32.mrb[30].mxu0  ;;  %1538 = vmatprep.mubr.bf16.mxu1 %v1122_v63  ;;  %v908_v9 = vadd.f32 %v907_v14, %v4454_v4  ;;  %v909_v11 = vpop.f32.mrb[30].mxu1  ;;  %1635 = vmatprep.mubr.bf16.mxu0 %v1124_v1 }
 0x133   : > { %v797_v15 = vadd.f32 %v796_v8, %v4439_v38  ;;  %v1083_v17 = vmax.f32 %v906_v13, 0.0  ;;  %v798_v18 = vpop.f32.mrb[31].mxu0  ;;  %1539 = vmatmul.mubr.bf16.gmra.mrb[56].mxu1 %v1121_v60  ;;  %v910_v23 = vadd.f32 %v909_v11, %v4444_v44  ;;  %v911_v24 = vpop.f32.mrb[31].mxu1  ;;  %1636 = vmatmul.mubr.bf16.gmra.mrb[72].mxu0 %v1123_v61  ;;  %v1081_v27 = vmax.f32 %v793_v6, 0.0 }
 0x134   : > { %v799_v0 = vadd.f32 %v798_v18, %v4449_v62  ;;  %v1084_v25 = vmax.f32 %v908_v9, 0.0  ;;  %v912_v26 = vadd.f32 %v911_v24, %v4454_v4  ;;  %v1082_v38 = vmax.f32 %v795_v21, 0.0 }
 0x135   : > { %v1086_v28 = vmax.f32 %v797_v15, 0.0  ;;  %v1088_v29 = vmax.f32 %v910_v23, 0.0 }
 0x136   : > { %v1087_v31 = vmax.f32 %v799_v0, 0.0  ;;  %v1089_v32 = vmax.f32 %v912_v26, 0.0 }
 0x137   : > { %v1126_v33 = vpack.c.bf16 %v1086_v28, %v1081_v27  ;;  %v1128_v44 = vpack.c.bf16 %v1088_v29, %v1083_v17 }
 0x138   : > { %v1127_v34 = vpack.c.bf16 %v1087_v31, %v1082_v38  ;;  %v1129_v35 = vpack.c.bf16 %v1089_v32, %v1084_v25  ;;  %v3595_v36 = vpop.f32.mrb[32].mxu0 }
 0x139   : > { %v957_v62 = vadd.f32 %v3595_v36, %v4546_v30  ;;  %v948_v37 = vpop.f32.mrb[33].mxu0  ;;  %v3834_v36 = vld [vmem:[%s5138_s8] ss:$20 sps:$4 sm:$0xff]  }
 0x13a   : > { %v949_v4 = vadd.f32 %v948_v37, %v4546_v30  ;;  %v3596_v39 = vpop.f32.mrb[34].mxu0  ;;  %1546 = vmatprep.mubr.bf16.mxu1 %v1127_v34  ;;  %1643 = vmatprep.mubr.bf16.mxu0 %v1129_v35  ;;  %v3839_v37 = vld [vmem:[%s5138_s8 + $0x2c] ss:$20 sps:$4 sm:$0xff]  }
 0x13b   : > { %v960_v42 = vadd.f32 %v3596_v39, %v4546_v30  ;;  %v951_v57 = vpop.f32.mrb[35].mxu0  ;;  %1547 = vmatmul.mubr.bf16.gmra.mrb[60].mxu1 %v1126_v33  ;;  %1644 = vmatmul.mubr.bf16.gmra.mrb[76].mxu0 %v1128_v44  ;;  %v1025_v46 = vmax.f32 %v957_v62, 0.0  ;;  %v3836_v62 = vld [vmem:[%s5138_s8 + $0x4] ss:$20 sps:$4 sm:$0xff]   ;;  %v3842_v39 = vld [vmem:[%s5138_s8 + $0x54] ss:$20 sps:$4 sm:$0xff]  }
 0x13c   : > { %v952_v45 = vadd.f32 %v951_v57, %v4546_v30  ;;  %2049 = vmatprep.mubr.bf16.mxu0 %v3966_v2  ;;  %v1015_v12 = vmax.f32 %v949_v4, 0.0  ;;  %2017 = vmatprep.subr.bf16.mxu0 %v3836_v62  ;;  %v3840_v4 = vld [vmem:[%s5138_s8 + $0x50] ss:$20 sps:$4 sm:$0xff]   ;;  %v3843_v57 = vld [vmem:[%s5138_s8 + $0x78] ss:$20 sps:$4 sm:$0xff]  }
 0x13d   : > { %v1030_v10 = vmax.f32 %v960_v42, 0.0  ;;  %2018 = vmatpush1.bf16.msra.mxu0 %v3834_v36  ;;  %v3848_v42 = vld [vmem:[%s5138_s8 + $0xc] ss:$20 sps:$4 sm:$0xff]  }
 0x13e   : > { %v1020_v48 = vmax.f32 %v952_v45, 0.0  ;;  %2019 = vmatprep.subr.bf16.mxu0 %v3839_v37  ;;  %v3845_v45 = vld [vmem:[%s5138_s8 + $0x7c] ss:$20 sps:$4 sm:$0xff]   ;;  %2130 = vmatprep.subr.bf16.mxu1 %v3848_v42 }
 0x13f   : > { %v1100_v49 = vpack.c.bf16 %v1030_v10, %v1025_v46  ;;  %v3846_v46 = vld [vmem:[%s5138_s8 + $0x8] ss:$20 sps:$4 sm:$0xff]  }
 0x140   : > { %v1095_v50 = vpack.c.bf16 %v1020_v48, %v1015_v12  ;;  %v3599_v43 = vpop.f32.mrb[36].mxu0  ;;  %v3851_v10 = vld [vmem:[%s5138_s8 + $0x34] ss:$20 sps:$4 sm:$0xff]   ;;  %v3849_v12 = vld [vmem:[%s5138_s8 + $0x30] ss:$20 sps:$4 sm:$0xff]  }
 0x141   : > { %v973_v51 = vadd.f32 %v3599_v43, %v4546_v30  ;;  %v964_v58 = vpop.f32.mrb[37].mxu0  ;;  %v3854_v48 = vld [vmem:[%s5138_s8 + $0x5c] ss:$20 sps:$4 sm:$0xff]   ;;  %v3855_v43 = vld [vmem:[%s5138_s8 + $0x80] ss:$20 sps:$4 sm:$0xff]  }
 0x142   : > { %v965_v22 = vadd.f32 %v964_v58, %v4546_v30  ;;  %v3600_v52 = vpop.f32.mrb[38].mxu0  ;;  %3625 = vmatprep.mubr.bf16.mxu1 %v1095_v50  ;;  %v3857_v50 = vld [vmem:[%s5138_s8 + $0x84] ss:$20 sps:$4 sm:$0xff]  }
 0x143   : > { %v1045_v47 = vmax.f32 %v973_v51, 0.0  ;;  %v976_v54 = vadd.f32 %v3600_v52, %v4546_v30  ;;  %v967_v55 = vpop.f32.mrb[39].mxu0  ;;  %3626 = vmatmul.mubr.bf16.vlgmr.msra.gmra.mrb[64].mxu1 %v1100_v49  ;;  %v3852_v49 = vld [vmem:[%s5138_s8 + $0x58] ss:$20 sps:$4 sm:$0xff]   ;;  %v4617_v51 = vld [vmem:[%s5138_s8 + $0x10] ss:$20 sps:$4 sm:$0xff]  }
 0x144   : > { %v1035_v56 = vmax.f32 %v965_v22, 0.0  ;;  %v968_v59 = vadd.f32 %v967_v55, %v4546_v30  ;;  %2131 = vmatpush1.bf16.msra.mxu1 %v3846_v46  ;;  %v4623_v52 = vld [vmem:[%s5137_s7] ss:$0 sm:$0xff] }
 0x145   : > { %v1050_v60 = vmax.f32 %v976_v54, 0.0  ;;  %2132 = vmatprep.subr.bf16.mxu1 %v3851_v10 }
 0x146   : > { %v1040_v61 = vmax.f32 %v968_v59, 0.0 }
 0x147   : > { %v1110_v63 = vpack.c.bf16 %v1050_v60, %v1045_v47 }
 0x148   : > { %v1105_v1 = vpack.c.bf16 %v1040_v61, %v1035_v56  ;;  %v3603_v3 = vpop.f32.mrb[40].mxu0  ;;  %2133 = vmatpush1.bf16.msra.mxu1 %v3849_v12 }
 0x149   : > { %v989_v5 = vadd.f32 %v3603_v3, %v4546_v30  ;;  %v980_v6 = vpop.f32.mrb[41].mxu0  ;;  %2134 = vmatprep.subr.bf16.mxu1 %v3854_v48 }
 0x14a   : > { %v981_v7 = vadd.f32 %v980_v6, %v4546_v30  ;;  %v3604_v13 = vpop.f32.mrb[42].mxu0  ;;  %3629 = vmatprep.mubr.bf16.mxu1 %v1105_v1 }
 0x14b   : > { %v1065_v14 = vmax.f32 %v989_v5, 0.0  ;;  %v992_v21 = vadd.f32 %v3604_v13, %v4546_v30  ;;  %v983_v8 = vpop.f32.mrb[43].mxu0  ;;  %3630 = vmatmul.mubr.bf16.gmra.mrb[68].mxu1 %v1110_v63 }
 0x14c   : > { %v1055_v9 = vmax.f32 %v981_v7, 0.0  ;;  %v984_v11 = vadd.f32 %v983_v8, %v4546_v30  ;;  %2135 = vmatpush1.bf16.msra.mxu1 %v3852_v49 }
 0x14d   : > { %v1070_v15 = vmax.f32 %v992_v21, 0.0  ;;  %2136 = vmatprep.subr.bf16.mxu1 %v3857_v50 }
 0x14e   : > { %v1060_v17 = vmax.f32 %v984_v11, 0.0 }
 0x14f   : > { %v1120_v18 = vpack.c.bf16 %v1070_v15, %v1065_v14 }
 0x150   : > { %v1115_v23 = vpack.c.bf16 %v1060_v17, %v1055_v9  ;;  %v3607_v24 = vpop.f32.mrb[44].mxu0  ;;  %2137 = vmatpush1.bf16.msra.mxu1 %v3855_v43 }
 0x151   : > { %v1005_v0 = vadd.f32 %v3607_v24, %v4546_v30  ;;  %v996_v25 = vpop.f32.mrb[45].mxu0 }
 0x152   : > { %v997_v26 = vadd.f32 %v996_v25, %v4546_v30  ;;  %v3608_v27 = vpop.f32.mrb[46].mxu0  ;;  %3633 = vmatprep.mubr.bf16.mxu1 %v1115_v23 }
 0x153   : > { %v1085_v28 = vmax.f32 %v1005_v0, 0.0  ;;  %v1008_v29 = vadd.f32 %v3608_v27, %v4546_v30  ;;  %v999_v38 = vpop.f32.mrb[47].mxu0  ;;  %3634 = vmatmul.mubr.bf16.gmra.mrb[72].mxu1 %v1120_v18 }
 0x154   : > { %v1075_v31 = vmax.f32 %v997_v26, 0.0  ;;  %v1000_v32 = vadd.f32 %v999_v38, %v4546_v30  ;;  %v3837_v30 = vld [vmem:[%s5138_s8 + $0x28] ss:$20 sps:$4 sm:$0xff]  }
 0x155   : > { %v1090_v33 = vmax.f32 %v1008_v29, 0.0  ;;  %2020 = vmatpush1.bf16.msra.mxu0 %v3837_v30 }
 0x156   : > { %v1080_v44 = vmax.f32 %v1000_v32, 0.0  ;;  %2021 = vmatprep.subr.bf16.mxu0 %v3842_v39 }
 0x157   : > { %v1130_v34 = vpack.c.bf16 %v1090_v33, %v1085_v28 }
 0x158   : > { %v1125_v35 = vpack.c.bf16 %v1080_v44, %v1075_v31 }
 0x159   : > { %2022 = vmatpush1.bf16.msra.mxu0 %v3840_v4 }
 0x15a   : > { %3637 = vmatprep.mubr.bf16.mxu1 %v1125_v35  ;;  %2023 = vmatprep.subr.bf16.mxu0 %v3845_v45 }
 0x15b   : > { %3638 = vmatmul.mubr.bf16.gmra.mrb[76].mxu1 %v1130_v34 }
 0x15c   : > { %2162 = vmatprep.mubr.bf16.mxu1 %v3966_v2 }
 0x15d   : > { %2024 = vmatpush1.bf16.msra.mxu0 %v3843_v57 }
 0x15e   : > { %3641 = vmatprep.subr.bf16.mxu0 %v4617_v51 }
 0x1d6   : > { %v3305_v58 = vpop.f32.mrb[32].mxu1  ;;  %v3369_v22 = vpop.f32.mrb[48].mxu0 }
 0x1d7   : > { %v3306_v47 = vpop.f32.mrb[33].mxu1  ;;  %v3370_v54 = vpop.f32.mrb[49].mxu0 }
 0x1d8   : > { %v3307_v55 = vadd.f32 %v3306_v47, %v3305_v58  ;;  %v3308_v56 = vpop.f32.mrb[34].mxu1  ;;  %v3371_v59 = vadd.f32 %v3370_v54, %v3369_v22  ;;  %v3372_v60 = vpop.f32.mrb[50].mxu0 }
 0x1d9   : > { %v3309_v61 = vpop.f32.mrb[35].mxu1  ;;  %v3373_v63 = vpop.f32.mrb[51].mxu0 }
 0x1da   : > { %v1493_v1 = vadd.f32 %v3307_v55, %v4623_v52  ;;  %v3310_v3 = vadd.f32 %v3309_v61, %v3308_v56  ;;  %v3374_v5 = vadd.f32 %v3373_v63, %v3372_v60 }
 0x1dc   : > { %v1496_v6 = vadd.f32 %v3310_v3, %v4623_v52  ;;  %v4627_v7 = vadd.f32 %v3371_v59, %v1493_v1 }
 0x1de   : > { %v3311_v13 = vpop.f32.mrb[36].mxu1  ;;  %v3375_v14 = vpop.f32.mrb[52].mxu0  ;;  %v4629_v21 = vadd.f32 %v3374_v5, %v1496_v6  ;;  %v3862_v6 = vld [vmem:[%s5140_s10 + $0x40] sm:$0xff]  }
 0x1df   : > { %v3312_v8 = vpop.f32.mrb[37].mxu1  ;;  %v3376_v9 = vpop.f32.mrb[53].mxu0  ;;  %3445 = vmatprep.subr.bf16.mxu1 %v3862_v6 }
 0x1e0   : > { %v3313_v11 = vadd.f32 %v3312_v8, %v3311_v13  ;;  %v3314_v15 = vpop.f32.mrb[38].mxu1  ;;  %v3377_v17 = vadd.f32 %v3376_v9, %v3375_v14  ;;  %v3378_v18 = vpop.f32.mrb[54].mxu0 }
 0x1e1   : > { %v3315_v23 = vpop.f32.mrb[39].mxu1  ;;  %v3379_v24 = vpop.f32.mrb[55].mxu0 }
 0x1e2   : > { %v1501_v0 = vadd.f32 %v3313_v11, %v4623_v52  ;;  %v3316_v25 = vadd.f32 %v3315_v23, %v3314_v15  ;;  %v3380_v26 = vadd.f32 %v3379_v24, %v3378_v18 }
 0x1e4   : > { %v1504_v27 = vadd.f32 %v3316_v25, %v4623_v52  ;;  %v4633_v28 = vadd.f32 %v3377_v17, %v1501_v0 }
 0x1e6   : > { %v3317_v29 = vpop.f32.mrb[40].mxu1  ;;  %v3381_v38 = vpop.f32.mrb[56].mxu0  ;;  %v4635_v31 = vadd.f32 %v3380_v26, %v1504_v27 }
 0x1e7   : > { %v3318_v32 = vpop.f32.mrb[41].mxu1  ;;  %v3382_v33 = vpop.f32.mrb[57].mxu0 }
 0x1e8   : > { %v3319_v44 = vadd.f32 %v3318_v32, %v3317_v29  ;;  %v3320_v34 = vpop.f32.mrb[42].mxu1  ;;  %v3383_v35 = vadd.f32 %v3382_v33, %v3381_v38  ;;  %v3384_v36 = vpop.f32.mrb[58].mxu0 }
 0x1e9   : > { %v3321_v62 = vpop.f32.mrb[43].mxu1  ;;  %v3385_v30 = vpop.f32.mrb[59].mxu0 }
 0x1ea   : > { %v1509_v37 = vadd.f32 %v3319_v44, %v4623_v52  ;;  %v3322_v4 = vadd.f32 %v3321_v62, %v3320_v34  ;;  %v3386_v39 = vadd.f32 %v3385_v30, %v3384_v36 }
 0x1ec   : > { %v1512_v42 = vadd.f32 %v3322_v4, %v4623_v52  ;;  %v4639_v57 = vadd.f32 %v3383_v35, %v1509_v37 }
 0x1ee   : > { %v3323_v45 = vpop.f32.mrb[44].mxu1  ;;  %v3387_v46 = vpop.f32.mrb[60].mxu0  ;;  %v4641_v10 = vadd.f32 %v3386_v39, %v1512_v42 }
 0x1ef   : > { %v3324_v12 = vpop.f32.mrb[45].mxu1  ;;  %v3388_v48 = vpop.f32.mrb[61].mxu0 }
 0x1f0   : > { %v3325_v49 = vadd.f32 %v3324_v12, %v3323_v45  ;;  %v3326_v50 = vpop.f32.mrb[46].mxu1  ;;  %v3389_v43 = vadd.f32 %v3388_v48, %v3387_v46  ;;  %v3390_v58 = vpop.f32.mrb[62].mxu0 }
 0x1f1   : > { %v3327_v22 = vpop.f32.mrb[47].mxu1  ;;  %v3391_v47 = vpop.f32.mrb[63].mxu0 }
 0x1f2   : > { %v1517_v54 = vadd.f32 %v3325_v49, %v4623_v52  ;;  %v3328_v55 = vadd.f32 %v3327_v22, %v3326_v50  ;;  %v3392_v56 = vadd.f32 %v3391_v47, %v3390_v58 }
 0x1f4   : > { %v1520_v59 = vadd.f32 %v3328_v55, %v4623_v52  ;;  %v4645_v60 = vadd.f32 %v3389_v43, %v1517_v54 }
 0x1f6   : > { %v3329_v61 = vpop.f32.mrb[48].mxu1  ;;  %v3393_v63 = vpop.f32.mrb[64].mxu0  ;;  %v4647_v1 = vadd.f32 %v3392_v56, %v1520_v59 }
 0x1f7   : > { %v3330_v3 = vpop.f32.mrb[49].mxu1  ;;  %v3394_v5 = vpop.f32.mrb[65].mxu0 }
 0x1f8   : > { %v3331_v13 = vadd.f32 %v3330_v3, %v3329_v61  ;;  %v3332_v14 = vpop.f32.mrb[50].mxu1  ;;  %v3395_v8 = vadd.f32 %v3394_v5, %v3393_v63  ;;  %v3396_v9 = vpop.f32.mrb[66].mxu0 }
 0x1f9   : > { %v3333_v11 = vpop.f32.mrb[51].mxu1  ;;  %v3397_v15 = vpop.f32.mrb[67].mxu0 }
 0x1fa   : > { %v1525_v17 = vadd.f32 %v3331_v13, %v4623_v52  ;;  %v3334_v18 = vadd.f32 %v3333_v11, %v3332_v14  ;;  %v3398_v23 = vadd.f32 %v3397_v15, %v3396_v9  ;;  %v3742_v63 = vpop.permute.xlu0 %3741 }
 0x1fc   : > { %v1528_v24 = vadd.f32 %v3334_v18, %v4623_v52  ;;  %v4654_v0 = vadd.f32 %v3395_v8, %v1525_v17 }
 0x1fe   : > { %v3335_v25 = vpop.f32.mrb[52].mxu1  ;;  %v3399_v26 = vpop.f32.mrb[68].mxu0  ;;  %v4656_v27 = vadd.f32 %v3398_v23, %v1528_v24 }
 0x1ff   : > { %v3336_v29 = vpop.f32.mrb[53].mxu1  ;;  %v3400_v38 = vpop.f32.mrb[69].mxu0 }
 0x200   : > { %v3337_v32 = vadd.f32 %v3336_v29, %v3335_v25  ;;  %v3338_v33 = vpop.f32.mrb[54].mxu1  ;;  %v3401_v44 = vadd.f32 %v3400_v38, %v3399_v26  ;;  %v3402_v34 = vpop.f32.mrb[70].mxu0 }
 0x201   : > { %v3339_v35 = vpop.f32.mrb[55].mxu1  ;;  %v3403_v36 = vpop.f32.mrb[71].mxu0 }
 0x202   : > { %v1533_v62 = vadd.f32 %v3337_v32, %v4623_v52  ;;  %v3340_v30 = vadd.f32 %v3339_v35, %v3338_v33  ;;  %v3404_v37 = vadd.f32 %v3403_v36, %v3402_v34  ;;  %v3747_v29 = vpop.permute.xlu0 %3746  ;;  %v3752_v33 = vpop.permute.xlu1 %3751 }
 0x203   : > { %v3749_v34 = vunpack.i.h.bf16 %v3747_v29  ;;  %v3748_v35 = vunpack.i.l.bf16 %v3747_v29  ;;  %v3867_v29 = vld [vmem:[%s5140_s10 + $0x10] sm:$0xff]  }
 0x204   : > { %v1536_v4 = vadd.f32 %v3340_v30, %v4623_v52  ;;  %v4660_v39 = vadd.f32 %v3401_v44, %v1533_v62  ;;  %v3744_v30 = vunpack.i.h.bf16 %v3742_v63 }
 0x206   : > { %v3341_v42 = vpop.f32.mrb[56].mxu1  ;;  %v3405_v45 = vpop.f32.mrb[72].mxu0  ;;  %v4662_v46 = vadd.f32 %v3404_v37, %v1536_v4  ;;  %v3743_v37 = vunpack.i.l.bf16 %v3742_v63  ;;  %v3754_v63 = vunpack.i.h.bf16 %v3752_v33 }
 0x207   : > { %v3342_v12 = vpop.f32.mrb[57].mxu1  ;;  %v3406_v48 = vpop.f32.mrb[73].mxu0 }
 0x208   : > { %v3343_v49 = vadd.f32 %v3342_v12, %v3341_v42  ;;  %v3344_v50 = vpop.f32.mrb[58].mxu1  ;;  %v3407_v43 = vadd.f32 %v3406_v48, %v3405_v45  ;;  %v3408_v58 = vpop.f32.mrb[74].mxu0 }
 0x209   : > { %v3345_v22 = vpop.f32.mrb[59].mxu1  ;;  %v3409_v47 = vpop.f32.mrb[75].mxu0 }
 0x20a   : > { %v1541_v54 = vadd.f32 %v3343_v49, %v4623_v52  ;;  %v3346_v55 = vadd.f32 %v3345_v22, %v3344_v50  ;;  %v3410_v56 = vadd.f32 %v3409_v47, %v3408_v58  ;;  %v3757_v58 = vpop.permute.xlu1 %3756 }
 0x20b   : > { %v3759_v47 = vunpack.i.h.bf16 %v3757_v58 }
 0x20c   : > { %v1544_v59 = vadd.f32 %v3346_v55, %v4623_v52  ;;  %v4666_v61 = vadd.f32 %v3407_v43, %v1541_v54  ;;  %v3758_v54 = vunpack.i.l.bf16 %v3757_v58 }
 0x20e   : > { %v3347_v3 = vpop.f32.mrb[60].mxu1  ;;  %v3411_v5 = vpop.f32.mrb[76].mxu0  ;;  %v4668_v6 = vadd.f32 %v3410_v56, %v1544_v59  ;;  %v3864_v59 = vld [vmem:[%s5140_s10 + $0x48] sm:$0xff]  }
 0x20f   : > { %v3348_v13 = vpop.f32.mrb[61].mxu1  ;;  %v3412_v14 = vpop.f32.mrb[77].mxu0 }
 0x210   : > { %v3349_v8 = vadd.f32 %v3348_v13, %v3347_v3  ;;  %v3350_v9 = vpop.f32.mrb[62].mxu1  ;;  %v3413_v11 = vadd.f32 %v3412_v14, %v3411_v5  ;;  %v3414_v15 = vpop.f32.mrb[78].mxu0  ;;  %v3753_v3 = vunpack.i.l.bf16 %v3752_v33 }
 0x211   : > { %v3351_v17 = vpop.f32.mrb[63].mxu1  ;;  %v3415_v18 = vpop.f32.mrb[79].mxu0 }
 0x212   : > { %v1549_v23 = vadd.f32 %v3349_v8, %v4623_v52  ;;  %v3352_v24 = vadd.f32 %v3351_v17, %v3350_v9  ;;  %v3416_v25 = vadd.f32 %v3415_v18, %v3414_v15  ;;  %v3860_v8 = vld [vmem:[%s5138_s8 + $0x60] ss:$20 sps:$4 sm:$0xff]   ;;  %v3767_v18 = vpop.permute.xlu1 %3766 }
 0x213   : > { %v3768_v33 = vunpack.i.l.bf16 %v3767_v18 }
 0x214   : > { %v1552_v26 = vadd.f32 %v3352_v24, %v4623_v52  ;;  %v4672_v38 = vadd.f32 %v3413_v11, %v1549_v23  ;;  %v3866_v24 = vld [vmem:[%s5140_s10 + $0x50] sm:$0xff]  }
 0x216   : > { %v3627_v32 = vpop.f32.mrb[64].mxu1  ;;  %v4674_v44 = vadd.f32 %v3416_v25, %v1552_v26  ;;  %v3861_v26 = vld [vmem:[%s5138_s8 + $0x88] ss:$20 sps:$4 sm:$0xff]  }
 0x217   : > { %v1695_v36 = vadd.f32 %v3627_v32, %v4633_v28  ;;  %v1686_v62 = vpop.f32.mrb[65].mxu1  ;;  %v3769_v32 = vunpack.i.h.bf16 %v3767_v18  ;;  %v3874_v18 = vld [vmem:[%s5140_s10 + $0xc8] sm:$0xff]  }
 0x218   : > { %v1687_v4 = vadd.f32 %v1686_v62, %v4627_v7  ;;  %v3628_v42 = vpop.f32.mrb[66].mxu1  ;;  %v3859_v7 = vld [vmem:[%s5138_s8 + $0x38] ss:$20 sps:$4 sm:$0xff]  }
 0x219   : > { %v1698_v45 = vadd.f32 %v3628_v42, %v4635_v31  ;;  %v1689_v52 = vpop.f32.mrb[67].mxu1  ;;  %v1815_v48 = vsel %vm663_vm0, %v1695_v36, %v3748_v35  ;;  %v3868_v36 = vld [vmem:[%s5140_s10 + $0x58] sm:$0xff]  }
 0x21a   : > { %v1690_v12 = vadd.f32 %v1689_v52, %v4629_v21  ;;  %v1813_v50 = vsel %vm663_vm0, %v1687_v4, %v3743_v37  ;;  %v3863_v21 = vld [vmem:[%s5140_s10] sm:$0xff]   ;;  %v3869_v52 = vld [vmem:[%s5140_s10 + $0x18] sm:$0xff]  }
 0x21b   : > { %v1816_v49 = vsel %vm663_vm0, %v1698_v45, %v3749_v34 }
 0x21c   : > { %v4683_v43 = vpack.c.bf16 %v1816_v49, %v1815_v48  ;;  %v1814_v28 = vsel %vm663_vm0, %v1690_v12, %v3744_v30 }
 0x21d   : > { %v4686_v22 = vpack.c.bf16 %v1814_v28, %v1813_v50  ;;  %v3777_v50 = vpop.permute.xlu1 %3776 }
 0x21e   : > { %v3631_v31 = vpop.f32.mrb[68].mxu1 }
 0x21f   : > { %v1711_v55 = vadd.f32 %v3631_v31, %v4645_v60  ;;  %v1702_v56 = vpop.f32.mrb[69].mxu1  ;;  %3208 = vmatmul.mubr.msk.bf16.vlgmr.msra.gmra.mrb[80].mxu0 %vm1992_vm1, %v4686_v22  ;;  %3216 = vmatmul.mubr.msk.bf16.vlgmr.msra.gmra.mrb[80].mxu1 %vm1992_vm1, %v4686_v22 }
 0x220   : > { %v1703_v5 = vadd.f32 %v1702_v56, %v4639_v57  ;;  %3642 = vmatpush3.bf16.msra.mxu0 %v4617_v51  ;;  %v3632_v13 = vpop.f32.mrb[70].mxu1  ;;  %2059 = vmatprep.mubr.bf16.mxu0 %v3966_v2  ;;  %v3865_v51 = vld [vmem:[%s5140_s10 + $0x8] sm:$0xff]  }
 0x221   : > { %v1714_v60 = vadd.f32 %v3632_v13, %v4647_v1  ;;  %v1705_v14 = vpop.f32.mrb[71].mxu1  ;;  %2172 = vmatprep.mubr.bf16.mxu1 %v3966_v2  ;;  %3643 = vmatprep.subr.bf16.mxu0 %v3859_v7  ;;  %v1819_v57 = vsel %vm663_vm0, %v1711_v55, %v3758_v54  ;;  %v3778_v54 = vunpack.i.l.bf16 %v3777_v50 }
 0x222   : > { %v1706_v9 = vadd.f32 %v1705_v14, %v4641_v10  ;;  %3446 = vmatpush3.bf16.msra.mxu1 %v3863_v21  ;;  %v1817_v1 = vsel %vm663_vm0, %v1703_v5, %v3753_v3  ;;  %v3762_v10 = vpop.permute.xlu0 %3761  ;;  %v3871_v21 = vld [vmem:[%s5140_s10 + $0x20] sm:$0xff]  }
 0x223   : > { %v1820_v11 = vsel %vm663_vm0, %v1714_v60, %v3759_v47  ;;  %3447 = vmatprep.subr.bf16.mxu1 %v3864_v59  ;;  %v3764_v62 = vunpack.i.h.bf16 %v3762_v10  ;;  %v3763_v30 = vunpack.i.l.bf16 %v3762_v10  ;;  %v3779_v47 = vunpack.i.h.bf16 %v3777_v50  ;;  %v3876_v59 = vld [vmem:[%s5140_s10 + $0x68] sm:$0xff]   ;;  %v3879_v10 = vld [vmem:[%s5140_s10 + $0x90] sm:$0xff]  }
 0x224   : > { %v4717_v15 = vpack.c.bf16 %v1820_v11, %v1819_v57  ;;  %v1818_v17 = vsel %vm663_vm0, %v1706_v9, %v3754_v63  ;;  %3644 = vmatpush3.bf16.msra.mxu0 %v3859_v7  ;;  %v3870_v7 = vld [vmem:[%s5140_s10 + $0x60] sm:$0xff]  }
 0x225   : > { %v4720_v23 = vpack.c.bf16 %v1818_v17, %v1817_v1  ;;  %3645 = vmatprep.subr.bf16.mxu0 %v3860_v8  ;;  %v3883_v1 = vld [vmem:[%s5140_s10 + $0x30] sm:$0xff]   ;;  %v3873_v17 = vld [vmem:[%s5140_s10 + $0x80] sm:$0xff]  }
 0x226   : > { %v3635_v25 = vpop.f32.mrb[72].mxu1  ;;  %3448 = vmatpush3.bf16.msra.mxu1 %v3865_v51  ;;  %v3772_v58 = vpop.permute.xlu0 %3771 }
 0x227   : > { %v1727_v34 = vadd.f32 %v3635_v25, %v4660_v39  ;;  %v1718_v35 = vpop.f32.mrb[73].mxu1  ;;  %3209 = vmatmul.mubr.msk.bf16.gmra.mrb[84].mxu0 %vm1992_vm1, %v4683_v43  ;;  %3217 = vmatmul.mubr.msk.bf16.gmra.mrb[84].mxu1 %vm1992_vm1, %v4683_v43  ;;  %v3774_v63 = vunpack.i.h.bf16 %v3772_v58  ;;  %v3773_v3 = vunpack.i.l.bf16 %v3772_v58  ;;  %v3885_v25 = vld [vmem:[%s5140_s10 + $0xa0] sm:$0xff]  }
 0x228   : > { %v1719_v37 = vadd.f32 %v1718_v35, %v4654_v0  ;;  %v3636_v4 = vpop.f32.mrb[74].mxu1  ;;  %2069 = vmatprep.mubr.bf16.mxu0 %v3966_v2  ;;  %2182 = vmatprep.mubr.bf16.mxu1 %v3966_v2  ;;  %v3872_v0 = vld [vmem:[%s5140_s10 + $0xc0] sm:$0xff]   ;;  %v3892_v35 = vld [vmem:[%s5140_s10 + $0xf8] sm:$0xff]  }
 0x229   : > { %v1730_v39 = vadd.f32 %v3636_v4, %v4662_v46  ;;  %v1721_v42 = vpop.f32.mrb[75].mxu1  ;;  %3646 = vmatpush3.bf16.msra.mxu0 %v3860_v8  ;;  %3449 = vmatprep.subr.bf16.mxu1 %v3866_v24  ;;  %v1823_v12 = vsel %vm663_vm0, %v1727_v34, %v3768_v33  ;;  %v3877_v8 = vld [vmem:[%s5140_s10 + $0x28] sm:$0xff]   ;;  %v3884_v24 = vld [vmem:[%s5140_s10 + $0xe0] sm:$0xff]   ;;  %v3889_v33 = vld [vmem:[%s5140_s10 + $0x38] sm:$0xff]  }
 0x22a   : > { %v1722_v45 = vadd.f32 %v1721_v42, %v4656_v27  ;;  %3647 = vmatprep.subr.bf16.mxu0 %v3861_v26  ;;  %3450 = vmatpush3.bf16.msra.mxu1 %v3867_v29  ;;  %v1821_v46 = vsel %vm663_vm0, %v1719_v37, %v3763_v30  ;;  %v3890_v29 = vld [vmem:[%s5140_s10 + $0xf0] sm:$0xff]   ;;  %v4890_v30 = vld [vmem:[%s5139_s9] sm:$0x1f] }
 0x22b   : > { %v1824_v48 = vsel %vm663_vm0, %v1730_v39, %v3769_v32  ;;  %3451 = vmatprep.subr.bf16.mxu1 %v3868_v36  ;;  %v3888_v32 = vld [vmem:[%s5140_s10 + $0x78] sm:$0xff]   ;;  %v3891_v34 = vld [vmem:[%s5140_s10 + $0xb0] sm:$0xff]   ;;  %v4895_v37 = vrot.slane %v4890_v30, %v588_v41  ;;  %v4900_v4 = vrot.slane %v4890_v30, %v596_v53 }
 0x22c   : > { %v4753_v49 = vpack.c.bf16 %v1824_v48, %v1823_v12  ;;  %v1822_v27 = vsel %vm663_vm0, %v1722_v45, %v3764_v62  ;;  %v3893_v36 = vld [vmem:[%s5140_s10 + $0xb8] sm:$0xff]   ;;  %v3894_v62 = vld [vmem:[%s5140_s10 + $0x100] sm:$0xff]   ;;  %v4905_v45 = vrot.slane %v4890_v30, %v592_v16 }
 0x22d   : > { %v4756_v28 = vpack.c.bf16 %v1822_v27, %v1821_v46  ;;  %3648 = vmatpush3.bf16.msra.mxu0 %v3861_v26  ;;  %v3887_v26 = vld [vmem:[%s5140_s10 + $0xa8] sm:$0xff]  }
 0x22e   : > { %v3639_v31 = vpop.f32.mrb[76].mxu1  ;;  %3452 = vmatpush3.bf16.msra.mxu1 %v3869_v52  ;;  %3509 = vmatprep.subr.bf16.mxu0 %v3872_v0  ;;  %v4910_v52 = vrot.slane %v4890_v30, %v600_v19 }
 0x22f   : > { %v1743_v55 = vadd.f32 %v3639_v31, %v4672_v38  ;;  %v1734_v56 = vpop.f32.mrb[77].mxu1  ;;  %3210 = vmatmul.mubr.msk.bf16.gmra.mrb[88].mxu0 %vm1992_vm1, %v4720_v23  ;;  %3218 = vmatmul.mubr.msk.bf16.gmra.mrb[88].mxu1 %vm1992_vm1, %v4720_v23 }
 0x230   : > { %v1735_v5 = vadd.f32 %v1734_v56, %v4666_v61  ;;  %v3640_v13 = vpop.f32.mrb[78].mxu1  ;;  %2079 = vmatprep.mubr.bf16.mxu0 %v3966_v2  ;;  %2192 = vmatprep.mubr.bf16.mxu1 %v3966_v2 }
 0x231   : > { %v1746_v38 = vadd.f32 %v3640_v13, %v4674_v44  ;;  %v1737_v60 = vpop.f32.mrb[79].mxu1  ;;  %3453 = vmatprep.subr.bf16.mxu1 %v3870_v7  ;;  %v1827_v9 = vsel %vm663_vm0, %v1743_v55, %v3778_v54  ;;  %v3895_v55 = vld [vmem:[%s5140_s10 + $0x108] sm:$0xff]  }
 0x232   : > { %v1738_v14 = vadd.f32 %v1737_v60, %v4668_v6  ;;  %3454 = vmatpush3.bf16.msra.mxu1 %v3871_v21  ;;  %v1825_v51 = vsel %vm663_vm0, %v1735_v5, %v3773_v3  ;;  %v3882_v6 = vld [vmem:[%s5140_s10 + $0x70] sm:$0xff]  }
 0x233   : > { %v1828_v61 = vsel %vm663_vm0, %v1746_v38, %v3779_v47  ;;  %3455 = vmatprep.subr.bf16.mxu1 %v3876_v59 }
 0x234   : > { %v4783_v57 = vpack.c.bf16 %v1828_v61, %v1827_v9  ;;  %v1826_v44 = vsel %vm663_vm0, %v1738_v14, %v3774_v63 }
 0x235   : > { %v1835_v11 = vpack.c.bf16 %v1826_v44, %v1825_v51  ;;  %v3896_v51 = vld [vmem:[%s5140_s10 + $0x110] sm:$0xff]  }
 0x236   : > { %3456 = vmatpush3.bf16.msra.mxu1 %v3877_v8 }
 0x237   : > { %3211 = vmatmul.mubr.msk.bf16.gmra.mrb[92].mxu0 %vm1992_vm1, %v4717_v15  ;;  %3219 = vmatmul.mubr.msk.bf16.gmra.mrb[92].mxu1 %vm1992_vm1, %v4717_v15 }
 0x238   : > { %2089 = vmatprep.mubr.bf16.mxu0 %v3966_v2  ;;  %2202 = vmatprep.mubr.bf16.mxu1 %v3966_v2 }
 0x239   : > { %3457 = vmatprep.subr.bf16.mxu1 %v3882_v6 }
 0x23a   : > { %3458 = vmatpush3.bf16.msra.mxu1 %v3883_v1 }
 0x23b   : > { %3459 = vmatprep.subr.bf16.mxu1 %v3888_v32 }
 0x23e   : > { %3460 = vmatpush3.bf16.msra.mxu1 %v3889_v33 }
 0x23f   : > { %3212 = vmatmul.mubr.msk.bf16.gmra.mrb[96].mxu0 %vm1992_vm1, %v4756_v28  ;;  %3220 = vmatmul.mubr.msk.bf16.gmra.mrb[96].mxu1 %vm1992_vm1, %v4756_v28 }
 0x240   : > { %2099 = vmatprep.mubr.bf16.mxu0 %v3966_v2  ;;  %2212 = vmatprep.mubr.bf16.mxu1 %v3966_v2 }
 0x241   : > { %3665 = vmatprep.subr.bf16.mxu1 %v3894_v62 }
 0x247   : > { %3213 = vmatmul.mubr.msk.bf16.gmra.mrb[100].mxu0 %vm1992_vm1, %v4753_v49  ;;  %3221 = vmatmul.mubr.msk.bf16.gmra.mrb[100].mxu1 %vm1992_vm1, %v4753_v49 }
 0x248   : > { %2109 = vmatprep.mubr.bf16.mxu0 %v3966_v2  ;;  %2222 = vmatprep.mubr.bf16.mxu1 %v3966_v2 }
 0x24f   : > { %3214 = vmatmul.mubr.msk.bf16.gmra.mrb[104].mxu0 %vm1992_vm1, %v1835_v11  ;;  %3222 = vmatmul.mubr.msk.bf16.gmra.mrb[104].mxu1 %vm1992_vm1, %v1835_v11 }
 0x250   : > { %2119 = vmatprep.mubr.bf16.mxu0 %v3966_v2  ;;  %2232 = vmatprep.mubr.bf16.mxu1 %v3966_v2  ;;  %v3875_v2 = vld [vmem:[%s5140_s10 + $0x88] sm:$0xff]  }
 0x257   : > { %3215 = vmatmul.mubr.msk.bf16.gmra.mrb[108].mxu0 %vm1992_vm1, %v4783_v57  ;;  %3223 = vmatmul.mubr.msk.bf16.gmra.mrb[108].mxu1 %vm1992_vm1, %v4783_v57 }
 0x258   : > { %3649 = vmatprep.mubr.msk.bf16.mxu0 %vm1992_vm1, %v4686_v22  ;;  %v3878_v22 = vld [vmem:[%s5140_s10 + $0xd0] sm:$0xff]  }
 0x25f   : > { %3650 = vmatmul.mubr.msk.bf16.vlgmr.msra.gmra.mrb[112].mxu0 %vm1992_vm1, %v4683_v43  ;;  %v3880_v43 = vld [vmem:[%s5140_s10 + $0xd8] sm:$0xff]  }
 0x260   : > { %3653 = vmatprep.mubr.msk.bf16.mxu0 %vm1992_vm1, %v4720_v23  ;;  %3510 = vmatpush3.bf16.msra.mxu0 %v3873_v17  ;;  %v3881_v23 = vld [vmem:[%s5140_s10 + $0x98] sm:$0xff]  }
 0x261   : > { %3511 = vmatprep.subr.bf16.mxu0 %v3874_v18 }
 0x264   : > { %3512 = vmatpush3.bf16.msra.mxu0 %v3875_v2 }
 0x265   : > { %3513 = vmatprep.subr.bf16.mxu0 %v3878_v22  ;;  %v3897_v22 = vld [vmem:[%s5140_s10 + $0x118] sm:$0xff]  }
 0x267   : > { %3654 = vmatmul.mubr.msk.bf16.gmra.mrb[116].mxu0 %vm1992_vm1, %v4717_v15  ;;  %v3886_v15 = vld [vmem:[%s5140_s10 + $0xe8] sm:$0xff]  }
 0x268   : > { %3657 = vmatprep.mubr.msk.bf16.mxu0 %vm1992_vm1, %v4756_v28  ;;  %3514 = vmatpush3.bf16.msra.mxu0 %v3879_v10 }
 0x269   : > { %3515 = vmatprep.subr.bf16.mxu0 %v3880_v43 }
 0x26c   : > { %3516 = vmatpush3.bf16.msra.mxu0 %v3881_v23 }
 0x26d   : > { %3517 = vmatprep.subr.bf16.mxu0 %v3884_v24 }
 0x26f   : > { %3658 = vmatmul.mubr.msk.bf16.gmra.mrb[120].mxu0 %vm1992_vm1, %v4753_v49 }
 0x270   : > { %3661 = vmatprep.mubr.msk.bf16.mxu0 %vm1992_vm1, %v1835_v11  ;;  %3518 = vmatpush3.bf16.msra.mxu0 %v3885_v25 }
 0x271   : > { %3519 = vmatprep.subr.bf16.mxu0 %v3886_v15 }
 0x274   : > { %3520 = vmatpush3.bf16.msra.mxu0 %v3887_v26 }
 0x275   : > { %3521 = vmatprep.subr.bf16.mxu0 %v3890_v29 }
 0x277   : > { %3662 = vmatmul.mubr.msk.bf16.gmra.mrb[124].mxu0 %vm1992_vm1, %v4783_v57 }
 0x278   : > { %3522 = vmatpush3.bf16.msra.mxu0 %v3891_v34 }
 0x279   : > { %3523 = vmatprep.subr.bf16.mxu0 %v3892_v35 }
 0x27c   : > { %3524 = vmatpush3.bf16.msra.mxu0 %v3893_v36  ;;  %v3898_v36 = vld [vmem:[%s5140_s10 + $0x120] sm:$0xff]  }
 0x2f2   : > { %v2051_v39 = vpop.f32.mrb[80].mxu0  ;;  %v2164_v42 = vpop.f32.mrb[80].mxu1 }
 0x2f3   : > { %v2053_v0 = vpop.f32.mrb[81].mxu0  ;;  %v2166_v41 = vpop.f32.mrb[81].mxu1  ;;  %v2052_v46 = vadd.f32 %v2051_v39, %v4895_v37  ;;  %v2165_v53 = vadd.f32 %v2164_v42, %v4900_v4 }
 0x2f4   : > { %v2055_v12 = vpop.f32.mrb[82].mxu0  ;;  %v2168_v48 = vpop.f32.mrb[82].mxu1  ;;  %v2054_v28 = vadd.f32 %v2053_v0, %v4905_v45  ;;  %v2167_v58 = vadd.f32 %v2166_v41, %v4910_v52 }
 0x2f5   : > { %v2056_v49 = vadd.f32 %v2055_v12, %v4895_v37  ;;  %v2169_v27 = vadd.f32 %v2168_v48, %v4900_v4  ;;  %v2057_v50 = vpop.f32.mrb[83].mxu0  ;;  %v2170_v16 = vpop.f32.mrb[83].mxu1 }
 0x2f6   : > { %v2058_v19 = vadd.f32 %v2057_v50, %v4905_v45  ;;  %v2171_v7 = vadd.f32 %v2170_v16, %v4910_v52 }
 0x2f7   : > { %v2340_v31 = vpack.c.bf16 %v2056_v49, %v2052_v46  ;;  %v2342_v21 = vpack.c.bf16 %v2169_v27, %v2165_v53  ;;  %v3899_v53 = vld [vmem:[%s5140_s10 + $0x128] sm:$0xff]  }
 0x2f8   : > { %v2341_v47 = vpack.c.bf16 %v2058_v19, %v2054_v28  ;;  %v2343_v54 = vpack.c.bf16 %v2171_v7, %v2167_v58 }
 0x2fa   : > { %v2061_v56 = vpop.f32.mrb[84].mxu0  ;;  %v2174_v59 = vpop.f32.mrb[84].mxu1  ;;  %2739 = vmatprep.mubr.bf16.mxu1 %v2341_v47  ;;  %2836 = vmatprep.mubr.bf16.mxu0 %v2343_v54 }
 0x2fb   : > { %v2063_v63 = vpop.f32.mrb[85].mxu0  ;;  %v2176_v3 = vpop.f32.mrb[85].mxu1  ;;  %2740 = vmatmul.mubr.bf16.vlgmr.msra.gmra.mrb[112].mxu1 %v2340_v31  ;;  %2837 = vmatmul.mubr.bf16.vlgmr.msra.gmra.mrb[128].mxu0 %v2342_v21  ;;  %v2062_v38 = vadd.f32 %v2061_v56, %v4895_v37  ;;  %v2175_v60 = vadd.f32 %v2174_v59, %v4900_v4 }
 0x2fc   : > { %3666 = vmatpush3.bf16.msra.mxu1 %v3894_v62  ;;  %v2065_v5 = vpop.f32.mrb[86].mxu0  ;;  %v2178_v13 = vpop.f32.mrb[86].mxu1  ;;  %v2064_v57 = vadd.f32 %v2063_v63, %v4905_v45  ;;  %v2177_v44 = vadd.f32 %v2176_v3, %v4910_v52 }
 0x2fd   : > { %v2066_v14 = vadd.f32 %v2065_v5, %v4895_v37  ;;  %v2179_v8 = vadd.f32 %v2178_v13, %v4900_v4  ;;  %v2067_v9 = vpop.f32.mrb[87].mxu0  ;;  %v2180_v61 = vpop.f32.mrb[87].mxu1  ;;  %3667 = vmatprep.subr.bf16.mxu1 %v3895_v55 }
 0x2fe   : > { %v2068_v11 = vadd.f32 %v2067_v9, %v4905_v45  ;;  %v2181_v6 = vadd.f32 %v2180_v61, %v4910_v52 }
 0x2ff   : > { %v2345_v1 = vpack.c.bf16 %v2066_v14, %v2062_v38  ;;  %v2347_v17 = vpack.c.bf16 %v2179_v8, %v2175_v60  ;;  %v3901_v14 = vld [vmem:[%s5140_s10 + $0x138] sm:$0xff]  }
 0x300   : > { %v2346_v18 = vpack.c.bf16 %v2068_v11, %v2064_v57  ;;  %v2348_v2 = vpack.c.bf16 %v2181_v6, %v2177_v44  ;;  %3668 = vmatpush3.bf16.msra.mxu1 %v3895_v55  ;;  %v3900_v55 = vld [vmem:[%s5140_s10 + $0x130] sm:$0xff]  }
 0x301   : > { %3669 = vmatprep.subr.bf16.mxu1 %v3896_v51 }
 0x302   : > { %v2071_v10 = vpop.f32.mrb[88].mxu0  ;;  %v2184_v43 = vpop.f32.mrb[88].mxu1  ;;  %2747 = vmatprep.mubr.bf16.mxu1 %v2346_v18  ;;  %2844 = vmatprep.mubr.bf16.mxu0 %v2348_v2 }
 0x303   : > { %v2073_v23 = vpop.f32.mrb[89].mxu0  ;;  %v2186_v24 = vpop.f32.mrb[89].mxu1  ;;  %2748 = vmatmul.mubr.bf16.gmra.mrb[116].mxu1 %v2345_v1  ;;  %2845 = vmatmul.mubr.bf16.gmra.mrb[132].mxu0 %v2347_v17  ;;  %v2072_v26 = vadd.f32 %v2071_v10, %v4895_v37  ;;  %v2185_v29 = vadd.f32 %v2184_v43, %v4900_v4 }
 0x304   : > { %v2075_v25 = vpop.f32.mrb[90].mxu0  ;;  %v2188_v15 = vpop.f32.mrb[90].mxu1  ;;  %3670 = vmatpush3.bf16.msra.mxu1 %v3896_v51  ;;  %v2074_v62 = vadd.f32 %v2073_v23, %v4905_v45  ;;  %v2187_v39 = vadd.f32 %v2186_v24, %v4910_v52 }
 0x305   : > { %v2076_v32 = vadd.f32 %v2075_v25, %v4895_v37  ;;  %v2189_v33 = vadd.f32 %v2188_v15, %v4900_v4  ;;  %v2077_v34 = vpop.f32.mrb[91].mxu0  ;;  %v2190_v35 = vpop.f32.mrb[91].mxu1  ;;  %3671 = vmatprep.subr.bf16.mxu1 %v3897_v22 }
 0x306   : > { %v2078_v42 = vadd.f32 %v2077_v34, %v4905_v45  ;;  %v2191_v0 = vadd.f32 %v2190_v35, %v4910_v52 }
 0x307   : > { %v2350_v41 = vpack.c.bf16 %v2076_v32, %v2072_v26  ;;  %v2352_v12 = vpack.c.bf16 %v2189_v33, %v2185_v29 }
 0x308   : > { %v2351_v48 = vpack.c.bf16 %v2078_v42, %v2074_v62  ;;  %v2353_v46 = vpack.c.bf16 %v2191_v0, %v2187_v39  ;;  %3672 = vmatpush3.bf16.msra.mxu1 %v3897_v22 }
 0x309   : > { %3673 = vmatprep.subr.bf16.mxu1 %v3898_v36 }
 0x30a   : > { %v2081_v49 = vpop.f32.mrb[92].mxu0  ;;  %v2194_v27 = vpop.f32.mrb[92].mxu1  ;;  %2755 = vmatprep.mubr.bf16.mxu1 %v2351_v48  ;;  %2852 = vmatprep.mubr.bf16.mxu0 %v2353_v46 }
 0x30b   : > { %v2083_v50 = vpop.f32.mrb[93].mxu0  ;;  %v2196_v16 = vpop.f32.mrb[93].mxu1  ;;  %2756 = vmatmul.mubr.bf16.gmra.mrb[120].mxu1 %v2350_v41  ;;  %2853 = vmatmul.mubr.bf16.gmra.mrb[136].mxu0 %v2352_v12  ;;  %v2082_v19 = vadd.f32 %v2081_v49, %v4895_v37  ;;  %v2195_v7 = vadd.f32 %v2194_v27, %v4900_v4 }
 0x30c   : > { %v2085_v28 = vpop.f32.mrb[94].mxu0  ;;  %v2198_v58 = vpop.f32.mrb[94].mxu1  ;;  %3674 = vmatpush3.bf16.msra.mxu1 %v3898_v36  ;;  %v2084_v56 = vadd.f32 %v2083_v50, %v4905_v45  ;;  %v2197_v59 = vadd.f32 %v2196_v16, %v4910_v52 }
 0x30d   : > { %v2086_v31 = vadd.f32 %v2085_v28, %v4895_v37  ;;  %v2199_v21 = vadd.f32 %v2198_v58, %v4900_v4  ;;  %v2087_v47 = vpop.f32.mrb[95].mxu0  ;;  %v2200_v54 = vpop.f32.mrb[95].mxu1  ;;  %3675 = vmatprep.subr.bf16.mxu1 %v3899_v53 }
 0x30e   : > { %v2088_v63 = vadd.f32 %v2087_v47, %v4905_v45  ;;  %v2201_v3 = vadd.f32 %v2200_v54, %v4910_v52 }
 0x30f   : > { %v2355_v5 = vpack.c.bf16 %v2086_v31, %v2082_v19  ;;  %v2357_v13 = vpack.c.bf16 %v2199_v21, %v2195_v7 }
 0x310   : > { %v2356_v38 = vpack.c.bf16 %v2088_v63, %v2084_v56  ;;  %v2358_v60 = vpack.c.bf16 %v2201_v3, %v2197_v59  ;;  %3676 = vmatpush3.bf16.msra.mxu1 %v3899_v53 }
 0x311   : > { %3677 = vmatprep.subr.bf16.mxu1 %v3900_v55 }
 0x312   : > { %v2091_v8 = vpop.f32.mrb[96].mxu0  ;;  %v2204_v9 = vpop.f32.mrb[96].mxu1  ;;  %2763 = vmatprep.mubr.bf16.mxu1 %v2356_v38  ;;  %2860 = vmatprep.mubr.bf16.mxu0 %v2358_v60 }
 0x313   : > { %v2093_v61 = vpop.f32.mrb[97].mxu0  ;;  %v2206_v51 = vpop.f32.mrb[97].mxu1  ;;  %2764 = vmatmul.mubr.bf16.gmra.mrb[124].mxu1 %v2355_v5  ;;  %2861 = vmatmul.mubr.bf16.gmra.mrb[140].mxu0 %v2357_v13  ;;  %v2092_v11 = vadd.f32 %v2091_v8, %v4895_v37  ;;  %v2205_v6 = vadd.f32 %v2204_v9, %v4900_v4 }
 0x314   : > { %v2095_v57 = vpop.f32.mrb[98].mxu0  ;;  %v2208_v44 = vpop.f32.mrb[98].mxu1  ;;  %3678 = vmatpush3.bf16.msra.mxu1 %v3900_v55  ;;  %v2094_v22 = vadd.f32 %v2093_v61, %v4905_v45  ;;  %v2207_v10 = vadd.f32 %v2206_v51, %v4910_v52 }
 0x315   : > { %v2096_v1 = vadd.f32 %v2095_v57, %v4895_v37  ;;  %v2209_v17 = vadd.f32 %v2208_v44, %v4900_v4  ;;  %v2097_v18 = vpop.f32.mrb[99].mxu0  ;;  %v2210_v2 = vpop.f32.mrb[99].mxu1  ;;  %3679 = vmatprep.subr.bf16.mxu1 %v3901_v14 }
 0x316   : > { %v2098_v43 = vadd.f32 %v2097_v18, %v4905_v45  ;;  %v2211_v23 = vadd.f32 %v2210_v2, %v4910_v52 }
 0x317   : > { %v2360_v24 = vpack.c.bf16 %v2096_v1, %v2092_v11  ;;  %v2362_v25 = vpack.c.bf16 %v2209_v17, %v2205_v6 }
 0x318   : > { %v2361_v15 = vpack.c.bf16 %v2098_v43, %v2094_v22  ;;  %v2363_v26 = vpack.c.bf16 %v2211_v23, %v2207_v10  ;;  %3680 = vmatpush3.bf16.msra.mxu1 %v3901_v14 }
 0x31a   : > { %v2101_v29 = vpop.f32.mrb[100].mxu0  ;;  %v2214_v32 = vpop.f32.mrb[100].mxu1  ;;  %2771 = vmatprep.mubr.bf16.mxu1 %v2361_v15  ;;  %2868 = vmatprep.mubr.bf16.mxu0 %v2363_v26 }
 0x31b   : > { %v2103_v33 = vpop.f32.mrb[101].mxu0  ;;  %v2216_v34 = vpop.f32.mrb[101].mxu1  ;;  %2772 = vmatmul.mubr.bf16.gmra.mrb[128].mxu1 %v2360_v24  ;;  %2869 = vmatmul.mubr.bf16.gmra.mrb[144].mxu0 %v2362_v25  ;;  %v2102_v62 = vadd.f32 %v2101_v29, %v4895_v37  ;;  %v2215_v39 = vadd.f32 %v2214_v32, %v4900_v4  ;;  %v1882_v32 = vrot.slane %v4890_v30, %v604_v20 }
 0x31c   : > { %v2105_v35 = vpop.f32.mrb[102].mxu0  ;;  %v2218_v36 = vpop.f32.mrb[102].mxu1  ;;  %v2104_v48 = vadd.f32 %v2103_v33, %v4905_v45  ;;  %v2217_v46 = vadd.f32 %v2216_v34, %v4910_v52 }
 0x31d   : > { %v2106_v42 = vadd.f32 %v2105_v35, %v4895_v37  ;;  %v2219_v0 = vadd.f32 %v2218_v36, %v4900_v4  ;;  %v2107_v41 = vpop.f32.mrb[103].mxu0  ;;  %v2220_v12 = vpop.f32.mrb[103].mxu1 }
 0x31e   : > { %v2108_v53 = vadd.f32 %v2107_v41, %v4905_v45  ;;  %v2221_v49 = vadd.f32 %v2220_v12, %v4910_v52 }
 0x31f   : > { %v2365_v27 = vpack.c.bf16 %v2106_v42, %v2102_v62  ;;  %v2367_v50 = vpack.c.bf16 %v2219_v0, %v2215_v39 }
 0x320   : > { %v2366_v16 = vpack.c.bf16 %v2108_v53, %v2104_v48  ;;  %v2368_v28 = vpack.c.bf16 %v2221_v49, %v2217_v46 }
 0x322   : > { %v2111_v58 = vpop.f32.mrb[104].mxu0  ;;  %v2224_v19 = vpop.f32.mrb[104].mxu1  ;;  %2779 = vmatprep.mubr.bf16.mxu1 %v2366_v16  ;;  %2876 = vmatprep.mubr.bf16.mxu0 %v2368_v28 }
 0x323   : > { %v2113_v7 = vpop.f32.mrb[105].mxu0  ;;  %v2226_v31 = vpop.f32.mrb[105].mxu1  ;;  %2780 = vmatmul.mubr.bf16.gmra.mrb[132].mxu1 %v2365_v27  ;;  %2877 = vmatmul.mubr.bf16.gmra.mrb[148].mxu0 %v2367_v50  ;;  %v2112_v54 = vadd.f32 %v2111_v58, %v4895_v37  ;;  %v2225_v55 = vadd.f32 %v2224_v19, %v4900_v4 }
 0x324   : > { %v2115_v21 = vpop.f32.mrb[106].mxu0  ;;  %v2228_v47 = vpop.f32.mrb[106].mxu1  ;;  %v2114_v5 = vadd.f32 %v2113_v7, %v4905_v45  ;;  %v2227_v13 = vadd.f32 %v2226_v31, %v4910_v52 }
 0x325   : > { %v2116_v56 = vadd.f32 %v2115_v21, %v4895_v37  ;;  %v2229_v59 = vadd.f32 %v2228_v47, %v4900_v4  ;;  %v2117_v63 = vpop.f32.mrb[107].mxu0  ;;  %v2230_v3 = vpop.f32.mrb[107].mxu1 }
 0x326   : > { %v2118_v38 = vadd.f32 %v2117_v63, %v4905_v45  ;;  %v2231_v60 = vadd.f32 %v2230_v3, %v4910_v52 }
 0x327   : > { %v2370_v14 = vpack.c.bf16 %v2116_v56, %v2112_v54  ;;  %v2372_v8 = vpack.c.bf16 %v2229_v59, %v2225_v55 }
 0x328   : > { %v2371_v9 = vpack.c.bf16 %v2118_v38, %v2114_v5  ;;  %v2373_v61 = vpack.c.bf16 %v2231_v60, %v2227_v13 }
 0x32a   : > { %v2121_v51 = vpop.f32.mrb[108].mxu0  ;;  %v2234_v57 = vpop.f32.mrb[108].mxu1  ;;  %2787 = vmatprep.mubr.bf16.mxu1 %v2371_v9  ;;  %2884 = vmatprep.mubr.bf16.mxu0 %v2373_v61  ;;  %v5003_v61 = vld [vmem:[%s5141_s11] ss:$0 sm:$0xff] }
 0x32b   : > { %v2123_v44 = vpop.f32.mrb[109].mxu0  ;;  %v2236_v11 = vpop.f32.mrb[109].mxu1  ;;  %2788 = vmatmul.mubr.bf16.gmra.mrb[136].mxu1 %v2370_v14  ;;  %2885 = vmatmul.mubr.bf16.gmra.mrb[152].mxu0 %v2372_v8  ;;  %v2122_v17 = vadd.f32 %v2121_v51, %v4895_v37  ;;  %v2235_v18 = vadd.f32 %v2234_v57, %v4900_v4 }
 0x32c   : > { %v2125_v6 = vpop.f32.mrb[110].mxu0  ;;  %v2238_v1 = vpop.f32.mrb[110].mxu1  ;;  %v2124_v23 = vadd.f32 %v2123_v44, %v4905_v45  ;;  %v2237_v24 = vadd.f32 %v2236_v11, %v4910_v52 }
 0x32d   : > { %v2126_v2 = vadd.f32 %v2125_v6, %v4895_v37  ;;  %v2239_v22 = vadd.f32 %v2238_v1, %v4900_v4  ;;  %v2127_v10 = vpop.f32.mrb[111].mxu0  ;;  %v2240_v43 = vpop.f32.mrb[111].mxu1 }
 0x32e   : > { %v2128_v25 = vadd.f32 %v2127_v10, %v4905_v45  ;;  %v2241_v15 = vadd.f32 %v2240_v43, %v4910_v52 }
 0x32f   : > { %v2375_v26 = vpack.c.bf16 %v2126_v2, %v2122_v17  ;;  %v2377_v29 = vpack.c.bf16 %v2239_v22, %v2235_v18 }
 0x330   : > { %v2376_v33 = vpack.c.bf16 %v2128_v25, %v2124_v23  ;;  %v2378_v37 = vpack.c.bf16 %v2241_v15, %v2237_v24 }
 0x332   : > { %v3651_v34 = vpop.f32.mrb[112].mxu0  ;;  %2795 = vmatprep.mubr.bf16.mxu1 %v2376_v33  ;;  %2892 = vmatprep.mubr.bf16.mxu0 %v2378_v37 }
 0x333   : > { %v2286_v4 = vadd.f32 %v3651_v34, %v1882_v32  ;;  %v2277_v35 = vpop.f32.mrb[113].mxu0  ;;  %2796 = vmatmul.mubr.bf16.gmra.mrb[140].mxu1 %v2375_v26  ;;  %2893 = vmatmul.mubr.bf16.gmra.mrb[156].mxu0 %v2377_v29 }
 0x334   : > { %v2278_v36 = vadd.f32 %v2277_v35, %v1882_v32  ;;  %v3652_v62 = vpop.f32.mrb[114].mxu0 }
 0x335   : > { %v2289_v45 = vadd.f32 %v3652_v62, %v1882_v32  ;;  %v2280_v39 = vpop.f32.mrb[115].mxu0 }
 0x336   : > { %v2281_v52 = vadd.f32 %v2280_v39, %v1882_v32 }
 0x337   : > { %v2349_v42 = vpack.c.bf16 %v2289_v45, %v2286_v4 }
 0x338   : > { %v2344_v0 = vpack.c.bf16 %v2281_v52, %v2278_v36 }
 0x33a   : > { %v3655_v41 = vpop.f32.mrb[116].mxu0  ;;  %3681 = vmatprep.mubr.bf16.mxu1 %v2344_v0 }
 0x33b   : > { %v2302_v40 = vadd.f32 %v3655_v41, %v1882_v32  ;;  %v2293_v20 = vpop.f32.mrb[117].mxu0  ;;  %3682 = vmatmul.mubr.bf16.vlgmr.msra.gmra.mrb[144].mxu1 %v2349_v42 }
 0x33c   : > { %v2294_v30 = vadd.f32 %v2293_v20, %v1882_v32  ;;  %v3656_v12 = vpop.f32.mrb[118].mxu0 }
 0x33d   : > { %v2305_v48 = vadd.f32 %v3656_v12, %v1882_v32  ;;  %v2296_v46 = vpop.f32.mrb[119].mxu0 }
 0x33e   : > { %v2297_v53 = vadd.f32 %v2296_v46, %v1882_v32 }
 0x33f   : > { %v2359_v49 = vpack.c.bf16 %v2305_v48, %v2302_v40 }
 0x340   : > { %v2354_v27 = vpack.c.bf16 %v2297_v53, %v2294_v30 }
 0x342   : > { %v3659_v50 = vpop.f32.mrb[120].mxu0  ;;  %3685 = vmatprep.mubr.bf16.mxu1 %v2354_v27 }
 0x343   : > { %v2318_v16 = vadd.f32 %v3659_v50, %v1882_v32  ;;  %v2309_v28 = vpop.f32.mrb[121].mxu0  ;;  %3686 = vmatmul.mubr.bf16.gmra.mrb[148].mxu1 %v2359_v49 }
 0x344   : > { %v2310_v58 = vadd.f32 %v2309_v28, %v1882_v32  ;;  %v3660_v19 = vpop.f32.mrb[122].mxu0 }
 0x345   : > { %v2321_v7 = vadd.f32 %v3660_v19, %v1882_v32  ;;  %v2312_v31 = vpop.f32.mrb[123].mxu0 }
 0x346   : > { %v2313_v21 = vadd.f32 %v2312_v31, %v1882_v32 }
 0x347   : > { %v2369_v47 = vpack.c.bf16 %v2321_v7, %v2318_v16 }
 0x348   : > { %v2364_v54 = vpack.c.bf16 %v2313_v21, %v2310_v58 }
 0x34a   : > { %v3663_v55 = vpop.f32.mrb[124].mxu0  ;;  %3689 = vmatprep.mubr.bf16.mxu1 %v2364_v54 }
 0x34b   : > { %v2334_v56 = vadd.f32 %v3663_v55, %v1882_v32  ;;  %v2325_v59 = vpop.f32.mrb[125].mxu0  ;;  %3690 = vmatmul.mubr.bf16.gmra.mrb[152].mxu1 %v2369_v47 }
 0x34c   : > { %v2326_v63 = vadd.f32 %v2325_v59, %v1882_v32  ;;  %v3664_v3 = vpop.f32.mrb[126].mxu0 }
 0x34d   : > { %v2337_v5 = vadd.f32 %v3664_v3, %v1882_v32  ;;  %v2328_v13 = vpop.f32.mrb[127].mxu0 }
 0x34e   : > { %v2329_v38 = vadd.f32 %v2328_v13, %v1882_v32 }
 0x34f   : > { %v2379_v60 = vpack.c.bf16 %v2337_v5, %v2334_v56 }
 0x350   : > { %v2374_v14 = vpack.c.bf16 %v2329_v38, %v2326_v63 }
 0x352   : > { %3693 = vmatprep.mubr.bf16.mxu1 %v2374_v14 }
 0x353   : > { %3694 = vmatmul.mubr.bf16.gmra.mrb[156].mxu1 %v2379_v60 }
 0x3ce   : > { %v3461_v8 = vpop.f32.mrb[112].mxu1  ;;  %v3525_v9 = vpop.f32.mrb[128].mxu0 }
 0x3cf   : > { %v3462_v51 = vpop.f32.mrb[113].mxu1  ;;  %v3526_v57 = vpop.f32.mrb[129].mxu0 }
 0x3d0   : > { %v3463_v44 = vadd.f32 %v3462_v51, %v3461_v8  ;;  %v3527_v11 = vadd.f32 %v3526_v57, %v3525_v9  ;;  %v3464_v6 = vpop.f32.mrb[114].mxu1  ;;  %v3528_v1 = vpop.f32.mrb[130].mxu0 }
 0x3d1   : > { %v3465_v17 = vpop.f32.mrb[115].mxu1  ;;  %v3529_v18 = vpop.f32.mrb[131].mxu0 }
 0x3d2   : > { %v2742_v2 = vadd.f32 %v3463_v44, %v5003_v61  ;;  %v3466_v22 = vadd.f32 %v3465_v17, %v3464_v6  ;;  %v3530_v10 = vadd.f32 %v3529_v18, %v3528_v1 }
 0x3d4   : > { %v2745_v43 = vadd.f32 %v3466_v22, %v5003_v61  ;;  %v5007_v23 = vadd.f32 %v3527_v11, %v2742_v2 }
 0x3d6   : > { %v3467_v24 = vpop.f32.mrb[116].mxu1  ;;  %v3531_v25 = vpop.f32.mrb[132].mxu0  ;;  %v5009_v15 = vadd.f32 %v3530_v10, %v2745_v43 }
 0x3d7   : > { %v3468_v26 = vpop.f32.mrb[117].mxu1  ;;  %v3532_v29 = vpop.f32.mrb[133].mxu0 }
 0x3d8   : > { %v3469_v32 = vadd.f32 %v3468_v26, %v3467_v24  ;;  %v3533_v33 = vadd.f32 %v3532_v29, %v3531_v25  ;;  %v3470_v37 = vpop.f32.mrb[118].mxu1  ;;  %v3534_v34 = vpop.f32.mrb[134].mxu0 }
 0x3d9   : > { %v3471_v4 = vpop.f32.mrb[119].mxu1  ;;  %v3535_v35 = vpop.f32.mrb[135].mxu0 }
 0x3da   : > { %v2750_v36 = vadd.f32 %v3469_v32, %v5003_v61  ;;  %v3472_v62 = vadd.f32 %v3471_v4, %v3470_v37  ;;  %v3536_v45 = vadd.f32 %v3535_v35, %v3534_v34 }
 0x3dc   : > { %v2753_v39 = vadd.f32 %v3472_v62, %v5003_v61  ;;  %v5013_v52 = vadd.f32 %v3533_v33, %v2750_v36 }
 0x3de   : > { %v3473_v42 = vpop.f32.mrb[120].mxu1  ;;  %v3537_v0 = vpop.f32.mrb[136].mxu0  ;;  %v5015_v41 = vadd.f32 %v3536_v45, %v2753_v39 }
 0x3df   : > { %v3474_v40 = vpop.f32.mrb[121].mxu1  ;;  %v3538_v20 = vpop.f32.mrb[137].mxu0 }
 0x3e0   : > { %v3475_v30 = vadd.f32 %v3474_v40, %v3473_v42  ;;  %v3539_v12 = vadd.f32 %v3538_v20, %v3537_v0  ;;  %v3476_v48 = vpop.f32.mrb[122].mxu1  ;;  %v3540_v46 = vpop.f32.mrb[138].mxu0 }
 0x3e1   : > { %v3477_v53 = vpop.f32.mrb[123].mxu1  ;;  %v3541_v49 = vpop.f32.mrb[139].mxu0 }
 0x3e2   : > { %v2758_v27 = vadd.f32 %v3475_v30, %v5003_v61  ;;  %v3478_v50 = vadd.f32 %v3477_v53, %v3476_v48  ;;  %v3542_v16 = vadd.f32 %v3541_v49, %v3540_v46 }
 0x3e4   : > { %v2761_v28 = vadd.f32 %v3478_v50, %v5003_v61  ;;  %v5019_v58 = vadd.f32 %v3539_v12, %v2758_v27 }
 0x3e6   : > { %v3479_v19 = vpop.f32.mrb[124].mxu1  ;;  %v3543_v7 = vpop.f32.mrb[140].mxu0  ;;  %v5021_v31 = vadd.f32 %v3542_v16, %v2761_v28 }
 0x3e7   : > { %v3480_v21 = vpop.f32.mrb[125].mxu1  ;;  %v3544_v47 = vpop.f32.mrb[141].mxu0 }
 0x3e8   : > { %v3481_v54 = vadd.f32 %v3480_v21, %v3479_v19  ;;  %v3545_v55 = vadd.f32 %v3544_v47, %v3543_v7  ;;  %v3482_v56 = vpop.f32.mrb[126].mxu1  ;;  %v3546_v59 = vpop.f32.mrb[142].mxu0 }
 0x3e9   : > { %v3483_v63 = vpop.f32.mrb[127].mxu1  ;;  %v3547_v3 = vpop.f32.mrb[143].mxu0 }
 0x3ea   : > { %v2766_v5 = vadd.f32 %v3481_v54, %v5003_v61  ;;  %v3484_v13 = vadd.f32 %v3483_v63, %v3482_v56  ;;  %v3548_v38 = vadd.f32 %v3547_v3, %v3546_v59 }
 0x3ec   : > { %v2769_v60 = vadd.f32 %v3484_v13, %v5003_v61  ;;  %v5025_v14 = vadd.f32 %v3545_v55, %v2766_v5 }
 0x3ee   : > { %v3485_v8 = vpop.f32.mrb[128].mxu1  ;;  %v3549_v9 = vpop.f32.mrb[144].mxu0  ;;  %v5027_v51 = vadd.f32 %v3548_v38, %v2769_v60 }
 0x3ef   : > { %v3486_v57 = vpop.f32.mrb[129].mxu1  ;;  %v3550_v44 = vpop.f32.mrb[145].mxu0 }
 0x3f0   : > { %v3487_v11 = vadd.f32 %v3486_v57, %v3485_v8  ;;  %v3551_v6 = vadd.f32 %v3550_v44, %v3549_v9  ;;  %v3488_v1 = vpop.f32.mrb[130].mxu1  ;;  %v3552_v17 = vpop.f32.mrb[146].mxu0 }
 0x3f1   : > { %v3489_v18 = vpop.f32.mrb[131].mxu1  ;;  %v3553_v2 = vpop.f32.mrb[147].mxu0 }
 0x3f2   : > { %v2774_v22 = vadd.f32 %v3487_v11, %v5003_v61  ;;  %v3490_v10 = vadd.f32 %v3489_v18, %v3488_v1  ;;  %v3554_v43 = vadd.f32 %v3553_v2, %v3552_v17 }
 0x3f4   : > { %v2777_v24 = vadd.f32 %v3490_v10, %v5003_v61  ;;  %v5031_v25 = vadd.f32 %v3551_v6, %v2774_v22 }
 0x3f6   : > { %v3491_v26 = vpop.f32.mrb[132].mxu1  ;;  %v3555_v29 = vpop.f32.mrb[148].mxu0  ;;  %v5033_v32 = vadd.f32 %v3554_v43, %v2777_v24 }
 0x3f7   : > { %v3492_v33 = vpop.f32.mrb[133].mxu1  ;;  %v3556_v37 = vpop.f32.mrb[149].mxu0 }
 0x3f8   : > { %v3493_v34 = vadd.f32 %v3492_v33, %v3491_v26  ;;  %v3557_v4 = vadd.f32 %v3556_v37, %v3555_v29  ;;  %v3494_v35 = vpop.f32.mrb[134].mxu1  ;;  %v3558_v36 = vpop.f32.mrb[150].mxu0 }
 0x3f9   : > { %v3495_v62 = vpop.f32.mrb[135].mxu1  ;;  %v3559_v45 = vpop.f32.mrb[151].mxu0 }
 0x3fa   : > { %v2782_v39 = vadd.f32 %v3493_v34, %v5003_v61  ;;  %v3496_v42 = vadd.f32 %v3495_v62, %v3494_v35  ;;  %v3560_v0 = vadd.f32 %v3559_v45, %v3558_v36 }
 0x3fc   : > { %v2785_v40 = vadd.f32 %v3496_v42, %v5003_v61  ;;  %v2879_v20 = vadd.f32 %v3557_v4, %v2782_v39 }
 0x3fe   : > { %v3497_v30 = vpop.f32.mrb[136].mxu1  ;;  %v3561_v12 = vpop.f32.mrb[152].mxu0  ;;  %v5037_v48 = vadd.f32 %v3560_v0, %v2785_v40 }
 0x3ff   : > { %v3498_v46 = vpop.f32.mrb[137].mxu1  ;;  %v3562_v53 = vpop.f32.mrb[153].mxu0 }
 0x400   : > { %v3499_v49 = vadd.f32 %v3498_v46, %v3497_v30  ;;  %v3563_v27 = vadd.f32 %v3562_v53, %v3561_v12  ;;  %v3500_v50 = vpop.f32.mrb[138].mxu1  ;;  %v3564_v16 = vpop.f32.mrb[154].mxu0 }
 0x401   : > { %v3501_v28 = vpop.f32.mrb[139].mxu1  ;;  %v3565_v19 = vpop.f32.mrb[155].mxu0 }
 0x402   : > { %v2790_v7 = vadd.f32 %v3499_v49, %v5003_v61  ;;  %v3502_v21 = vadd.f32 %v3501_v28, %v3500_v50  ;;  %v3566_v47 = vadd.f32 %v3565_v19, %v3564_v16 }
 0x404   : > { %v2793_v54 = vadd.f32 %v3502_v21, %v5003_v61  ;;  %v2887_v55 = vadd.f32 %v3563_v27, %v2790_v7 }
 0x406   : > { %v3503_v56 = vpop.f32.mrb[140].mxu1  ;;  %v3567_v59 = vpop.f32.mrb[156].mxu0  ;;  %v5041_v63 = vadd.f32 %v3566_v47, %v2793_v54 }
 0x407   : > { %v3504_v3 = vpop.f32.mrb[141].mxu1  ;;  %v3568_v5 = vpop.f32.mrb[157].mxu0 }
 0x408   : > { %v3505_v13 = vadd.f32 %v3504_v3, %v3503_v56  ;;  %v3569_v38 = vadd.f32 %v3568_v5, %v3567_v59  ;;  %v3506_v60 = vpop.f32.mrb[142].mxu1  ;;  %v3570_v8 = vpop.f32.mrb[158].mxu0 }
 0x409   : > { %v3507_v9 = vpop.f32.mrb[143].mxu1  ;;  %v3571_v57 = vpop.f32.mrb[159].mxu0 }
 0x40a   : > { %v2798_v44 = vadd.f32 %v3505_v13, %v5003_v61  ;;  %v3508_v11 = vadd.f32 %v3507_v9, %v3506_v60  ;;  %v3572_v6 = vadd.f32 %v3571_v57, %v3570_v8 }
 0x40c   : > { %v2801_v1 = vadd.f32 %v3508_v11, %v5003_v61  ;;  %v2895_v17 = vadd.f32 %v3569_v38, %v2798_v44 }
 0x40e   : > { %v3683_v18 = vpop.f32.mrb[144].mxu1  ;;  %v2898_v2 = vadd.f32 %v3572_v6, %v2801_v1 }
 0x40f   : > { %v2944_v22 = vadd.f32 %v3683_v18, %v5013_v52  ;;  %v2935_v10 = vpop.f32.mrb[145].mxu1 }
 0x410   : > { %v2936_v43 = vadd.f32 %v2935_v10, %v5007_v23  ;;  %v3684_v24 = vpop.f32.mrb[146].mxu1 }
 0x411   : > { %3000 = vst [vmem:[%s5050_s19 + $0x10] sm:$0xff] %v2944_v22  ;;  %v2947_v61 = vadd.f32 %v3684_v24, %v5015_v41  ;;  %v2938_v26 = vpop.f32.mrb[147].mxu1 }
 0x412   : > { %2998 = vst [vmem:[%s5050_s19] sm:$0xff] %v2936_v43  ;;  %v2939_v52 = vadd.f32 %v2938_v26, %v5009_v15 }
 0x413   : > { %3001 = vst [vmem:[%s5050_s19 + $0x18] sm:$0xff] %v2947_v61 }
 0x414   : > { %2999 = vst [vmem:[%s5050_s19 + $0x8] sm:$0xff] %v2939_v52 }
 0x416   : > { %v3687_v23 = vpop.f32.mrb[148].mxu1 }
 0x417   : > { %v2960_v29 = vadd.f32 %v3687_v23, %v5025_v14  ;;  %v2951_v33 = vpop.f32.mrb[149].mxu1 }
 0x418   : > { %v2952_v37 = vadd.f32 %v2951_v33, %v5019_v58  ;;  %v3688_v34 = vpop.f32.mrb[150].mxu1 }
 0x419   : > { %3004 = vst [vmem:[%s5050_s19 + $0x30] sm:$0xff] %v2960_v29  ;;  %v2963_v41 = vadd.f32 %v3688_v34, %v5027_v51  ;;  %v2954_v4 = vpop.f32.mrb[151].mxu1 }
 0x41a   : > { %3002 = vst [vmem:[%s5050_s19 + $0x20] sm:$0xff] %v2952_v37  ;;  %v2955_v15 = vadd.f32 %v2954_v4, %v5021_v31 }
 0x41b   : > { %3005 = vst [vmem:[%s5050_s19 + $0x38] sm:$0xff] %v2963_v41 }
 0x41c   : > { %3003 = vst [vmem:[%s5050_s19 + $0x28] sm:$0xff] %v2955_v15 }
 0x41e   : > { %v3691_v14 = vpop.f32.mrb[152].mxu1 }
 0x41f   : > { %v2976_v35 = vadd.f32 %v3691_v14, %v2879_v20  ;;  %v2967_v36 = vpop.f32.mrb[153].mxu1 }
 0x420   : > { %v2968_v58 = vadd.f32 %v2967_v36, %v5031_v25  ;;  %v3692_v62 = vpop.f32.mrb[154].mxu1 }
 0x421   : > { %3008 = vst [vmem:[%s5050_s19 + $0x50] sm:$0xff] %v2976_v35  ;;  %v2979_v51 = vadd.f32 %v3692_v62, %v5037_v48  ;;  %v2970_v45 = vpop.f32.mrb[155].mxu1 }
 0x422   : > { %3006 = vst [vmem:[%s5050_s19 + $0x40] sm:$0xff] %v2968_v58  ;;  %v2971_v39 = vadd.f32 %v2970_v45, %v5033_v32 }
 0x423   : > { %3009 = vst [vmem:[%s5050_s19 + $0x58] sm:$0xff] %v2979_v51 }
 0x424   : > { %3007 = vst [vmem:[%s5050_s19 + $0x48] sm:$0xff] %v2971_v39 }
 0x426   : > { %v3695_v31 = vpop.f32.mrb[156].mxu1 }
 0x427   : > { %v2992_v42 = vadd.f32 %v3695_v31, %v2895_v17  ;;  %v2983_v25 = vpop.f32.mrb[157].mxu1 }
 0x428   : > { %v2984_v0 = vadd.f32 %v2983_v25, %v2887_v55  ;;  %v3696_v40 = vpop.f32.mrb[158].mxu1 }
 0x429   : > { %3012 = vst [vmem:[%s5050_s19 + $0x70] sm:$0xff] %v2992_v42  ;;  %v2995_v20 = vadd.f32 %v3696_v40, %v2898_v2  ;;  %v2986_v30 = vpop.f32.mrb[159].mxu1 }
 0x42a   : > { %3010 = vst [vmem:[%s5050_s19 + $0x60] sm:$0xff] %v2984_v0  ;;  %v2987_v32 = vadd.f32 %v2986_v30, %v5041_v63 }
 0x42b   : > { %3013 = vst [vmem:[%s5050_s19 + $0x78] sm:$0xff] %v2995_v20 }
 0x42c   : > { %3011 = vst [vmem:[%s5050_s19 + $0x68] sm:$0xff] %v2987_v32 }
 0x42d   : > { %3915 = shalt.err (!%p3912_p3)
}
 0x42e   : > { %s3916_s18 = scalar_lea.hbm %s5079_s29, 2048  ;;  %s3920_s19 = scalar_lea.hbm %s5142_s12, 4096 }
 0x42f   : > { %p3917_p4 = scmp.ne.s32.totalorder %s5079_s29, %s3916_s18  ;;  %p3921_p9 = scmp.lt.u32.totalorder %s5079_s29, %s5142_s12 }
 0x430   : > { %p3922_p10 = scmp.lt.u32.totalorder %s3920_s19, %s3916_s18  ;;  %p3924_p12 = scmp.lt.u32.totalorder %s3916_s18, %s5079_s29 }
 0x431   : > { %p3918_p7 = pnand %p3917_p4, %p4074_p5 }
 0x432   : > { %p3923_p11 = por %p3922_p10, %p3921_p9 }
 0x433   : > { %p3919_p8 = pneg %p3918_p7 }
 0x434   : > { %p3925_p13 = por %p3924_p12, %p3923_p11 }
 0x436   : > { %p3926_p0 = pnand %p3925_p13, %p3919_p8 }
 0x438   : > { %3929 = shalt.err (!%p3926_p0)
}
 0x439   : > { %s3969_s28 = smov 128   ;;  %s3970_s27 = smov 8  }
 0x43a   : > { %3697 = dma.vmem_to_hbm [thread:$0]  (%p4074_p5), %s5081_s17, 2048, %s5079_s29, %s5089_s25, %s3969_s28, %s3969_s28, %s3970_s27  }
 0x43b PF: > { %p3703_p1 = scmp.ge.s32.totalorder %s3964_s24, 2  ;;  %s3043_s15 = sand.u32 1, %s3952_s21  }
 0x43c   : > { %s3044_s16 = scalar_lea.sflag [#allocation3], %s3043_s15 }
 0x43d   : > { %p3700_p2 = pnand %p3703_p1, %p4078_p6 }
 0x43f   : > { %3947 = dma.done.wait (!%p3700_p2), %s3044_s16, 2048  }
 0x440   : > { %3949 = vsyncadd (!%p3700_p2), %s3044_s16, 4294965248  ;;  %s5154_s24 = sld [smem:[#allocation6_spill]]  ;;  %s5155_s18 = sld [smem:[#allocation5_spill]] }
 0x441   : > { %s5156_s23 = sld [smem:[#allocation7_spill]]  ;;  %s5157_s21 = smov %s3956_s22 }
 0x446   : > { %p22_p3 = scmp.ge.s32.totalorder %s5154_s24, 4   ;;  %s5158_s22 = smov %s5155_s18 }
 0x448   :  { %24 = sbr.rel (!%p22_p3) target bundleno = 3 (0x3), region = 106 }
 0x44f   :  { %3049 = vsyncpa [#allocation3], 1 }
 0x450   :  { %3051 = vsyncpa [#allocation3 + $0x1], 1 }

// kernel: tpu_custom_call.1
= control target key start
LH: loop header
LB: loop body
LE: loop exit
PB: predicated region body
PF: predicated region fallthrough
CT: control target
= control target key end

     0   :  { %17 = vsyncpa [#allocation3], 0  ;;  %s5130_s0 = inlined_call_operand.vmem [shape: f32[256,32], index: 0, kind: input, shape index: {}]   ;;  %s5131_s1 = inlined_call_operand.vmem [shape: f32[256,32], index: 1, kind: input, shape index: {}]   ;;  %s5132_s2 = inlined_call_operand.vmem [shape: f32[1,32], index: 2, kind: input, shape index: {}]   ;;  %s5133_s3 = inlined_call_operand.vmem [shape: f32[1,32], index: 3, kind: input, shape index: {}]   ;;  %s5134_s4 = inlined_call_operand.vmem [shape: bf16[32,640], index: 4, kind: input, shape index: {}]   ;;  %s5135_s5 = inlined_call_operand.vmem [shape: f32[1,640], index: 5, kind: input, shape index: {}]   ;;  %s5136_s6 = inlined_call_operand.vmem [shape: bf16[640,32], index: 6, kind: input, shape index: {}]   ;;  %s5137_s7 = inlined_call_operand.vmem [shape: f32[1,32], index: 7, kind: input, shape index: {}]   ;;  %s5138_s8 = inlined_call_operand.vmem [shape: bf16[64,640], index: 8, kind: input, shape index: {}]   ;;  %s5139_s9 = inlined_call_operand.vmem [shape: f32[1,640], index: 9, kind: input, shape index: {}]   ;;  %s5140_s10 = inlined_call_operand.vmem [shape: bf16[640,128], index: 10, kind: input, shape index: {}]   ;;  %s5141_s11 = inlined_call_operand.vmem [shape: f32[1,128], index: 11, kind: input, shape index: {}]   ;;  %s5142_s12 = inlined_call_operand.hbm [shape: f32[256,128], index: 12, kind: output, shape index: {}]  }
   0x1   :  { %19 = vsyncpa [#allocation3 + $0x1], 0  ;;  %s4036_s21 = smov 0   ;;  %s4038_s22 = smov 0  }
   0x2   :  { %s4040_s23 = smov 0   ;;  %s4042_s24 = smov 0  }
   0x3 LB: > { %5147 = sst [smem:[#allocation5_spill]] %s3960_s23  ;;  %s4057_s25 = sadd.s32 4294967295, %s3964_s24   ;;  %s3964_s24 = sphi %s4042_s24, %s5154_s24   ;;  %s3960_s23 = sphi %s4040_s23, %s5156_s23   ;;  %s3956_s22 = sphi %s4038_s22, %s5158_s22   ;;  %s3952_s21 = sphi %s4036_s21, %s5157_s21  }
   0x4   : > { %s3102_s26 = sadd.s32 4294967294, %s3964_s24   ;;  %s4061_s27 = sadd.s32 1, %s3964_s24  }
   0x5   : > { %5148 = sst [smem:[#allocation6_spill]] %s4061_s27  ;;  %s294_s28 = sadd.s32 1, %s3960_s23 }
   0x6   : > { %s291_s29 = ssub.s32 %s3964_s24, %s4061_s27  ;;  %p304_p0 = scmp.ne.s32.totalorder %s3960_s23, %s3956_s22 }
   0x7   : > { %p292_p1 = scmp.eq.s32.totalorder %s291_s29, 0  ;;  %p305_p2 = scmp.eq.s32.totalorder %s4057_s25, 1 }
   0x8   : > { %p310_p3 = scmp.ne.s32.totalorder %s3956_s22, %s3952_s21  ;;  %p311_p4 = scmp.eq.s32.totalorder %s3102_s26, 1 }
   0x9   : > { %s4072_s30 = scalar_select %p292_p1, %s3960_s23, %s294_s28  }
   0xa   : > { %p4074_p5 = por %p305_p2, %p304_p0  ;;  %p4078_p6 = por %p311_p4, %p310_p3 }
   0xb   : > { %5149 = sst [smem:[#allocation7_spill]] %s4072_s30  ;;  %p3105_p7 = scmp.ge.s32.totalorder %s3964_s24, 1 }
   0xc   : > { %s5151_s14 = scalar_select %p4078_p6, 1, 0 }
   0xd   : > { %p377_p8 = scmp.lt.s32.totalorder %s3964_s24, 3 }
   0xe   : > { %5152 = sst [smem:[#allocation8_spill]] %s5151_s14 }
   0xf   : > { %p378_p9 = pnand %p3105_p7, %p377_p8 }
  0x10   : > { %v3780_v0 = vld [vmem:[%s5134_s4 + $0x4] ss:$20 sps:$4 sm:$0xff] (!%p378_p9)   ;;  %s3107_s17 = sshll.u32 (!%p378_p9), %s4057_s25, 4  ;;  %v3782_v1 = vld [vmem:[%s5134_s4] ss:$20 sps:$4 sm:$0xff] (!%p378_p9)   ;;  %v3966_v2 = vmov (!%p378_p9), 0  }
  0x11   : > { %381 = sbr.rel (%p378_p9) target bundleno = 1083 (0x43b), region = 68  ;;  %720 = vmatprep.mubr.bf16.mxu0 (!%p378_p9), %v3966_v2  ;;  %p425_p10 = scmp.lt.s32.totalorder (!%p378_p9), %s3107_s17, 31  ;;  %833 = vmatprep.mubr.bf16.mxu1 (!%p378_p9), %v3966_v2  ;;  %v3783_v3 = vld [vmem:[%s5134_s4 + $0xc] ss:$20 sps:$4 sm:$0xff] (!%p378_p9)   ;;  %v3787_v5 = vld [vmem:[%s5134_s4 + $0x8] ss:$20 sps:$4 sm:$0xff] (!%p378_p9)  }
  0x12   : > { %688 = vmatprep.subr.bf16.mxu0 (!%p378_p9), %v3780_v0  ;;  %v3785_v4 = vld [vmem:[%s5134_s4 + $0x2c] ss:$20 sps:$4 sm:$0xff] (!%p378_p9)   ;;  %v3788_v6 = vld [vmem:[%s5134_s4 + $0x28] ss:$20 sps:$4 sm:$0xff] (!%p378_p9)   ;;  %801 = vmatprep.subr.bf16.mxu1 (!%p378_p9), %v3783_v3  ;;  %v3791_v8 = vld [vmem:[%s5134_s4 + $0x30] ss:$20 sps:$4 sm:$0xff] (!%p378_p9)  }
  0x13   : > { %689 = vmatpush1.bf16.msra.mxu0 (!%p378_p9), %v3782_v1  ;;  %v3789_v7 = vld [vmem:[%s5134_s4 + $0x34] ss:$20 sps:$4 sm:$0xff] (!%p378_p9)   ;;  %802 = vmatpush1.bf16.msra.mxu1 (!%p378_p9), %v3787_v5  ;;  %v3792_v9 = vld [vmem:[%s5134_s4 + $0x10] ss:$20 sps:$4 sm:$0xff] (!%p378_p9)   ;;  %v4117_v10 = vld [vmem:[%s5132_s2] ss:$0 sm:$0xff] (!%p378_p9) }
  0x14   : > { %690 = vmatprep.subr.bf16.mxu0 (!%p378_p9), %v3785_v4  ;;  %803 = vmatprep.subr.bf16.mxu1 (!%p378_p9), %v3789_v7  ;;  %v3794_v11 = vld [vmem:[%s5136_s6 + $0x40] sm:$0xff] (!%p378_p9)   ;;  %vm663_vm0 = vcmask (!%p378_p9), 261120   ;;  %v3793_v45 = vld [vmem:[%s5134_s4 + $0x38] ss:$20 sps:$4 sm:$0xff] (!%p378_p9)   ;;  %v3798_v4 = vld [vmem:[%s5136_s6 + $0x50] sm:$0xff] (!%p378_p9)   ;;  %s3967_s23 = smov (!%p378_p9), 32  }
  0x15   : > { %v4135_v12 = vld [vmem:[%s5133_s3] ss:$0 sm:$0xff] (!%p378_p9)  ;;  %v3796_v63 = vld [vmem:[%s5136_s6 + $0x48] sm:$0xff] (!%p378_p9)   ;;  %vm1992_vm1 = vcmask (!%p378_p9), 523264   ;;  %s3968_s14 = smov (!%p378_p9), [#allocation2]  }
  0x16   : > { %v3795_v55 = vld [vmem:[%s5136_s6] sm:$0xff] (!%p378_p9)   ;;  %v3797_v1 = vld [vmem:[%s5136_s6 + $0x8] sm:$0xff] (!%p378_p9)  }
  0x17   : > { %691 = vmatpush1.bf16.msra.mxu0 (!%p378_p9), %v3788_v6  ;;  %804 = vmatpush1.bf16.msra.mxu1 (!%p378_p9), %v3791_v8 }
  0x18   : > { %s5160_s17 = smov (!%p425_p10, %s3107_s17), 31  ;;  %3589 = vmatprep.subr.bf16.mxu0 %v3792_v9  ;;  %3289 = vmatprep.subr.bf16.mxu1 %v3794_v11 }
  0x19   : > { %s3108_s15 = sshll.u32 %s5160_s17, 3 }
  0x1a   : > { %s4125_s20 = scalar_lea.vmem %s5130_s0, %s3108_s15  ;;  %s4130_s17 = scalar_lea.vmem %s5131_s1, %s3108_s15 }
  0x1b   : > { %v4138_v13 = vld [vmem:[%s4125_s20] sm:$0xff]  ;;  %v4141_v14 = vld [vmem:[%s4125_s20 + $0x8] sm:$0xff]  ;;  %v4150_v20 = vld [vmem:[%s4125_s20 + $0x10] sm:$0xff]  ;;  %s3906_s15 = sshll.u32 %s3968_s14, 4  ;;  %s3907_s15 = int_to_ptr.vmem [resolvable:$false] %s3906_s15 }
  0x1c   : > { %v500_v15 = vld [vmem:[%s4130_s17] sm:$0xff]  ;;  %v461_v16 = vmul.f32 %v4117_v10, %v4138_v13  ;;  %v462_v17 = vmul.f32 %v4117_v10, %v4141_v14  ;;  %v501_v18 = vld [vmem:[%s4130_s17 + $0x8] sm:$0xff]  ;;  %v4153_v21 = vld [vmem:[%s4125_s20 + $0x18] sm:$0xff]  ;;  %v463_v23 = vmul.f32 %v4117_v10, %v4150_v20  ;;  %s3908_s16 = scalar_lea.vmem %s3907_s15, 4096 }
  0x1d   : > { %v516_v19 = vmul.f32 0.1, %v500_v15  ;;  %v517_v22 = vmul.f32 0.1, %v501_v18  ;;  %v464_v24 = vmul.f32 %v4117_v10, %v4153_v21  ;;  %v502_v25 = vld [vmem:[%s4130_s17 + $0x10] sm:$0xff]  ;;  %v503_v26 = vld [vmem:[%s4130_s17 + $0x18] sm:$0xff] }
  0x1e   : > { %v484_v27 = vadd.f32 %v4135_v12, %v461_v16  ;;  %v485_v28 = vadd.f32 %v4135_v12, %v462_v17  ;;  %v518_v30 = vmul.f32 0.1, %v502_v25  ;;  %v519_v32 = vmul.f32 0.1, %v503_v26  ;;  %v504_v35 = vld [vmem:[%s4130_s17 + $0x20] sm:$0xff]  ;;  %v4170_v41 = vld [vmem:[%s4125_s20 + $0x28] sm:$0xff] }
  0x1f   : > { %v532_v29 = vadd.f32 1.0, %v516_v19  ;;  %v533_v31 = vadd.f32 1.0, %v517_v22  ;;  %v486_v34 = vadd.f32 %v4135_v12, %v463_v23  ;;  %v487_v37 = vadd.f32 %v4135_v12, %v464_v24  ;;  %v4167_v40 = vld [vmem:[%s4125_s20 + $0x20] sm:$0xff]  ;;  %v505_v42 = vld [vmem:[%s4130_s17 + $0x28] sm:$0xff]  ;;  %v506_v51 = vld [vmem:[%s4130_s17 + $0x30] sm:$0xff] }
  0x20   : > { %v534_v38 = vadd.f32 1.0, %v518_v30  ;;  %v535_v39 = vadd.f32 1.0, %v519_v32  ;;  %v520_v44 = vmul.f32 0.1, %v504_v35  ;;  %v465_v46 = vmul.f32 %v4117_v10, %v4167_v40  ;;  %v4190_v53 = vld [vmem:[%s4125_s20 + $0x30] sm:$0xff]  ;;  %v507_v54 = vld [vmem:[%s4130_s17 + $0x38] sm:$0xff] }
  0x21   : > { %v548_v33 = vmul.f32 %v532_v29, %v484_v27  ;;  %v549_v36 = vmul.f32 %v533_v31, %v485_v28  ;;  %v466_v49 = vmul.f32 %v4117_v10, %v4170_v41  ;;  %v521_v50 = vmul.f32 0.1, %v505_v42  ;;  %v4198_v57 = vld [vmem:[%s4125_s20 + $0x38] sm:$0xff]  ;;  %v508_v62 = vld [vmem:[%s4130_s17 + $0x40] sm:$0xff]  ;;  %v509_v8 = vld [vmem:[%s4130_s17 + $0x48] sm:$0xff] }
  0x22   : > { %v550_v47 = vmul.f32 %v534_v38, %v486_v34  ;;  %v551_v48 = vmul.f32 %v535_v39, %v487_v37  ;;  %v536_v52 = vadd.f32 1.0, %v520_v44  ;;  %v488_v56 = vadd.f32 %v4135_v12, %v465_v46  ;;  %v4225_v16 = vld [vmem:[%s4125_s20 + $0x40] sm:$0xff]  ;;  %v3799_v17 = vld [vmem:[%s5136_s6 + $0x10] sm:$0xff]   ;;  %v3800_v18 = vld [vmem:[%s5136_s6 + $0x58] sm:$0xff]  }
  0x23   : > { %v4173_v43 = vpack.c.bf16 %v549_v36, %v548_v33  ;;  %v489_v59 = vadd.f32 %v4135_v12, %v466_v49  ;;  %v537_v60 = vadd.f32 1.0, %v521_v50  ;;  %v522_v61 = vmul.f32 0.1, %v506_v51  ;;  %v4234_v19 = vld [vmem:[%s4125_s20 + $0x48] sm:$0xff]  ;;  %v510_v26 = vld [vmem:[%s4130_s17 + $0x50] sm:$0xff]  ;;  %v3801_v27 = vld [vmem:[%s5136_s6 + $0x18] sm:$0xff]  }
  0x24   : > { %v4200_v58 = vpack.c.bf16 %v551_v48, %v550_v47  ;;  %v523_v0 = vmul.f32 0.1, %v507_v54  ;;  %v467_v3 = vmul.f32 %v4117_v10, %v4190_v53  ;;  %v552_v5 = vmul.f32 %v536_v52, %v488_v56  ;;  %v3804_v28 = vld [vmem:[%s5136_s6 + $0xc0] sm:$0xff]   ;;  %v511_v30 = vld [vmem:[%s4130_s17 + $0x58] sm:$0xff]  ;;  %v4263_v38 = vld [vmem:[%s4125_s20 + $0x50] sm:$0xff] }
  0x25   : > { %3123 = vmatmul.mubr.msk.bf16.vlgmr.msra.gmra.mrb[0].mxu0 %vm663_vm0, %v4173_v43  ;;  %3131 = vmatmul.mubr.msk.bf16.vlgmr.msra.gmra.mrb[0].mxu1 %vm663_vm0, %v4173_v43  ;;  %v553_v6 = vmul.f32 %v537_v60, %v489_v59  ;;  %v468_v7 = vmul.f32 %v4117_v10, %v4198_v57  ;;  %v538_v11 = vadd.f32 1.0, %v522_v61  ;;  %v525_v25 = vmul.f32 0.1, %v509_v8  ;;  %v3802_v31 = vld [vmem:[%s5136_s6 + $0x60] sm:$0xff]   ;;  %v4269_v44 = vld [vmem:[%s4125_s20 + $0x58] sm:$0xff]  ;;  %v3807_v46 = vld [vmem:[%s5136_s6 + $0x68] sm:$0xff]  }
  0x26   : > { %3590 = vmatpush3.bf16.msra.mxu0 %v3792_v9  ;;  %730 = vmatprep.mubr.bf16.mxu0 %v3966_v2  ;;  %v524_v9 = vmul.f32 0.1, %v508_v62  ;;  %v539_v15 = vadd.f32 1.0, %v523_v0  ;;  %v490_v23 = vadd.f32 %v4135_v12, %v467_v3  ;;  %v469_v29 = vmul.f32 %v4117_v10, %v4225_v16  ;;  %v512_v35 = vld [vmem:[%s4130_s17 + $0x60] sm:$0xff]  ;;  %v3809_v52 = vld [vmem:[%s5136_s6 + $0x28] sm:$0xff]  }
  0x27   : > { %843 = vmatprep.mubr.bf16.mxu1 %v3966_v2  ;;  %3591 = vmatprep.subr.bf16.mxu0 %v3793_v45  ;;  %v4236_v22 = vpack.c.bf16 %v553_v6, %v552_v5  ;;  %v491_v24 = vadd.f32 %v4135_v12, %v468_v7  ;;  %v470_v34 = vmul.f32 %v4117_v10, %v4234_v19  ;;  %v526_v36 = vmul.f32 0.1, %v510_v26  ;;  %v3803_v39 = vld [vmem:[%s5136_s6 + $0x20] sm:$0xff]  }
  0x28   : > { %3290 = vmatpush3.bf16.msra.mxu1 %v3795_v55  ;;  %v554_v32 = vmul.f32 %v538_v11, %v490_v23  ;;  %v540_v37 = vadd.f32 1.0, %v524_v9  ;;  %v541_v42 = vadd.f32 1.0, %v525_v25  ;;  %v492_v48 = vadd.f32 %v4135_v12, %v469_v29  ;;  %v3813_v55 = vld [vmem:[%s5136_s6 + $0x70] sm:$0xff]   ;;  %v4296_v62 = vld [vmem:[%s4125_s20 + $0x60] sm:$0xff]  ;;  %v515_v25 = vld [vmem:[%s4130_s17 + $0x78] sm:$0xff] }
  0x29   : > { %3291 = vmatprep.subr.bf16.mxu1 %v3796_v63  ;;  %v555_v33 = vmul.f32 %v539_v15, %v491_v24  ;;  %v493_v49 = vadd.f32 %v4135_v12, %v470_v34  ;;  %v527_v50 = vmul.f32 0.1, %v511_v30  ;;  %v528_v51 = vmul.f32 0.1, %v512_v35  ;;  %v3815_v63 = vld [vmem:[%s5136_s6 + $0x30] sm:$0xff]   ;;  %v4319_v24 = vld [vmem:[%s4125_s20 + $0x78] sm:$0xff] }
  0x2a   : > { %3592 = vmatpush3.bf16.msra.mxu0 %v3793_v45  ;;  %v513_v45 = vld [vmem:[%s4130_s17 + $0x68] sm:$0xff]  ;;  %v471_v54 = vmul.f32 %v4117_v10, %v4263_v38  ;;  %v556_v56 = vmul.f32 %v540_v37, %v492_v48  ;;  %v472_v60 = vmul.f32 %v4117_v10, %v4269_v44  ;;  %v473_v9 = vmul.f32 %v4117_v10, %v4296_v62  ;;  %v514_v23 = vld [vmem:[%s4130_s17 + $0x70] sm:$0xff] }
  0x2b   : > { %3353 = vmatprep.subr.bf16.mxu0 %v3804_v28  ;;  %v4275_v47 = vpack.c.bf16 %v555_v33, %v554_v32  ;;  %v557_v59 = vmul.f32 %v541_v42, %v493_v49  ;;  %v529_v61 = vmul.f32 0.1, %v513_v45  ;;  %v543_v3 = vadd.f32 1.0, %v527_v50  ;;  %v3806_v48 = vld [vmem:[%s5136_s6 + $0xc8] sm:$0xff]   ;;  %v3810_v50 = vld [vmem:[%s5136_s6 + $0xd0] sm:$0xff]  }
  0x2c   : > { %3292 = vmatpush3.bf16.msra.mxu1 %v3797_v1  ;;  %v494_v0 = vadd.f32 %v4135_v12, %v471_v54  ;;  %v542_v1 = vadd.f32 1.0, %v526_v36  ;;  %v495_v6 = vadd.f32 %v4135_v12, %v472_v60  ;;  %v544_v7 = vadd.f32 1.0, %v528_v51  ;;  %v3808_v49 = vld [vmem:[%s5136_s6 + $0x88] sm:$0xff]   ;;  %v3812_v51 = vld [vmem:[%s5136_s6 + $0xd8] sm:$0xff]  }
  0x2d   : > { %3124 = vmatmul.mubr.msk.bf16.gmra.mrb[4].mxu0 %vm663_vm0, %v4200_v58  ;;  %3132 = vmatmul.mubr.msk.bf16.gmra.mrb[4].mxu1 %vm663_vm0, %v4200_v58  ;;  %v568_v5 = vpack.c.bf16 %v557_v59, %v556_v56  ;;  %v545_v8 = vadd.f32 1.0, %v529_v61  ;;  %v530_v30 = vmul.f32 0.1, %v514_v23  ;;  %v476_v33 = vmul.f32 %v4117_v10, %v4319_v24  ;;  %v3820_v54 = vld [vmem:[%s5136_s6 + $0xa8] sm:$0xff]   ;;  %v3823_v56 = vld [vmem:[%s5136_s6 + $0xb0] sm:$0xff]   ;;  %v3819_v59 = vld [vmem:[%s5136_s6 + $0x78] sm:$0xff]  }
  0x2e   : > { %740 = vmatprep.mubr.bf16.mxu0 %v3966_v2  ;;  %853 = vmatprep.mubr.bf16.mxu1 %v3966_v2  ;;  %v558_v11 = vmul.f32 %v542_v1, %v494_v0  ;;  %v559_v15 = vmul.f32 %v543_v3, %v495_v6  ;;  %v531_v34 = vmul.f32 0.1, %v515_v25  ;;  %v3821_v60 = vld [vmem:[%s5136_s6 + $0x38] sm:$0xff]   ;;  %v4406_v0 = vld [vmem:[%s5136_s6 + $0x100] sm:$0xff]   ;;  %v3740_v1 = vpack.i.bf16 %v4141_v14, %v4138_v13 }
  0x2f   : > { %3293 = vmatprep.subr.bf16.mxu1 %v3798_v4  ;;  %v4303_v4 = vld [vmem:[%s4125_s20 + $0x68] sm:$0xff]  ;;  %v546_v35 = vadd.f32 1.0, %v530_v30  ;;  %v3824_v61 = vld [vmem:[%s5136_s6 + $0xf8] sm:$0xff]   ;;  %v3750_v3 = vpack.i.bf16 %v4170_v41, %v4167_v40  ;;  %v3755_v6 = vpack.i.bf16 %v4198_v57, %v4190_v53  ;;  %v3760_v13 = vpack.i.bf16 %v4234_v19, %v4225_v16  ;;  %v4432_v57 = vld [vmem:[%s5135_s5] sm:$0x1f] }
  0x30   : > { %3294 = vmatpush3.bf16.msra.mxu1 %v3799_v17  ;;  %v474_v17 = vmul.f32 %v4117_v10, %v4303_v4  ;;  %v569_v26 = vpack.c.bf16 %v559_v15, %v558_v11  ;;  %v547_v42 = vadd.f32 1.0, %v531_v34  ;;  %3741 = vrot.lane.b32.xlu0 %v3740_v1, %s3967_s23 }
  0x31   : > { %3295 = vmatprep.subr.bf16.mxu1 %v3800_v18  ;;  %v4315_v18 = vld [vmem:[%s4125_s20 + $0x70] sm:$0xff]  ;;  %3751 = vrot.lane.b32.xlu1 %v3750_v3, %s3967_s23  ;;  %s3278_s20 = sshll.u32 %s4057_s25, 11 }
  0x32   : > { %v497_v28 = vadd.f32 %v4135_v12, %v474_v17  ;;  %v475_v29 = vmul.f32 %v4117_v10, %v4315_v18  ;;  %v3775_v14 = vpack.i.bf16 %v4319_v24, %v4315_v18  ;;  %s5079_s29 = scalar_lea.hbm %s5142_s12, %s3278_s20 }
  0x34   : > { %3296 = vmatpush3.bf16.msra.mxu1 %v3801_v27  ;;  %v496_v27 = vadd.f32 %v4135_v12, %v473_v9  ;;  %v561_v32 = vmul.f32 %v545_v8, %v497_v28  ;;  %v498_v37 = vadd.f32 %v4135_v12, %v475_v29 }
  0x35   : > { %3125 = vmatmul.mubr.msk.bf16.gmra.mrb[8].mxu0 %vm663_vm0, %v4236_v22  ;;  %3133 = vmatmul.mubr.msk.bf16.gmra.mrb[8].mxu1 %vm663_vm0, %v4236_v22 }
  0x36   : > { %750 = vmatprep.mubr.bf16.mxu0 %v3966_v2  ;;  %863 = vmatprep.mubr.bf16.mxu1 %v3966_v2  ;;  %v562_v45 = vmul.f32 %v546_v35, %v498_v37 }
  0x37   : > { %3297 = vmatprep.subr.bf16.mxu1 %v3802_v31  ;;  %v560_v31 = vmul.f32 %v544_v7, %v496_v27  ;;  %3756 = vrot.lane.b32.xlu1 %v3755_v6, %s3967_s23  ;;  %v3765_v7 = vpack.i.bf16 %v4269_v44, %v4263_v38 }
  0x38   : > { %3298 = vmatpush3.bf16.msra.mxu1 %v3803_v39  ;;  %v499_v39 = vadd.f32 %v4135_v12, %v476_v33  ;;  %v3805_v12 = vld [vmem:[%s5136_s6 + $0x80] sm:$0xff]  }
  0x39   : > { %3299 = vmatprep.subr.bf16.mxu1 %v3807_v46  ;;  %v570_v36 = vpack.c.bf16 %v561_v32, %v560_v31 }
  0x3a   : > { %v563_v46 = vmul.f32 %v547_v42, %v499_v39 }
  0x3b   : > { %3766 = vrot.lane.b32.xlu1 %v3765_v7, %s3967_s23 }
  0x3c   : > { %3300 = vmatpush3.bf16.msra.mxu1 %v3809_v52  ;;  %v571_v10 = vpack.c.bf16 %v563_v46, %v562_v45  ;;  %v3817_v52 = vld [vmem:[%s5136_s6 + $0xa0] sm:$0xff]  }
  0x3d   : > { %3126 = vmatmul.mubr.msk.bf16.gmra.mrb[12].mxu0 %vm663_vm0, %v4275_v47  ;;  %3134 = vmatmul.mubr.msk.bf16.gmra.mrb[12].mxu1 %vm663_vm0, %v4275_v47 }
  0x3e   : > { %760 = vmatprep.mubr.bf16.mxu0 %v3966_v2  ;;  %873 = vmatprep.mubr.bf16.mxu1 %v3966_v2 }
  0x3f   : > { %3301 = vmatprep.subr.bf16.mxu1 %v3813_v55  ;;  %v3822_v55 = vld [vmem:[%s5136_s6 + $0xf0] sm:$0xff]   ;;  %3776 = vrot.lane.b32.xlu1 %v3775_v14, %s3967_s23 }
  0x40   : > { %3302 = vmatpush3.bf16.msra.mxu1 %v3815_v63  ;;  %v3825_v63 = vld [vmem:[%s5136_s6 + $0xb8] sm:$0xff]  }
  0x41   : > { %3303 = vmatprep.subr.bf16.mxu1 %v3819_v59 }
  0x44   : > { %3304 = vmatpush3.bf16.msra.mxu1 %v3821_v60 }
  0x45   : > { %3127 = vmatmul.mubr.msk.bf16.gmra.mrb[16].mxu0 %vm663_vm0, %v568_v5  ;;  %3135 = vmatmul.mubr.msk.bf16.gmra.mrb[16].mxu1 %vm663_vm0, %v568_v5 }
  0x46   : > { %770 = vmatprep.mubr.bf16.mxu0 %v3966_v2  ;;  %883 = vmatprep.mubr.bf16.mxu1 %v3966_v2 }
  0x47   : > { %3609 = vmatprep.subr.bf16.mxu1 %v4406_v0 }
  0x4d   : > { %3128 = vmatmul.mubr.msk.bf16.gmra.mrb[20].mxu0 %vm663_vm0, %v569_v26  ;;  %3136 = vmatmul.mubr.msk.bf16.gmra.mrb[20].mxu1 %vm663_vm0, %v569_v26 }
  0x4e   : > { %780 = vmatprep.mubr.bf16.mxu0 %v3966_v2  ;;  %893 = vmatprep.mubr.bf16.mxu1 %v3966_v2 }
  0x55   : > { %3129 = vmatmul.mubr.msk.bf16.gmra.mrb[24].mxu0 %vm663_vm0, %v570_v36  ;;  %3137 = vmatmul.mubr.msk.bf16.gmra.mrb[24].mxu1 %vm663_vm0, %v570_v36 }
  0x56   : > { %790 = vmatprep.mubr.bf16.mxu0 %v3966_v2  ;;  %903 = vmatprep.mubr.bf16.mxu1 %v3966_v2 }
  0x5d   : > { %3130 = vmatmul.mubr.msk.bf16.gmra.mrb[28].mxu0 %vm663_vm0, %v571_v10  ;;  %3138 = vmatmul.mubr.msk.bf16.gmra.mrb[28].mxu1 %vm663_vm0, %v571_v10 }
  0x5e   : > { %3593 = vmatprep.mubr.msk.bf16.mxu0 %vm663_vm0, %v4173_v43  ;;  %v3811_v43 = vld [vmem:[%s5136_s6 + $0x90] sm:$0xff]  }
  0x65   : > { %3594 = vmatmul.mubr.msk.bf16.vlgmr.msra.gmra.mrb[32].mxu0 %vm663_vm0, %v4200_v58  ;;  %v3814_v58 = vld [vmem:[%s5136_s6 + $0x98] sm:$0xff]  }
  0x66   : > { %3597 = vmatprep.mubr.msk.bf16.mxu0 %vm663_vm0, %v4236_v22  ;;  %3354 = vmatpush3.bf16.msra.mxu0 %v3805_v12  ;;  %v3816_v22 = vld [vmem:[%s5136_s6 + $0xe0] sm:$0xff]  }
  0x67   : > { %3355 = vmatprep.subr.bf16.mxu0 %v3806_v48 }
  0x6a   : > { %3356 = vmatpush3.bf16.msra.mxu0 %v3808_v49 }
  0x6b   : > { %3357 = vmatprep.subr.bf16.mxu0 %v3810_v50 }
  0x6d   : > { %3598 = vmatmul.mubr.msk.bf16.gmra.mrb[36].mxu0 %vm663_vm0, %v4275_v47  ;;  %v3818_v47 = vld [vmem:[%s5136_s6 + $0xe8] sm:$0xff]  }
  0x6e   : > { %3601 = vmatprep.mubr.msk.bf16.mxu0 %vm663_vm0, %v568_v5  ;;  %3358 = vmatpush3.bf16.msra.mxu0 %v3811_v43  ;;  %v3745_v5 = vpack.i.bf16 %v4153_v21, %v4150_v20  ;;  %v3770_v20 = vpack.i.bf16 %v4303_v4, %v4296_v62  ;;  %v586_v21 = vlaneseq }
  0x6f   : > { %3359 = vmatprep.subr.bf16.mxu0 %v3812_v51 }
  0x70   : > { %3746 = vrot.lane.b32.xlu0 %v3745_v5, %s3967_s23  ;;  %v4425_v40 = vshrl.u32 %v586_v21, 7 }
  0x72   : > { %3360 = vmatpush3.bf16.msra.mxu0 %v3814_v58  ;;  %v588_v41 = vsub.s32 0, %v4425_v40  ;;  %v596_v53 = vsub.s32 2, %v4425_v40  ;;  %v592_v16 = vsub.s32 1, %v4425_v40  ;;  %v600_v19 = vsub.s32 3, %v4425_v40 }
  0x73   : > { %3361 = vmatprep.subr.bf16.mxu0 %v3816_v22 }
  0x74   : > { %3761 = vrot.lane.b32.xlu0 %v3760_v13, %s3967_s23  ;;  %v4439_v38 = vrot.slane %v4432_v57, %v588_v41  ;;  %v4444_v44 = vrot.slane %v4432_v57, %v596_v53  ;;  %v4449_v62 = vrot.slane %v4432_v57, %v592_v16  ;;  %v4454_v4 = vrot.slane %v4432_v57, %v600_v19 }
  0x75   : > { %3602 = vmatmul.mubr.msk.bf16.gmra.mrb[40].mxu0 %vm663_vm0, %v569_v26 }
  0x76   : > { %3605 = vmatprep.mubr.msk.bf16.mxu0 %vm663_vm0, %v570_v36  ;;  %3362 = vmatpush3.bf16.msra.mxu0 %v3817_v52  ;;  %v3827_v52 = vld [vmem:[%s5136_s6 + $0x108] sm:$0xff]  }
  0x77   : > { %3363 = vmatprep.subr.bf16.mxu0 %v3818_v47 }
  0x78   : > { %3771 = vrot.lane.b32.xlu0 %v3770_v20, %s3967_s23  ;;  %v3828_v20 = vld [vmem:[%s5136_s6 + $0x110] sm:$0xff]   ;;  %s421_s23 = sand.u32 1, %s3956_s22  }
  0x79   : > { %s3106_s30 = sshll.u32 %s421_s23, 7  ;;  %s5089_s25 = scalar_lea.sflag [#allocation3], %s421_s23 }
  0x7a   : > { %3364 = vmatpush3.bf16.msra.mxu0 %v3820_v54  ;;  %s5050_s19 = scalar_lea.vmem [#allocation2], %s3106_s30 }
  0x7b   : > { %3365 = vmatprep.subr.bf16.mxu0 %v3822_v55  ;;  %s3028_s17 = sshll.u32 %s5050_s19, 4  ;;  %s5081_s17 = int_to_ptr.vmem [resolvable:$true] %s3028_s17 }
  0x7c   : > { %s3902_s27 = scalar_lea.vmem %s5081_s17, 2048  ;;  %p3909_p0 = scmp.lt.s32.totalorder %s5081_s17, %s3907_s15 }
  0x7d   : > { %3606 = vmatmul.mubr.msk.bf16.gmra.mrb[44].mxu0 %vm663_vm0, %v571_v10  ;;  %p3903_p11 = scmp.ne.s32.totalorder %s5081_s17, %s3902_s27  ;;  %p3910_p1 = scmp.lt.s32.totalorder %s3908_s16, %s3902_s27 }
  0x7e   : > { %3366 = vmatpush3.bf16.msra.mxu0 %v3823_v56 }
  0x7f   : > { %3367 = vmatprep.subr.bf16.mxu0 %v3824_v61  ;;  %p3904_p12 = pnand %p3903_p11, %p4074_p5  ;;  %p3911_p2 = por %p3910_p1, %p3909_p0 }
  0x81   : > { %p3905_p13 = pneg %p3904_p12 }
  0x82   : > { %3368 = vmatpush3.bf16.msra.mxu0 %v3825_v63 }
  0x83   : > { %p3912_p3 = pnand %p3911_p2, %p3905_p13 }
  0xf8   : > { %v722_v8 = vpop.f32.mrb[0].mxu0  ;;  %v835_v9 = vpop.f32.mrb[0].mxu1 }
  0xf9   : > { %v723_v11 = vadd.f32 %v722_v8, %v4439_v38  ;;  %v724_v15 = vpop.f32.mrb[1].mxu0  ;;  %v836_v17 = vadd.f32 %v835_v9, %v4444_v44  ;;  %v837_v18 = vpop.f32.mrb[1].mxu1 }
  0xfa   : > { %v725_v23 = vadd.f32 %v724_v15, %v4449_v62  ;;  %v726_v24 = vpop.f32.mrb[2].mxu0  ;;  %v838_v25 = vadd.f32 %v837_v18, %v4454_v4  ;;  %v839_v26 = vpop.f32.mrb[2].mxu1 }
  0xfb   : > { %v727_v27 = vadd.f32 %v726_v24, %v4439_v38  ;;  %v1013_v28 = vmax.f32 %v836_v17, 0.0  ;;  %v728_v29 = vpop.f32.mrb[3].mxu0  ;;  %v840_v30 = vadd.f32 %v839_v26, %v4444_v44  ;;  %v841_v31 = vpop.f32.mrb[3].mxu1  ;;  %v1011_v35 = vmax.f32 %v723_v11, 0.0 }
  0xfc   : > { %v729_v32 = vadd.f32 %v728_v29, %v4449_v62  ;;  %v1014_v33 = vmax.f32 %v838_v25, 0.0  ;;  %v842_v34 = vadd.f32 %v841_v31, %v4454_v4  ;;  %v1012_v39 = vmax.f32 %v725_v23, 0.0 }
  0xfd   : > { %v1016_v36 = vmax.f32 %v727_v27, 0.0  ;;  %v1018_v37 = vmax.f32 %v840_v30, 0.0 }
  0xfe   : > { %v1017_v42 = vmax.f32 %v729_v32, 0.0  ;;  %v1019_v45 = vmax.f32 %v842_v34, 0.0 }
  0xff   : > { %v1091_v46 = vpack.c.bf16 %v1016_v36, %v1011_v35  ;;  %v1093_v10 = vpack.c.bf16 %v1018_v37, %v1013_v28  ;;  %v3829_v28 = vld [vmem:[%s5136_s6 + $0x118] sm:$0xff]  }
 0x100   : > { %v1092_v12 = vpack.c.bf16 %v1017_v42, %v1012_v39  ;;  %v1094_v48 = vpack.c.bf16 %v1019_v45, %v1014_v33  ;;  %v732_v49 = vpop.f32.mrb[4].mxu0  ;;  %v845_v50 = vpop.f32.mrb[4].mxu1 }
 0x101   : > { %v733_v43 = vadd.f32 %v732_v49, %v4439_v38  ;;  %v734_v51 = vpop.f32.mrb[5].mxu0  ;;  %v846_v58 = vadd.f32 %v845_v50, %v4444_v44  ;;  %v847_v22 = vpop.f32.mrb[5].mxu1 }
 0x102   : > { %v735_v47 = vadd.f32 %v734_v51, %v4449_v62  ;;  %v736_v54 = vpop.f32.mrb[6].mxu0  ;;  %1490 = vmatprep.mubr.bf16.mxu1 %v1092_v12  ;;  %v848_v55 = vadd.f32 %v847_v22, %v4454_v4  ;;  %v849_v56 = vpop.f32.mrb[6].mxu1  ;;  %1587 = vmatprep.mubr.bf16.mxu0 %v1094_v48  ;;  %v3830_v48 = vld [vmem:[%s5136_s6 + $0x120] sm:$0xff]  }
 0x103   : > { %v737_v59 = vadd.f32 %v736_v54, %v4439_v38  ;;  %v1023_v60 = vmax.f32 %v846_v58, 0.0  ;;  %v738_v61 = vpop.f32.mrb[7].mxu0  ;;  %1491 = vmatmul.mubr.bf16.vlgmr.msra.gmra.mrb[32].mxu1 %v1091_v46  ;;  %v850_v63 = vadd.f32 %v849_v56, %v4444_v44  ;;  %v851_v1 = vpop.f32.mrb[7].mxu1  ;;  %1588 = vmatmul.mubr.bf16.vlgmr.msra.gmra.mrb[48].mxu0 %v1093_v10  ;;  %v1021_v7 = vmax.f32 %v733_v43, 0.0 }
 0x104   : > { %v739_v3 = vadd.f32 %v738_v61, %v4449_v62  ;;  %v1024_v5 = vmax.f32 %v848_v55, 0.0  ;;  %3610 = vmatpush3.bf16.msra.mxu1 %v4406_v0  ;;  %v852_v6 = vadd.f32 %v851_v1, %v4454_v4  ;;  %v1022_v21 = vmax.f32 %v735_v47, 0.0  ;;  %v3831_v61 = vld [vmem:[%s5136_s6 + $0x128] sm:$0xff]  }
 0x105   : > { %v1026_v13 = vmax.f32 %v737_v59, 0.0  ;;  %v1028_v14 = vmax.f32 %v850_v63, 0.0  ;;  %3611 = vmatprep.subr.bf16.mxu1 %v3827_v52 }
 0x106   : > { %v1027_v8 = vmax.f32 %v739_v3, 0.0  ;;  %v1029_v9 = vmax.f32 %v852_v6, 0.0 }
 0x107   : > { %v1096_v11 = vpack.c.bf16 %v1026_v13, %v1021_v7  ;;  %v1098_v15 = vpack.c.bf16 %v1028_v14, %v1023_v60 }
 0x108   : > { %v1097_v17 = vpack.c.bf16 %v1027_v8, %v1022_v21  ;;  %v1099_v18 = vpack.c.bf16 %v1029_v9, %v1024_v5  ;;  %v742_v23 = vpop.f32.mrb[8].mxu0  ;;  %v855_v24 = vpop.f32.mrb[8].mxu1  ;;  %3612 = vmatpush3.bf16.msra.mxu1 %v3827_v52 }
 0x109   : > { %v743_v0 = vadd.f32 %v742_v23, %v4439_v38  ;;  %v744_v25 = vpop.f32.mrb[9].mxu0  ;;  %v856_v26 = vadd.f32 %v855_v24, %v4444_v44  ;;  %v857_v27 = vpop.f32.mrb[9].mxu1  ;;  %3613 = vmatprep.subr.bf16.mxu1 %v3828_v20 }
 0x10a   : > { %v745_v29 = vadd.f32 %v744_v25, %v4449_v62  ;;  %v746_v30 = vpop.f32.mrb[10].mxu0  ;;  %1498 = vmatprep.mubr.bf16.mxu1 %v1097_v17  ;;  %v858_v31 = vadd.f32 %v857_v27, %v4454_v4  ;;  %v859_v32 = vpop.f32.mrb[10].mxu1  ;;  %1595 = vmatprep.mubr.bf16.mxu0 %v1099_v18  ;;  %v3832_v18 = vld [vmem:[%s5136_s6 + $0x130] sm:$0xff]  }
 0x10b   : > { %v747_v33 = vadd.f32 %v746_v30, %v4439_v38  ;;  %v1033_v34 = vmax.f32 %v856_v26, 0.0  ;;  %v748_v35 = vpop.f32.mrb[11].mxu0  ;;  %1499 = vmatmul.mubr.bf16.gmra.mrb[36].mxu1 %v1096_v11  ;;  %v860_v36 = vadd.f32 %v859_v32, %v4444_v44  ;;  %v861_v37 = vpop.f32.mrb[11].mxu1  ;;  %1596 = vmatmul.mubr.bf16.gmra.mrb[52].mxu0 %v1098_v15  ;;  %v1031_v46 = vmax.f32 %v743_v0, 0.0 }
 0x10c   : > { %v749_v39 = vadd.f32 %v748_v35, %v4449_v62  ;;  %v1034_v42 = vmax.f32 %v858_v31, 0.0  ;;  %v862_v45 = vadd.f32 %v861_v37, %v4454_v4  ;;  %3614 = vmatpush3.bf16.msra.mxu1 %v3828_v20  ;;  %v1032_v49 = vmax.f32 %v745_v29, 0.0  ;;  %v3833_v35 = vld [vmem:[%s5136_s6 + $0x138] sm:$0xff]  }
 0x10d   : > { %v1036_v10 = vmax.f32 %v747_v33, 0.0  ;;  %v1038_v12 = vmax.f32 %v860_v36, 0.0  ;;  %3615 = vmatprep.subr.bf16.mxu1 %v3829_v28 }
 0x10e   : > { %v1037_v50 = vmax.f32 %v749_v39, 0.0  ;;  %v1039_v43 = vmax.f32 %v862_v45, 0.0 }
 0x10f   : > { %v1101_v51 = vpack.c.bf16 %v1036_v10, %v1031_v46  ;;  %v1103_v58 = vpack.c.bf16 %v1038_v12, %v1033_v34 }
 0x110   : > { %v1102_v22 = vpack.c.bf16 %v1037_v50, %v1032_v49  ;;  %v1104_v52 = vpack.c.bf16 %v1039_v43, %v1034_v42  ;;  %v752_v47 = vpop.f32.mrb[12].mxu0  ;;  %v865_v54 = vpop.f32.mrb[12].mxu1  ;;  %3616 = vmatpush3.bf16.msra.mxu1 %v3829_v28 }
 0x111   : > { %v753_v55 = vadd.f32 %v752_v47, %v4439_v38  ;;  %v754_v56 = vpop.f32.mrb[13].mxu0  ;;  %v866_v59 = vadd.f32 %v865_v54, %v4444_v44  ;;  %v867_v60 = vpop.f32.mrb[13].mxu1  ;;  %3617 = vmatprep.subr.bf16.mxu1 %v3830_v48 }
 0x112   : > { %v755_v63 = vadd.f32 %v754_v56, %v4449_v62  ;;  %v756_v1 = vpop.f32.mrb[14].mxu0  ;;  %1506 = vmatprep.mubr.bf16.mxu1 %v1102_v22  ;;  %v868_v3 = vadd.f32 %v867_v60, %v4454_v4  ;;  %v869_v5 = vpop.f32.mrb[14].mxu1  ;;  %1603 = vmatprep.mubr.bf16.mxu0 %v1104_v52 }
 0x113   : > { %v757_v6 = vadd.f32 %v756_v1, %v4439_v38  ;;  %v1043_v7 = vmax.f32 %v866_v59, 0.0  ;;  %v758_v13 = vpop.f32.mrb[15].mxu0  ;;  %1507 = vmatmul.mubr.bf16.gmra.mrb[40].mxu1 %v1101_v51  ;;  %v870_v14 = vadd.f32 %v869_v5, %v4444_v44  ;;  %v871_v20 = vpop.f32.mrb[15].mxu1  ;;  %1604 = vmatmul.mubr.bf16.gmra.mrb[56].mxu0 %v1103_v58  ;;  %v1041_v11 = vmax.f32 %v753_v55, 0.0 }
 0x114   : > { %v759_v21 = vadd.f32 %v758_v13, %v4449_v62  ;;  %v1044_v8 = vmax.f32 %v868_v3, 0.0  ;;  %v872_v9 = vadd.f32 %v871_v20, %v4454_v4  ;;  %3618 = vmatpush3.bf16.msra.mxu1 %v3830_v48  ;;  %v1042_v23 = vmax.f32 %v755_v63, 0.0 }
 0x115   : > { %v1046_v15 = vmax.f32 %v757_v6, 0.0  ;;  %v1048_v17 = vmax.f32 %v870_v14, 0.0  ;;  %3619 = vmatprep.subr.bf16.mxu1 %v3831_v61 }
 0x116   : > { %v1047_v24 = vmax.f32 %v759_v21, 0.0  ;;  %v1049_v0 = vmax.f32 %v872_v9, 0.0 }
 0x117   : > { %v1106_v25 = vpack.c.bf16 %v1046_v15, %v1041_v11  ;;  %v1108_v26 = vpack.c.bf16 %v1048_v17, %v1043_v7 }
 0x118   : > { %v1107_v27 = vpack.c.bf16 %v1047_v24, %v1042_v23  ;;  %v1109_v28 = vpack.c.bf16 %v1049_v0, %v1044_v8  ;;  %v762_v29 = vpop.f32.mrb[16].mxu0  ;;  %v875_v30 = vpop.f32.mrb[16].mxu1  ;;  %3620 = vmatpush3.bf16.msra.mxu1 %v3831_v61 }
 0x119   : > { %v763_v31 = vadd.f32 %v762_v29, %v4439_v38  ;;  %v764_v32 = vpop.f32.mrb[17].mxu0  ;;  %v876_v33 = vadd.f32 %v875_v30, %v4444_v44  ;;  %v877_v34 = vpop.f32.mrb[17].mxu1  ;;  %3621 = vmatprep.subr.bf16.mxu1 %v3832_v18 }
 0x11a   : > { %v765_v36 = vadd.f32 %v764_v32, %v4449_v62  ;;  %v766_v37 = vpop.f32.mrb[18].mxu0  ;;  %1514 = vmatprep.mubr.bf16.mxu1 %v1107_v27  ;;  %v878_v39 = vadd.f32 %v877_v34, %v4454_v4  ;;  %v879_v42 = vpop.f32.mrb[18].mxu1  ;;  %1611 = vmatprep.mubr.bf16.mxu0 %v1109_v28 }
 0x11b   : > { %v767_v45 = vadd.f32 %v766_v37, %v4439_v38  ;;  %v1053_v46 = vmax.f32 %v876_v33, 0.0  ;;  %v768_v10 = vpop.f32.mrb[19].mxu0  ;;  %1515 = vmatmul.mubr.bf16.gmra.mrb[44].mxu1 %v1106_v25  ;;  %v880_v12 = vadd.f32 %v879_v42, %v4444_v44  ;;  %v881_v48 = vpop.f32.mrb[19].mxu1  ;;  %1612 = vmatmul.mubr.bf16.gmra.mrb[60].mxu0 %v1108_v26  ;;  %v1051_v51 = vmax.f32 %v763_v31, 0.0 }
 0x11c   : > { %v769_v49 = vadd.f32 %v768_v10, %v4449_v62  ;;  %v1054_v50 = vmax.f32 %v878_v39, 0.0  ;;  %v882_v43 = vadd.f32 %v881_v48, %v4454_v4  ;;  %3622 = vmatpush3.bf16.msra.mxu1 %v3832_v18  ;;  %v1052_v52 = vmax.f32 %v765_v36, 0.0 }
 0x11d   : > { %v1056_v58 = vmax.f32 %v767_v45, 0.0  ;;  %v1058_v22 = vmax.f32 %v880_v12, 0.0  ;;  %3623 = vmatprep.subr.bf16.mxu1 %v3833_v35 }
 0x11e   : > { %v1057_v47 = vmax.f32 %v769_v49, 0.0  ;;  %v1059_v54 = vmax.f32 %v882_v43, 0.0 }
 0x11f   : > { %v1111_v55 = vpack.c.bf16 %v1056_v58, %v1051_v51  ;;  %v1113_v56 = vpack.c.bf16 %v1058_v22, %v1053_v46 }
 0x120   : > { %v1112_v59 = vpack.c.bf16 %v1057_v47, %v1052_v52  ;;  %v1114_v60 = vpack.c.bf16 %v1059_v54, %v1054_v50  ;;  %v772_v61 = vpop.f32.mrb[20].mxu0  ;;  %v885_v63 = vpop.f32.mrb[20].mxu1  ;;  %3624 = vmatpush3.bf16.msra.mxu1 %v3833_v35 }
 0x121   : > { %v773_v1 = vadd.f32 %v772_v61, %v4439_v38  ;;  %v774_v3 = vpop.f32.mrb[21].mxu0  ;;  %v886_v5 = vadd.f32 %v885_v63, %v4444_v44  ;;  %v887_v6 = vpop.f32.mrb[21].mxu1 }
 0x122   : > { %v775_v7 = vadd.f32 %v774_v3, %v4449_v62  ;;  %v776_v13 = vpop.f32.mrb[22].mxu0  ;;  %1522 = vmatprep.mubr.bf16.mxu1 %v1112_v59  ;;  %v888_v14 = vadd.f32 %v887_v6, %v4454_v4  ;;  %v889_v20 = vpop.f32.mrb[22].mxu1  ;;  %1619 = vmatprep.mubr.bf16.mxu0 %v1114_v60 }
 0x123   : > { %v777_v21 = vadd.f32 %v776_v13, %v4439_v38  ;;  %v1063_v8 = vmax.f32 %v886_v5, 0.0  ;;  %v778_v9 = vpop.f32.mrb[23].mxu0  ;;  %1523 = vmatmul.mubr.bf16.gmra.mrb[48].mxu1 %v1111_v55  ;;  %v890_v11 = vadd.f32 %v889_v20, %v4444_v44  ;;  %v891_v15 = vpop.f32.mrb[23].mxu1  ;;  %1620 = vmatmul.mubr.bf16.gmra.mrb[64].mxu0 %v1113_v56  ;;  %v1061_v24 = vmax.f32 %v773_v1, 0.0 }
 0x124   : > { %v779_v17 = vadd.f32 %v778_v9, %v4449_v62  ;;  %v1064_v18 = vmax.f32 %v888_v14, 0.0  ;;  %v892_v23 = vadd.f32 %v891_v15, %v4454_v4  ;;  %v1062_v26 = vmax.f32 %v775_v7, 0.0 }
 0x125   : > { %v1066_v0 = vmax.f32 %v777_v21, 0.0  ;;  %v1068_v25 = vmax.f32 %v890_v11, 0.0  ;;  %v604_v20 = vsub.s32 4, %v4425_v40 }
 0x126   : > { %v1067_v27 = vmax.f32 %v779_v17, 0.0  ;;  %v1069_v28 = vmax.f32 %v892_v23, 0.0 }
 0x127   : > { %v1116_v29 = vpack.c.bf16 %v1066_v0, %v1061_v24  ;;  %v1118_v30 = vpack.c.bf16 %v1068_v25, %v1063_v8 }
 0x128   : > { %v1117_v31 = vpack.c.bf16 %v1067_v27, %v1062_v26  ;;  %v1119_v32 = vpack.c.bf16 %v1069_v28, %v1064_v18  ;;  %v782_v33 = vpop.f32.mrb[24].mxu0  ;;  %v895_v34 = vpop.f32.mrb[24].mxu1 }
 0x129   : > { %v783_v35 = vadd.f32 %v782_v33, %v4439_v38  ;;  %v784_v36 = vpop.f32.mrb[25].mxu0  ;;  %v896_v37 = vadd.f32 %v895_v34, %v4444_v44  ;;  %v897_v39 = vpop.f32.mrb[25].mxu1 }
 0x12a   : > { %v785_v42 = vadd.f32 %v784_v36, %v4449_v62  ;;  %v786_v45 = vpop.f32.mrb[26].mxu0  ;;  %1530 = vmatprep.mubr.bf16.mxu1 %v1117_v31  ;;  %v898_v46 = vadd.f32 %v897_v39, %v4454_v4  ;;  %v899_v10 = vpop.f32.mrb[26].mxu1  ;;  %1627 = vmatprep.mubr.bf16.mxu0 %v1119_v32 }
 0x12b   : > { %v787_v12 = vadd.f32 %v786_v45, %v4439_v38  ;;  %v1073_v48 = vmax.f32 %v896_v37, 0.0  ;;  %v788_v49 = vpop.f32.mrb[27].mxu0  ;;  %1531 = vmatmul.mubr.bf16.gmra.mrb[52].mxu1 %v1116_v29  ;;  %v900_v50 = vadd.f32 %v899_v10, %v4444_v44  ;;  %v901_v43 = vpop.f32.mrb[27].mxu1  ;;  %1628 = vmatmul.mubr.bf16.gmra.mrb[68].mxu0 %v1118_v30  ;;  %v1071_v52 = vmax.f32 %v783_v35, 0.0 }
 0x12c   : > { %v789_v51 = vadd.f32 %v788_v49, %v4449_v62  ;;  %v1074_v58 = vmax.f32 %v898_v46, 0.0  ;;  %v902_v22 = vadd.f32 %v901_v43, %v4454_v4  ;;  %v1072_v55 = vmax.f32 %v785_v42, 0.0 }
 0x12d   : > { %v1076_v47 = vmax.f32 %v787_v12, 0.0  ;;  %v1078_v54 = vmax.f32 %v900_v50, 0.0  ;;  %v4546_v30 = vrot.slane %v4432_v57, %v604_v20 }
 0x12e   : > { %v1077_v56 = vmax.f32 %v789_v51, 0.0  ;;  %v1079_v59 = vmax.f32 %v902_v22, 0.0 }
 0x12f   : > { %v1121_v60 = vpack.c.bf16 %v1076_v47, %v1071_v52  ;;  %v1123_v61 = vpack.c.bf16 %v1078_v54, %v1073_v48 }
 0x130   : > { %v1122_v63 = vpack.c.bf16 %v1077_v56, %v1072_v55  ;;  %v1124_v1 = vpack.c.bf16 %v1079_v59, %v1074_v58  ;;  %v792_v3 = vpop.f32.mrb[28].mxu0  ;;  %v905_v5 = vpop.f32.mrb[28].mxu1 }
 0x131   : > { %v793_v6 = vadd.f32 %v792_v3, %v4439_v38  ;;  %v794_v7 = vpop.f32.mrb[29].mxu0  ;;  %v906_v13 = vadd.f32 %v905_v5, %v4444_v44  ;;  %v907_v14 = vpop.f32.mrb[29].mxu1 }
 0x132   : > { %v795_v21 = vadd.f32 %v794_v7, %v4449_v62  ;;  %v796_v8 = vpop.f32.mrb[30].mxu0  ;;  %1538 = vmatprep.mubr.bf16.mxu1 %v1122_v63  ;;  %v908_v9 = vadd.f32 %v907_v14, %v4454_v4  ;;  %v909_v11 = vpop.f32.mrb[30].mxu1  ;;  %1635 = vmatprep.mubr.bf16.mxu0 %v1124_v1 }
 0x133   : > { %v797_v15 = vadd.f32 %v796_v8, %v4439_v38  ;;  %v1083_v17 = vmax.f32 %v906_v13, 0.0  ;;  %v798_v18 = vpop.f32.mrb[31].mxu0  ;;  %1539 = vmatmul.mubr.bf16.gmra.mrb[56].mxu1 %v1121_v60  ;;  %v910_v23 = vadd.f32 %v909_v11, %v4444_v44  ;;  %v911_v24 = vpop.f32.mrb[31].mxu1  ;;  %1636 = vmatmul.mubr.bf16.gmra.mrb[72].mxu0 %v1123_v61  ;;  %v1081_v27 = vmax.f32 %v793_v6, 0.0 }
 0x134   : > { %v799_v0 = vadd.f32 %v798_v18, %v4449_v62  ;;  %v1084_v25 = vmax.f32 %v908_v9, 0.0  ;;  %v912_v26 = vadd.f32 %v911_v24, %v4454_v4  ;;  %v1082_v38 = vmax.f32 %v795_v21, 0.0 }
 0x135   : > { %v1086_v28 = vmax.f32 %v797_v15, 0.0  ;;  %v1088_v29 = vmax.f32 %v910_v23, 0.0 }
 0x136   : > { %v1087_v31 = vmax.f32 %v799_v0, 0.0  ;;  %v1089_v32 = vmax.f32 %v912_v26, 0.0 }
 0x137   : > { %v1126_v33 = vpack.c.bf16 %v1086_v28, %v1081_v27  ;;  %v1128_v44 = vpack.c.bf16 %v1088_v29, %v1083_v17 }
 0x138   : > { %v1127_v34 = vpack.c.bf16 %v1087_v31, %v1082_v38  ;;  %v1129_v35 = vpack.c.bf16 %v1089_v32, %v1084_v25  ;;  %v3595_v36 = vpop.f32.mrb[32].mxu0 }
 0x139   : > { %v957_v62 = vadd.f32 %v3595_v36, %v4546_v30  ;;  %v948_v37 = vpop.f32.mrb[33].mxu0  ;;  %v3834_v36 = vld [vmem:[%s5138_s8] ss:$20 sps:$4 sm:$0xff]  }
 0x13a   : > { %v949_v4 = vadd.f32 %v948_v37, %v4546_v30  ;;  %v3596_v39 = vpop.f32.mrb[34].mxu0  ;;  %1546 = vmatprep.mubr.bf16.mxu1 %v1127_v34  ;;  %1643 = vmatprep.mubr.bf16.mxu0 %v1129_v35  ;;  %v3839_v37 = vld [vmem:[%s5138_s8 + $0x2c] ss:$20 sps:$4 sm:$0xff]  }
 0x13b   : > { %v960_v42 = vadd.f32 %v3596_v39, %v4546_v30  ;;  %v951_v57 = vpop.f32.mrb[35].mxu0  ;;  %1547 = vmatmul.mubr.bf16.gmra.mrb[60].mxu1 %v1126_v33  ;;  %1644 = vmatmul.mubr.bf16.gmra.mrb[76].mxu0 %v1128_v44  ;;  %v1025_v46 = vmax.f32 %v957_v62, 0.0  ;;  %v3836_v62 = vld [vmem:[%s5138_s8 + $0x4] ss:$20 sps:$4 sm:$0xff]   ;;  %v3842_v39 = vld [vmem:[%s5138_s8 + $0x54] ss:$20 sps:$4 sm:$0xff]  }
 0x13c   : > { %v952_v45 = vadd.f32 %v951_v57, %v4546_v30  ;;  %2049 = vmatprep.mubr.bf16.mxu0 %v3966_v2  ;;  %v1015_v12 = vmax.f32 %v949_v4, 0.0  ;;  %2017 = vmatprep.subr.bf16.mxu0 %v3836_v62  ;;  %v3840_v4 = vld [vmem:[%s5138_s8 + $0x50] ss:$20 sps:$4 sm:$0xff]   ;;  %v3843_v57 = vld [vmem:[%s5138_s8 + $0x78] ss:$20 sps:$4 sm:$0xff]  }
 0x13d   : > { %v1030_v10 = vmax.f32 %v960_v42, 0.0  ;;  %2018 = vmatpush1.bf16.msra.mxu0 %v3834_v36  ;;  %v3848_v42 = vld [vmem:[%s5138_s8 + $0xc] ss:$20 sps:$4 sm:$0xff]  }
 0x13e   : > { %v1020_v48 = vmax.f32 %v952_v45, 0.0  ;;  %2019 = vmatprep.subr.bf16.mxu0 %v3839_v37  ;;  %v3845_v45 = vld [vmem:[%s5138_s8 + $0x7c] ss:$20 sps:$4 sm:$0xff]   ;;  %2130 = vmatprep.subr.bf16.mxu1 %v3848_v42 }
 0x13f   : > { %v1100_v49 = vpack.c.bf16 %v1030_v10, %v1025_v46  ;;  %v3846_v46 = vld [vmem:[%s5138_s8 + $0x8] ss:$20 sps:$4 sm:$0xff]  }
 0x140   : > { %v1095_v50 = vpack.c.bf16 %v1020_v48, %v1015_v12  ;;  %v3599_v43 = vpop.f32.mrb[36].mxu0  ;;  %v3851_v10 = vld [vmem:[%s5138_s8 + $0x34] ss:$20 sps:$4 sm:$0xff]   ;;  %v3849_v12 = vld [vmem:[%s5138_s8 + $0x30] ss:$20 sps:$4 sm:$0xff]  }
 0x141   : > { %v973_v51 = vadd.f32 %v3599_v43, %v4546_v30  ;;  %v964_v58 = vpop.f32.mrb[37].mxu0  ;;  %v3854_v48 = vld [vmem:[%s5138_s8 + $0x5c] ss:$20 sps:$4 sm:$0xff]   ;;  %v3855_v43 = vld [vmem:[%s5138_s8 + $0x80] ss:$20 sps:$4 sm:$0xff]  }
 0x142   : > { %v965_v22 = vadd.f32 %v964_v58, %v4546_v30  ;;  %v3600_v52 = vpop.f32.mrb[38].mxu0  ;;  %3625 = vmatprep.mubr.bf16.mxu1 %v1095_v50  ;;  %v3857_v50 = vld [vmem:[%s5138_s8 + $0x84] ss:$20 sps:$4 sm:$0xff]  }
 0x143   : > { %v1045_v47 = vmax.f32 %v973_v51, 0.0  ;;  %v976_v54 = vadd.f32 %v3600_v52, %v4546_v30  ;;  %v967_v55 = vpop.f32.mrb[39].mxu0  ;;  %3626 = vmatmul.mubr.bf16.vlgmr.msra.gmra.mrb[64].mxu1 %v1100_v49  ;;  %v3852_v49 = vld [vmem:[%s5138_s8 + $0x58] ss:$20 sps:$4 sm:$0xff]   ;;  %v4617_v51 = vld [vmem:[%s5138_s8 + $0x10] ss:$20 sps:$4 sm:$0xff]  }
 0x144   : > { %v1035_v56 = vmax.f32 %v965_v22, 0.0  ;;  %v968_v59 = vadd.f32 %v967_v55, %v4546_v30  ;;  %2131 = vmatpush1.bf16.msra.mxu1 %v3846_v46  ;;  %v4623_v52 = vld [vmem:[%s5137_s7] ss:$0 sm:$0xff] }
 0x145   : > { %v1050_v60 = vmax.f32 %v976_v54, 0.0  ;;  %2132 = vmatprep.subr.bf16.mxu1 %v3851_v10 }
 0x146   : > { %v1040_v61 = vmax.f32 %v968_v59, 0.0 }
 0x147   : > { %v1110_v63 = vpack.c.bf16 %v1050_v60, %v1045_v47 }
 0x148   : > { %v1105_v1 = vpack.c.bf16 %v1040_v61, %v1035_v56  ;;  %v3603_v3 = vpop.f32.mrb[40].mxu0  ;;  %2133 = vmatpush1.bf16.msra.mxu1 %v3849_v12 }
 0x149   : > { %v989_v5 = vadd.f32 %v3603_v3, %v4546_v30  ;;  %v980_v6 = vpop.f32.mrb[41].mxu0  ;;  %2134 = vmatprep.subr.bf16.mxu1 %v3854_v48 }
 0x14a   : > { %v981_v7 = vadd.f32 %v980_v6, %v4546_v30  ;;  %v3604_v13 = vpop.f32.mrb[42].mxu0  ;;  %3629 = vmatprep.mubr.bf16.mxu1 %v1105_v1 }
 0x14b   : > { %v1065_v14 = vmax.f32 %v989_v5, 0.0  ;;  %v992_v21 = vadd.f32 %v3604_v13, %v4546_v30  ;;  %v983_v8 = vpop.f32.mrb[43].mxu0  ;;  %3630 = vmatmul.mubr.bf16.gmra.mrb[68].mxu1 %v1110_v63 }
 0x14c   : > { %v1055_v9 = vmax.f32 %v981_v7, 0.0  ;;  %v984_v11 = vadd.f32 %v983_v8, %v4546_v30  ;;  %2135 = vmatpush1.bf16.msra.mxu1 %v3852_v49 }
 0x14d   : > { %v1070_v15 = vmax.f32 %v992_v21, 0.0  ;;  %2136 = vmatprep.subr.bf16.mxu1 %v3857_v50 }
 0x14e   : > { %v1060_v17 = vmax.f32 %v984_v11, 0.0 }
 0x14f   : > { %v1120_v18 = vpack.c.bf16 %v1070_v15, %v1065_v14 }
 0x150   : > { %v1115_v23 = vpack.c.bf16 %v1060_v17, %v1055_v9  ;;  %v3607_v24 = vpop.f32.mrb[44].mxu0  ;;  %2137 = vmatpush1.bf16.msra.mxu1 %v3855_v43 }
 0x151   : > { %v1005_v0 = vadd.f32 %v3607_v24, %v4546_v30  ;;  %v996_v25 = vpop.f32.mrb[45].mxu0 }
 0x152   : > { %v997_v26 = vadd.f32 %v996_v25, %v4546_v30  ;;  %v3608_v27 = vpop.f32.mrb[46].mxu0  ;;  %3633 = vmatprep.mubr.bf16.mxu1 %v1115_v23 }
 0x153   : > { %v1085_v28 = vmax.f32 %v1005_v0, 0.0  ;;  %v1008_v29 = vadd.f32 %v3608_v27, %v4546_v30  ;;  %v999_v38 = vpop.f32.mrb[47].mxu0  ;;  %3634 = vmatmul.mubr.bf16.gmra.mrb[72].mxu1 %v1120_v18 }
 0x154   : > { %v1075_v31 = vmax.f32 %v997_v26, 0.0  ;;  %v1000_v32 = vadd.f32 %v999_v38, %v4546_v30  ;;  %v3837_v30 = vld [vmem:[%s5138_s8 + $0x28] ss:$20 sps:$4 sm:$0xff]  }
 0x155   : > { %v1090_v33 = vmax.f32 %v1008_v29, 0.0  ;;  %2020 = vmatpush1.bf16.msra.mxu0 %v3837_v30 }
 0x156   : > { %v1080_v44 = vmax.f32 %v1000_v32, 0.0  ;;  %2021 = vmatprep.subr.bf16.mxu0 %v3842_v39 }
 0x157   : > { %v1130_v34 = vpack.c.bf16 %v1090_v33, %v1085_v28 }
 0x158   : > { %v1125_v35 = vpack.c.bf16 %v1080_v44, %v1075_v31 }
 0x159   : > { %2022 = vmatpush1.bf16.msra.mxu0 %v3840_v4 }
 0x15a   : > { %3637 = vmatprep.mubr.bf16.mxu1 %v1125_v35  ;;  %2023 = vmatprep.subr.bf16.mxu0 %v3845_v45 }
 0x15b   : > { %3638 = vmatmul.mubr.bf16.gmra.mrb[76].mxu1 %v1130_v34 }
 0x15c   : > { %2162 = vmatprep.mubr.bf16.mxu1 %v3966_v2 }
 0x15d   : > { %2024 = vmatpush1.bf16.msra.mxu0 %v3843_v57 }
 0x15e   : > { %3641 = vmatprep.subr.bf16.mxu0 %v4617_v51 }
 0x1d6   : > { %v3305_v58 = vpop.f32.mrb[32].mxu1  ;;  %v3369_v22 = vpop.f32.mrb[48].mxu0 }
 0x1d7   : > { %v3306_v47 = vpop.f32.mrb[33].mxu1  ;;  %v3370_v54 = vpop.f32.mrb[49].mxu0 }
 0x1d8   : > { %v3307_v55 = vadd.f32 %v3306_v47, %v3305_v58  ;;  %v3308_v56 = vpop.f32.mrb[34].mxu1  ;;  %v3371_v59 = vadd.f32 %v3370_v54, %v3369_v22  ;;  %v3372_v60 = vpop.f32.mrb[50].mxu0 }
 0x1d9   : > { %v3309_v61 = vpop.f32.mrb[35].mxu1  ;;  %v3373_v63 = vpop.f32.mrb[51].mxu0 }
 0x1da   : > { %v1493_v1 = vadd.f32 %v3307_v55, %v4623_v52  ;;  %v3310_v3 = vadd.f32 %v3309_v61, %v3308_v56  ;;  %v3374_v5 = vadd.f32 %v3373_v63, %v3372_v60 }
 0x1dc   : > { %v1496_v6 = vadd.f32 %v3310_v3, %v4623_v52  ;;  %v4627_v7 = vadd.f32 %v3371_v59, %v1493_v1 }
 0x1de   : > { %v3311_v13 = vpop.f32.mrb[36].mxu1  ;;  %v3375_v14 = vpop.f32.mrb[52].mxu0  ;;  %v4629_v21 = vadd.f32 %v3374_v5, %v1496_v6  ;;  %v3862_v6 = vld [vmem:[%s5140_s10 + $0x40] sm:$0xff]  }
 0x1df   : > { %v3312_v8 = vpop.f32.mrb[37].mxu1  ;;  %v3376_v9 = vpop.f32.mrb[53].mxu0  ;;  %3445 = vmatprep.subr.bf16.mxu1 %v3862_v6 }
 0x1e0   : > { %v3313_v11 = vadd.f32 %v3312_v8, %v3311_v13  ;;  %v3314_v15 = vpop.f32.mrb[38].mxu1  ;;  %v3377_v17 = vadd.f32 %v3376_v9, %v3375_v14  ;;  %v3378_v18 = vpop.f32.mrb[54].mxu0 }
 0x1e1   : > { %v3315_v23 = vpop.f32.mrb[39].mxu1  ;;  %v3379_v24 = vpop.f32.mrb[55].mxu0 }
 0x1e2   : > { %v1501_v0 = vadd.f32 %v3313_v11, %v4623_v52  ;;  %v3316_v25 = vadd.f32 %v3315_v23, %v3314_v15  ;;  %v3380_v26 = vadd.f32 %v3379_v24, %v3378_v18 }
 0x1e4   : > { %v1504_v27 = vadd.f32 %v3316_v25, %v4623_v52  ;;  %v4633_v28 = vadd.f32 %v3377_v17, %v1501_v0 }
 0x1e6   : > { %v3317_v29 = vpop.f32.mrb[40].mxu1  ;;  %v3381_v38 = vpop.f32.mrb[56].mxu0  ;;  %v4635_v31 = vadd.f32 %v3380_v26, %v1504_v27 }
 0x1e7   : > { %v3318_v32 = vpop.f32.mrb[41].mxu1  ;;  %v3382_v33 = vpop.f32.mrb[57].mxu0 }
 0x1e8   : > { %v3319_v44 = vadd.f32 %v3318_v32, %v3317_v29  ;;  %v3320_v34 = vpop.f32.mrb[42].mxu1  ;;  %v3383_v35 = vadd.f32 %v3382_v33, %v3381_v38  ;;  %v3384_v36 = vpop.f32.mrb[58].mxu0 }
 0x1e9   : > { %v3321_v62 = vpop.f32.mrb[43].mxu1  ;;  %v3385_v30 = vpop.f32.mrb[59].mxu0 }
 0x1ea   : > { %v1509_v37 = vadd.f32 %v3319_v44, %v4623_v52  ;;  %v3322_v4 = vadd.f32 %v3321_v62, %v3320_v34  ;;  %v3386_v39 = vadd.f32 %v3385_v30, %v3384_v36 }
 0x1ec   : > { %v1512_v42 = vadd.f32 %v3322_v4, %v4623_v52  ;;  %v4639_v57 = vadd.f32 %v3383_v35, %v1509_v37 }
 0x1ee   : > { %v3323_v45 = vpop.f32.mrb[44].mxu1  ;;  %v3387_v46 = vpop.f32.mrb[60].mxu0  ;;  %v4641_v10 = vadd.f32 %v3386_v39, %v1512_v42 }
 0x1ef   : > { %v3324_v12 = vpop.f32.mrb[45].mxu1  ;;  %v3388_v48 = vpop.f32.mrb[61].mxu0 }
 0x1f0   : > { %v3325_v49 = vadd.f32 %v3324_v12, %v3323_v45  ;;  %v3326_v50 = vpop.f32.mrb[46].mxu1  ;;  %v3389_v43 = vadd.f32 %v3388_v48, %v3387_v46  ;;  %v3390_v58 = vpop.f32.mrb[62].mxu0 }
 0x1f1   : > { %v3327_v22 = vpop.f32.mrb[47].mxu1  ;;  %v3391_v47 = vpop.f32.mrb[63].mxu0 }
 0x1f2   : > { %v1517_v54 = vadd.f32 %v3325_v49, %v4623_v52  ;;  %v3328_v55 = vadd.f32 %v3327_v22, %v3326_v50  ;;  %v3392_v56 = vadd.f32 %v3391_v47, %v3390_v58 }
 0x1f4   : > { %v1520_v59 = vadd.f32 %v3328_v55, %v4623_v52  ;;  %v4645_v60 = vadd.f32 %v3389_v43, %v1517_v54 }
 0x1f6   : > { %v3329_v61 = vpop.f32.mrb[48].mxu1  ;;  %v3393_v63 = vpop.f32.mrb[64].mxu0  ;;  %v4647_v1 = vadd.f32 %v3392_v56, %v1520_v59 }
 0x1f7   : > { %v3330_v3 = vpop.f32.mrb[49].mxu1  ;;  %v3394_v5 = vpop.f32.mrb[65].mxu0 }
 0x1f8   : > { %v3331_v13 = vadd.f32 %v3330_v3, %v3329_v61  ;;  %v3332_v14 = vpop.f32.mrb[50].mxu1  ;;  %v3395_v8 = vadd.f32 %v3394_v5, %v3393_v63  ;;  %v3396_v9 = vpop.f32.mrb[66].mxu0 }
 0x1f9   : > { %v3333_v11 = vpop.f32.mrb[51].mxu1  ;;  %v3397_v15 = vpop.f32.mrb[67].mxu0 }
 0x1fa   : > { %v1525_v17 = vadd.f32 %v3331_v13, %v4623_v52  ;;  %v3334_v18 = vadd.f32 %v3333_v11, %v3332_v14  ;;  %v3398_v23 = vadd.f32 %v3397_v15, %v3396_v9  ;;  %v3742_v63 = vpop.permute.xlu0 %3741 }
 0x1fc   : > { %v1528_v24 = vadd.f32 %v3334_v18, %v4623_v52  ;;  %v4654_v0 = vadd.f32 %v3395_v8, %v1525_v17 }
 0x1fe   : > { %v3335_v25 = vpop.f32.mrb[52].mxu1  ;;  %v3399_v26 = vpop.f32.mrb[68].mxu0  ;;  %v4656_v27 = vadd.f32 %v3398_v23, %v1528_v24 }
 0x1ff   : > { %v3336_v29 = vpop.f32.mrb[53].mxu1  ;;  %v3400_v38 = vpop.f32.mrb[69].mxu0 }
 0x200   : > { %v3337_v32 = vadd.f32 %v3336_v29, %v3335_v25  ;;  %v3338_v33 = vpop.f32.mrb[54].mxu1  ;;  %v3401_v44 = vadd.f32 %v3400_v38, %v3399_v26  ;;  %v3402_v34 = vpop.f32.mrb[70].mxu0 }
 0x201   : > { %v3339_v35 = vpop.f32.mrb[55].mxu1  ;;  %v3403_v36 = vpop.f32.mrb[71].mxu0 }
 0x202   : > { %v1533_v62 = vadd.f32 %v3337_v32, %v4623_v52  ;;  %v3340_v30 = vadd.f32 %v3339_v35, %v3338_v33  ;;  %v3404_v37 = vadd.f32 %v3403_v36, %v3402_v34  ;;  %v3747_v29 = vpop.permute.xlu0 %3746  ;;  %v3752_v33 = vpop.permute.xlu1 %3751 }
 0x203   : > { %v3749_v34 = vunpack.i.h.bf16 %v3747_v29  ;;  %v3748_v35 = vunpack.i.l.bf16 %v3747_v29  ;;  %v3867_v29 = vld [vmem:[%s5140_s10 + $0x10] sm:$0xff]  }
 0x204   : > { %v1536_v4 = vadd.f32 %v3340_v30, %v4623_v52  ;;  %v4660_v39 = vadd.f32 %v3401_v44, %v1533_v62  ;;  %v3744_v30 = vunpack.i.h.bf16 %v3742_v63 }
 0x206   : > { %v3341_v42 = vpop.f32.mrb[56].mxu1  ;;  %v3405_v45 = vpop.f32.mrb[72].mxu0  ;;  %v4662_v46 = vadd.f32 %v3404_v37, %v1536_v4  ;;  %v3743_v37 = vunpack.i.l.bf16 %v3742_v63  ;;  %v3754_v63 = vunpack.i.h.bf16 %v3752_v33 }
 0x207   : > { %v3342_v12 = vpop.f32.mrb[57].mxu1  ;;  %v3406_v48 = vpop.f32.mrb[73].mxu0 }
 0x208   : > { %v3343_v49 = vadd.f32 %v3342_v12, %v3341_v42  ;;  %v3344_v50 = vpop.f32.mrb[58].mxu1  ;;  %v3407_v43 = vadd.f32 %v3406_v48, %v3405_v45  ;;  %v3408_v58 = vpop.f32.mrb[74].mxu0 }
 0x209   : > { %v3345_v22 = vpop.f32.mrb[59].mxu1  ;;  %v3409_v47 = vpop.f32.mrb[75].mxu0 }
 0x20a   : > { %v1541_v54 = vadd.f32 %v3343_v49, %v4623_v52  ;;  %v3346_v55 = vadd.f32 %v3345_v22, %v3344_v50  ;;  %v3410_v56 = vadd.f32 %v3409_v47, %v3408_v58  ;;  %v3757_v58 = vpop.permute.xlu1 %3756 }
 0x20b   : > { %v3759_v47 = vunpack.i.h.bf16 %v3757_v58 }
 0x20c   : > { %v1544_v59 = vadd.f32 %v3346_v55, %v4623_v52  ;;  %v4666_v61 = vadd.f32 %v3407_v43, %v1541_v54  ;;  %v3758_v54 = vunpack.i.l.bf16 %v3757_v58 }
 0x20e   : > { %v3347_v3 = vpop.f32.mrb[60].mxu1  ;;  %v3411_v5 = vpop.f32.mrb[76].mxu0  ;;  %v4668_v6 = vadd.f32 %v3410_v56, %v1544_v59  ;;  %v3864_v59 = vld [vmem:[%s5140_s10 + $0x48] sm:$0xff]  }
 0x20f   : > { %v3348_v13 = vpop.f32.mrb[61].mxu1  ;;  %v3412_v14 = vpop.f32.mrb[77].mxu0 }
 0x210   : > { %v3349_v8 = vadd.f32 %v3348_v13, %v3347_v3  ;;  %v3350_v9 = vpop.f32.mrb[62].mxu1  ;;  %v3413_v11 = vadd.f32 %v3412_v14, %v3411_v5  ;;  %v3414_v15 = vpop.f32.mrb[78].mxu0  ;;  %v3753_v3 = vunpack.i.l.bf16 %v3752_v33 }
 0x211   : > { %v3351_v17 = vpop.f32.mrb[63].mxu1  ;;  %v3415_v18 = vpop.f32.mrb[79].mxu0 }
 0x212   : > { %v1549_v23 = vadd.f32 %v3349_v8, %v4623_v52  ;;  %v3352_v24 = vadd.f32 %v3351_v17, %v3350_v9  ;;  %v3416_v25 = vadd.f32 %v3415_v18, %v3414_v15  ;;  %v3860_v8 = vld [vmem:[%s5138_s8 + $0x60] ss:$20 sps:$4 sm:$0xff]   ;;  %v3767_v18 = vpop.permute.xlu1 %3766 }
 0x213   : > { %v3768_v33 = vunpack.i.l.bf16 %v3767_v18 }
 0x214   : > { %v1552_v26 = vadd.f32 %v3352_v24, %v4623_v52  ;;  %v4672_v38 = vadd.f32 %v3413_v11, %v1549_v23  ;;  %v3866_v24 = vld [vmem:[%s5140_s10 + $0x50] sm:$0xff]  }
 0x216   : > { %v3627_v32 = vpop.f32.mrb[64].mxu1  ;;  %v4674_v44 = vadd.f32 %v3416_v25, %v1552_v26  ;;  %v3861_v26 = vld [vmem:[%s5138_s8 + $0x88] ss:$20 sps:$4 sm:$0xff]  }
 0x217   : > { %v1695_v36 = vadd.f32 %v3627_v32, %v4633_v28  ;;  %v1686_v62 = vpop.f32.mrb[65].mxu1  ;;  %v3769_v32 = vunpack.i.h.bf16 %v3767_v18  ;;  %v3874_v18 = vld [vmem:[%s5140_s10 + $0xc8] sm:$0xff]  }
 0x218   : > { %v1687_v4 = vadd.f32 %v1686_v62, %v4627_v7  ;;  %v3628_v42 = vpop.f32.mrb[66].mxu1  ;;  %v3859_v7 = vld [vmem:[%s5138_s8 + $0x38] ss:$20 sps:$4 sm:$0xff]  }
 0x219   : > { %v1698_v45 = vadd.f32 %v3628_v42, %v4635_v31  ;;  %v1689_v52 = vpop.f32.mrb[67].mxu1  ;;  %v1815_v48 = vsel %vm663_vm0, %v1695_v36, %v3748_v35  ;;  %v3868_v36 = vld [vmem:[%s5140_s10 + $0x58] sm:$0xff]  }
 0x21a   : > { %v1690_v12 = vadd.f32 %v1689_v52, %v4629_v21  ;;  %v1813_v50 = vsel %vm663_vm0, %v1687_v4, %v3743_v37  ;;  %v3863_v21 = vld [vmem:[%s5140_s10] sm:$0xff]   ;;  %v3869_v52 = vld [vmem:[%s5140_s10 + $0x18] sm:$0xff]  }
 0x21b   : > { %v1816_v49 = vsel %vm663_vm0, %v1698_v45, %v3749_v34 }
 0x21c   : > { %v4683_v43 = vpack.c.bf16 %v1816_v49, %v1815_v48  ;;  %v1814_v28 = vsel %vm663_vm0, %v1690_v12, %v3744_v30 }
 0x21d   : > { %v4686_v22 = vpack.c.bf16 %v1814_v28, %v1813_v50  ;;  %v3777_v50 = vpop.permute.xlu1 %3776 }
 0x21e   : > { %v3631_v31 = vpop.f32.mrb[68].mxu1 }
 0x21f   : > { %v1711_v55 = vadd.f32 %v3631_v31, %v4645_v60  ;;  %v1702_v56 = vpop.f32.mrb[69].mxu1  ;;  %3208 = vmatmul.mubr.msk.bf16.vlgmr.msra.gmra.mrb[80].mxu0 %vm1992_vm1, %v4686_v22  ;;  %3216 = vmatmul.mubr.msk.bf16.vlgmr.msra.gmra.mrb[80].mxu1 %vm1992_vm1, %v4686_v22 }
 0x220   : > { %v1703_v5 = vadd.f32 %v1702_v56, %v4639_v57  ;;  %3642 = vmatpush3.bf16.msra.mxu0 %v4617_v51  ;;  %v3632_v13 = vpop.f32.mrb[70].mxu1  ;;  %2059 = vmatprep.mubr.bf16.mxu0 %v3966_v2  ;;  %v3865_v51 = vld [vmem:[%s5140_s10 + $0x8] sm:$0xff]  }
 0x221   : > { %v1714_v60 = vadd.f32 %v3632_v13, %v4647_v1  ;;  %v1705_v14 = vpop.f32.mrb[71].mxu1  ;;  %2172 = vmatprep.mubr.bf16.mxu1 %v3966_v2  ;;  %3643 = vmatprep.subr.bf16.mxu0 %v3859_v7  ;;  %v1819_v57 = vsel %vm663_vm0, %v1711_v55, %v3758_v54  ;;  %v3778_v54 = vunpack.i.l.bf16 %v3777_v50 }
 0x222   : > { %v1706_v9 = vadd.f32 %v1705_v14, %v4641_v10  ;;  %3446 = vmatpush3.bf16.msra.mxu1 %v3863_v21  ;;  %v1817_v1 = vsel %vm663_vm0, %v1703_v5, %v3753_v3  ;;  %v3762_v10 = vpop.permute.xlu0 %3761  ;;  %v3871_v21 = vld [vmem:[%s5140_s10 + $0x20] sm:$0xff]  }
 0x223   : > { %v1820_v11 = vsel %vm663_vm0, %v1714_v60, %v3759_v47  ;;  %3447 = vmatprep.subr.bf16.mxu1 %v3864_v59  ;;  %v3764_v62 = vunpack.i.h.bf16 %v3762_v10  ;;  %v3763_v30 = vunpack.i.l.bf16 %v3762_v10  ;;  %v3779_v47 = vunpack.i.h.bf16 %v3777_v50  ;;  %v3876_v59 = vld [vmem:[%s5140_s10 + $0x68] sm:$0xff]   ;;  %v3879_v10 = vld [vmem:[%s5140_s10 + $0x90] sm:$0xff]  }
 0x224   : > { %v4717_v15 = vpack.c.bf16 %v1820_v11, %v1819_v57  ;;  %v1818_v17 = vsel %vm663_vm0, %v1706_v9, %v3754_v63  ;;  %3644 = vmatpush3.bf16.msra.mxu0 %v3859_v7  ;;  %v3870_v7 = vld [vmem:[%s5140_s10 + $0x60] sm:$0xff]  }
 0x225   : > { %v4720_v23 = vpack.c.bf16 %v1818_v17, %v1817_v1  ;;  %3645 = vmatprep.subr.bf16.mxu0 %v3860_v8  ;;  %v3883_v1 = vld [vmem:[%s5140_s10 + $0x30] sm:$0xff]   ;;  %v3873_v17 = vld [vmem:[%s5140_s10 + $0x80] sm:$0xff]  }
 0x226   : > { %v3635_v25 = vpop.f32.mrb[72].mxu1  ;;  %3448 = vmatpush3.bf16.msra.mxu1 %v3865_v51  ;;  %v3772_v58 = vpop.permute.xlu0 %3771 }
 0x227   : > { %v1727_v34 = vadd.f32 %v3635_v25, %v4660_v39  ;;  %v1718_v35 = vpop.f32.mrb[73].mxu1  ;;  %3209 = vmatmul.mubr.msk.bf16.gmra.mrb[84].mxu0 %vm1992_vm1, %v4683_v43  ;;  %3217 = vmatmul.mubr.msk.bf16.gmra.mrb[84].mxu1 %vm1992_vm1, %v4683_v43  ;;  %v3774_v63 = vunpack.i.h.bf16 %v3772_v58  ;;  %v3773_v3 = vunpack.i.l.bf16 %v3772_v58  ;;  %v3885_v25 = vld [vmem:[%s5140_s10 + $0xa0] sm:$0xff]  }
 0x228   : > { %v1719_v37 = vadd.f32 %v1718_v35, %v4654_v0  ;;  %v3636_v4 = vpop.f32.mrb[74].mxu1  ;;  %2069 = vmatprep.mubr.bf16.mxu0 %v3966_v2  ;;  %2182 = vmatprep.mubr.bf16.mxu1 %v3966_v2  ;;  %v3872_v0 = vld [vmem:[%s5140_s10 + $0xc0] sm:$0xff]   ;;  %v3892_v35 = vld [vmem:[%s5140_s10 + $0xf8] sm:$0xff]  }
 0x229   : > { %v1730_v39 = vadd.f32 %v3636_v4, %v4662_v46  ;;  %v1721_v42 = vpop.f32.mrb[75].mxu1  ;;  %3646 = vmatpush3.bf16.msra.mxu0 %v3860_v8  ;;  %3449 = vmatprep.subr.bf16.mxu1 %v3866_v24  ;;  %v1823_v12 = vsel %vm663_vm0, %v1727_v34, %v3768_v33  ;;  %v3877_v8 = vld [vmem:[%s5140_s10 + $0x28] sm:$0xff]   ;;  %v3884_v24 = vld [vmem:[%s5140_s10 + $0xe0] sm:$0xff]   ;;  %v3889_v33 = vld [vmem:[%s5140_s10 + $0x38] sm:$0xff]  }
 0x22a   : > { %v1722_v45 = vadd.f32 %v1721_v42, %v4656_v27  ;;  %3647 = vmatprep.subr.bf16.mxu0 %v3861_v26  ;;  %3450 = vmatpush3.bf16.msra.mxu1 %v3867_v29  ;;  %v1821_v46 = vsel %vm663_vm0, %v1719_v37, %v3763_v30  ;;  %v3890_v29 = vld [vmem:[%s5140_s10 + $0xf0] sm:$0xff]   ;;  %v4890_v30 = vld [vmem:[%s5139_s9] sm:$0x1f] }
 0x22b   : > { %v1824_v48 = vsel %vm663_vm0, %v1730_v39, %v3769_v32  ;;  %3451 = vmatprep.subr.bf16.mxu1 %v3868_v36  ;;  %v3888_v32 = vld [vmem:[%s5140_s10 + $0x78] sm:$0xff]   ;;  %v3891_v34 = vld [vmem:[%s5140_s10 + $0xb0] sm:$0xff]   ;;  %v4895_v37 = vrot.slane %v4890_v30, %v588_v41  ;;  %v4900_v4 = vrot.slane %v4890_v30, %v596_v53 }
 0x22c   : > { %v4753_v49 = vpack.c.bf16 %v1824_v48, %v1823_v12  ;;  %v1822_v27 = vsel %vm663_vm0, %v1722_v45, %v3764_v62  ;;  %v3893_v36 = vld [vmem:[%s5140_s10 + $0xb8] sm:$0xff]   ;;  %v3894_v62 = vld [vmem:[%s5140_s10 + $0x100] sm:$0xff]   ;;  %v4905_v45 = vrot.slane %v4890_v30, %v592_v16 }
 0x22d   : > { %v4756_v28 = vpack.c.bf16 %v1822_v27, %v1821_v46  ;;  %3648 = vmatpush3.bf16.msra.mxu0 %v3861_v26  ;;  %v3887_v26 = vld [vmem:[%s5140_s10 + $0xa8] sm:$0xff]  }
 0x22e   : > { %v3639_v31 = vpop.f32.mrb[76].mxu1  ;;  %3452 = vmatpush3.bf16.msra.mxu1 %v3869_v52  ;;  %3509 = vmatprep.subr.bf16.mxu0 %v3872_v0  ;;  %v4910_v52 = vrot.slane %v4890_v30, %v600_v19 }
 0x22f   : > { %v1743_v55 = vadd.f32 %v3639_v31, %v4672_v38  ;;  %v1734_v56 = vpop.f32.mrb[77].mxu1  ;;  %3210 = vmatmul.mubr.msk.bf16.gmra.mrb[88].mxu0 %vm1992_vm1, %v4720_v23  ;;  %3218 = vmatmul.mubr.msk.bf16.gmra.mrb[88].mxu1 %vm1992_vm1, %v4720_v23 }
 0x230   : > { %v1735_v5 = vadd.f32 %v1734_v56, %v4666_v61  ;;  %v3640_v13 = vpop.f32.mrb[78].mxu1  ;;  %2079 = vmatprep.mubr.bf16.mxu0 %v3966_v2  ;;  %2192 = vmatprep.mubr.bf16.mxu1 %v3966_v2 }
 0x231   : > { %v1746_v38 = vadd.f32 %v3640_v13, %v4674_v44  ;;  %v1737_v60 = vpop.f32.mrb[79].mxu1  ;;  %3453 = vmatprep.subr.bf16.mxu1 %v3870_v7  ;;  %v1827_v9 = vsel %vm663_vm0, %v1743_v55, %v3778_v54  ;;  %v3895_v55 = vld [vmem:[%s5140_s10 + $0x108] sm:$0xff]  }
 0x232   : > { %v1738_v14 = vadd.f32 %v1737_v60, %v4668_v6  ;;  %3454 = vmatpush3.bf16.msra.mxu1 %v3871_v21  ;;  %v1825_v51 = vsel %vm663_vm0, %v1735_v5, %v3773_v3  ;;  %v3882_v6 = vld [vmem:[%s5140_s10 + $0x70] sm:$0xff]  }
 0x233   : > { %v1828_v61 = vsel %vm663_vm0, %v1746_v38, %v3779_v47  ;;  %3455 = vmatprep.subr.bf16.mxu1 %v3876_v59 }
 0x234   : > { %v4783_v57 = vpack.c.bf16 %v1828_v61, %v1827_v9  ;;  %v1826_v44 = vsel %vm663_vm0, %v1738_v14, %v3774_v63 }
 0x235   : > { %v1835_v11 = vpack.c.bf16 %v1826_v44, %v1825_v51  ;;  %v3896_v51 = vld [vmem:[%s5140_s10 + $0x110] sm:$0xff]  }
 0x236   : > { %3456 = vmatpush3.bf16.msra.mxu1 %v3877_v8 }
 0x237   : > { %3211 = vmatmul.mubr.msk.bf16.gmra.mrb[92].mxu0 %vm1992_vm1, %v4717_v15  ;;  %3219 = vmatmul.mubr.msk.bf16.gmra.mrb[92].mxu1 %vm1992_vm1, %v4717_v15 }
 0x238   : > { %2089 = vmatprep.mubr.bf16.mxu0 %v3966_v2  ;;  %2202 = vmatprep.mubr.bf16.mxu1 %v3966_v2 }
 0x239   : > { %3457 = vmatprep.subr.bf16.mxu1 %v3882_v6 }
 0x23a   : > { %3458 = vmatpush3.bf16.msra.mxu1 %v3883_v1 }
 0x23b   : > { %3459 = vmatprep.subr.bf16.mxu1 %v3888_v32 }
 0x23e   : > { %3460 = vmatpush3.bf16.msra.mxu1 %v3889_v33 }
 0x23f   : > { %3212 = vmatmul.mubr.msk.bf16.gmra.mrb[96].mxu0 %vm1992_vm1, %v4756_v28  ;;  %3220 = vmatmul.mubr.msk.bf16.gmra.mrb[96].mxu1 %vm1992_vm1, %v4756_v28 }
 0x240   : > { %2099 = vmatprep.mubr.bf16.mxu0 %v3966_v2  ;;  %2212 = vmatprep.mubr.bf16.mxu1 %v3966_v2 }
 0x241   : > { %3665 = vmatprep.subr.bf16.mxu1 %v3894_v62 }
 0x247   : > { %3213 = vmatmul.mubr.msk.bf16.gmra.mrb[100].mxu0 %vm1992_vm1, %v4753_v49  ;;  %3221 = vmatmul.mubr.msk.bf16.gmra.mrb[100].mxu1 %vm1992_vm1, %v4753_v49 }
 0x248   : > { %2109 = vmatprep.mubr.bf16.mxu0 %v3966_v2  ;;  %2222 = vmatprep.mubr.bf16.mxu1 %v3966_v2 }
 0x24f   : > { %3214 = vmatmul.mubr.msk.bf16.gmra.mrb[104].mxu0 %vm1992_vm1, %v1835_v11  ;;  %3222 = vmatmul.mubr.msk.bf16.gmra.mrb[104].mxu1 %vm1992_vm1, %v1835_v11 }
 0x250   : > { %2119 = vmatprep.mubr.bf16.mxu0 %v3966_v2  ;;  %2232 = vmatprep.mubr.bf16.mxu1 %v3966_v2  ;;  %v3875_v2 = vld [vmem:[%s5140_s10 + $0x88] sm:$0xff]  }
 0x257   : > { %3215 = vmatmul.mubr.msk.bf16.gmra.mrb[108].mxu0 %vm1992_vm1, %v4783_v57  ;;  %3223 = vmatmul.mubr.msk.bf16.gmra.mrb[108].mxu1 %vm1992_vm1, %v4783_v57 }
 0x258   : > { %3649 = vmatprep.mubr.msk.bf16.mxu0 %vm1992_vm1, %v4686_v22  ;;  %v3878_v22 = vld [vmem:[%s5140_s10 + $0xd0] sm:$0xff]  }
 0x25f   : > { %3650 = vmatmul.mubr.msk.bf16.vlgmr.msra.gmra.mrb[112].mxu0 %vm1992_vm1, %v4683_v43  ;;  %v3880_v43 = vld [vmem:[%s5140_s10 + $0xd8] sm:$0xff]  }
 0x260   : > { %3653 = vmatprep.mubr.msk.bf16.mxu0 %vm1992_vm1, %v4720_v23  ;;  %3510 = vmatpush3.bf16.msra.mxu0 %v3873_v17  ;;  %v3881_v23 = vld [vmem:[%s5140_s10 + $0x98] sm:$0xff]  }
 0x261   : > { %3511 = vmatprep.subr.bf16.mxu0 %v3874_v18 }
 0x264   : > { %3512 = vmatpush3.bf16.msra.mxu0 %v3875_v2 }
 0x265   : > { %3513 = vmatprep.subr.bf16.mxu0 %v3878_v22  ;;  %v3897_v22 = vld [vmem:[%s5140_s10 + $0x118] sm:$0xff]  }
 0x267   : > { %3654 = vmatmul.mubr.msk.bf16.gmra.mrb[116].mxu0 %vm1992_vm1, %v4717_v15  ;;  %v3886_v15 = vld [vmem:[%s5140_s10 + $0xe8] sm:$0xff]  }
 0x268   : > { %3657 = vmatprep.mubr.msk.bf16.mxu0 %vm1992_vm1, %v4756_v28  ;;  %3514 = vmatpush3.bf16.msra.mxu0 %v3879_v10 }
 0x269   : > { %3515 = vmatprep.subr.bf16.mxu0 %v3880_v43 }
 0x26c   : > { %3516 = vmatpush3.bf16.msra.mxu0 %v3881_v23 }
 0x26d   : > { %3517 = vmatprep.subr.bf16.mxu0 %v3884_v24 }
 0x26f   : > { %3658 = vmatmul.mubr.msk.bf16.gmra.mrb[120].mxu0 %vm1992_vm1, %v4753_v49 }
 0x270   : > { %3661 = vmatprep.mubr.msk.bf16.mxu0 %vm1992_vm1, %v1835_v11  ;;  %3518 = vmatpush3.bf16.msra.mxu0 %v3885_v25 }
 0x271   : > { %3519 = vmatprep.subr.bf16.mxu0 %v3886_v15 }
 0x274   : > { %3520 = vmatpush3.bf16.msra.mxu0 %v3887_v26 }
 0x275   : > { %3521 = vmatprep.subr.bf16.mxu0 %v3890_v29 }
 0x277   : > { %3662 = vmatmul.mubr.msk.bf16.gmra.mrb[124].mxu0 %vm1992_vm1, %v4783_v57 }
 0x278   : > { %3522 = vmatpush3.bf16.msra.mxu0 %v3891_v34 }
 0x279   : > { %3523 = vmatprep.subr.bf16.mxu0 %v3892_v35 }
 0x27c   : > { %3524 = vmatpush3.bf16.msra.mxu0 %v3893_v36  ;;  %v3898_v36 = vld [vmem:[%s5140_s10 + $0x120] sm:$0xff]  }
 0x2f2   : > { %v2051_v39 = vpop.f32.mrb[80].mxu0  ;;  %v2164_v42 = vpop.f32.mrb[80].mxu1 }
 0x2f3   : > { %v2053_v0 = vpop.f32.mrb[81].mxu0  ;;  %v2166_v41 = vpop.f32.mrb[81].mxu1  ;;  %v2052_v46 = vadd.f32 %v2051_v39, %v4895_v37  ;;  %v2165_v53 = vadd.f32 %v2164_v42, %v4900_v4 }
 0x2f4   : > { %v2055_v12 = vpop.f32.mrb[82].mxu0  ;;  %v2168_v48 = vpop.f32.mrb[82].mxu1  ;;  %v2054_v28 = vadd.f32 %v2053_v0, %v4905_v45  ;;  %v2167_v58 = vadd.f32 %v2166_v41, %v4910_v52 }
 0x2f5   : > { %v2056_v49 = vadd.f32 %v2055_v12, %v4895_v37  ;;  %v2169_v27 = vadd.f32 %v2168_v48, %v4900_v4  ;;  %v2057_v50 = vpop.f32.mrb[83].mxu0  ;;  %v2170_v16 = vpop.f32.mrb[83].mxu1 }
 0x2f6   : > { %v2058_v19 = vadd.f32 %v2057_v50, %v4905_v45  ;;  %v2171_v7 = vadd.f32 %v2170_v16, %v4910_v52 }
 0x2f7   : > { %v2340_v31 = vpack.c.bf16 %v2056_v49, %v2052_v46  ;;  %v2342_v21 = vpack.c.bf16 %v2169_v27, %v2165_v53  ;;  %v3899_v53 = vld [vmem:[%s5140_s10 + $0x128] sm:$0xff]  }
 0x2f8   : > { %v2341_v47 = vpack.c.bf16 %v2058_v19, %v2054_v28  ;;  %v2343_v54 = vpack.c.bf16 %v2171_v7, %v2167_v58 }
 0x2fa   : > { %v2061_v56 = vpop.f32.mrb[84].mxu0  ;;  %v2174_v59 = vpop.f32.mrb[84].mxu1  ;;  %2739 = vmatprep.mubr.bf16.mxu1 %v2341_v47  ;;  %2836 = vmatprep.mubr.bf16.mxu0 %v2343_v54 }
 0x2fb   : > { %v2063_v63 = vpop.f32.mrb[85].mxu0  ;;  %v2176_v3 = vpop.f32.mrb[85].mxu1  ;;  %2740 = vmatmul.mubr.bf16.vlgmr.msra.gmra.mrb[112].mxu1 %v2340_v31  ;;  %2837 = vmatmul.mubr.bf16.vlgmr.msra.gmra.mrb[128].mxu0 %v2342_v21  ;;  %v2062_v38 = vadd.f32 %v2061_v56, %v4895_v37  ;;  %v2175_v60 = vadd.f32 %v2174_v59, %v4900_v4 }
 0x2fc   : > { %3666 = vmatpush3.bf16.msra.mxu1 %v3894_v62  ;;  %v2065_v5 = vpop.f32.mrb[86].mxu0  ;;  %v2178_v13 = vpop.f32.mrb[86].mxu1  ;;  %v2064_v57 = vadd.f32 %v2063_v63, %v4905_v45  ;;  %v2177_v44 = vadd.f32 %v2176_v3, %v4910_v52 }
 0x2fd   : > { %v2066_v14 = vadd.f32 %v2065_v5, %v4895_v37  ;;  %v2179_v8 = vadd.f32 %v2178_v13, %v4900_v4  ;;  %v2067_v9 = vpop.f32.mrb[87].mxu0  ;;  %v2180_v61 = vpop.f32.mrb[87].mxu1  ;;  %3667 = vmatprep.subr.bf16.mxu1 %v3895_v55 }
 0x2fe   : > { %v2068_v11 = vadd.f32 %v2067_v9, %v4905_v45  ;;  %v2181_v6 = vadd.f32 %v2180_v61, %v4910_v52 }
 0x2ff   : > { %v2345_v1 = vpack.c.bf16 %v2066_v14, %v2062_v38  ;;  %v2347_v17 = vpack.c.bf16 %v2179_v8, %v2175_v60  ;;  %v3901_v14 = vld [vmem:[%s5140_s10 + $0x138] sm:$0xff]  }
 0x300   : > { %v2346_v18 = vpack.c.bf16 %v2068_v11, %v2064_v57  ;;  %v2348_v2 = vpack.c.bf16 %v2181_v6, %v2177_v44  ;;  %3668 = vmatpush3.bf16.msra.mxu1 %v3895_v55  ;;  %v3900_v55 = vld [vmem:[%s5140_s10 + $0x130] sm:$0xff]  }
 0x301   : > { %3669 = vmatprep.subr.bf16.mxu1 %v3896_v51 }
 0x302   : > { %v2071_v10 = vpop.f32.mrb[88].mxu0  ;;  %v2184_v43 = vpop.f32.mrb[88].mxu1  ;;  %2747 = vmatprep.mubr.bf16.mxu1 %v2346_v18  ;;  %2844 = vmatprep.mubr.bf16.mxu0 %v2348_v2 }
 0x303   : > { %v2073_v23 = vpop.f32.mrb[89].mxu0  ;;  %v2186_v24 = vpop.f32.mrb[89].mxu1  ;;  %2748 = vmatmul.mubr.bf16.gmra.mrb[116].mxu1 %v2345_v1  ;;  %2845 = vmatmul.mubr.bf16.gmra.mrb[132].mxu0 %v2347_v17  ;;  %v2072_v26 = vadd.f32 %v2071_v10, %v4895_v37  ;;  %v2185_v29 = vadd.f32 %v2184_v43, %v4900_v4 }
 0x304   : > { %v2075_v25 = vpop.f32.mrb[90].mxu0  ;;  %v2188_v15 = vpop.f32.mrb[90].mxu1  ;;  %3670 = vmatpush3.bf16.msra.mxu1 %v3896_v51  ;;  %v2074_v62 = vadd.f32 %v2073_v23, %v4905_v45  ;;  %v2187_v39 = vadd.f32 %v2186_v24, %v4910_v52 }
 0x305   : > { %v2076_v32 = vadd.f32 %v2075_v25, %v4895_v37  ;;  %v2189_v33 = vadd.f32 %v2188_v15, %v4900_v4  ;;  %v2077_v34 = vpop.f32.mrb[91].mxu0  ;;  %v2190_v35 = vpop.f32.mrb[91].mxu1  ;;  %3671 = vmatprep.subr.bf16.mxu1 %v3897_v22 }
 0x306   : > { %v2078_v42 = vadd.f32 %v2077_v34, %v4905_v45  ;;  %v2191_v0 = vadd.f32 %v2190_v35, %v4910_v52 }
 0x307   : > { %v2350_v41 = vpack.c.bf16 %v2076_v32, %v2072_v26  ;;  %v2352_v12 = vpack.c.bf16 %v2189_v33, %v2185_v29 }
 0x308   : > { %v2351_v48 = vpack.c.bf16 %v2078_v42, %v2074_v62  ;;  %v2353_v46 = vpack.c.bf16 %v2191_v0, %v2187_v39  ;;  %3672 = vmatpush3.bf16.msra.mxu1 %v3897_v22 }
 0x309   : > { %3673 = vmatprep.subr.bf16.mxu1 %v3898_v36 }
 0x30a   : > { %v2081_v49 = vpop.f32.mrb[92].mxu0  ;;  %v2194_v27 = vpop.f32.mrb[92].mxu1  ;;  %2755 = vmatprep.mubr.bf16.mxu1 %v2351_v48  ;;  %2852 = vmatprep.mubr.bf16.mxu0 %v2353_v46 }
 0x30b   : > { %v2083_v50 = vpop.f32.mrb[93].mxu0  ;;  %v2196_v16 = vpop.f32.mrb[93].mxu1  ;;  %2756 = vmatmul.mubr.bf16.gmra.mrb[120].mxu1 %v2350_v41  ;;  %2853 = vmatmul.mubr.bf16.gmra.mrb[136].mxu0 %v2352_v12  ;;  %v2082_v19 = vadd.f32 %v2081_v49, %v4895_v37  ;;  %v2195_v7 = vadd.f32 %v2194_v27, %v4900_v4 }
 0x30c   : > { %v2085_v28 = vpop.f32.mrb[94].mxu0  ;;  %v2198_v58 = vpop.f32.mrb[94].mxu1  ;;  %3674 = vmatpush3.bf16.msra.mxu1 %v3898_v36  ;;  %v2084_v56 = vadd.f32 %v2083_v50, %v4905_v45  ;;  %v2197_v59 = vadd.f32 %v2196_v16, %v4910_v52 }
 0x30d   : > { %v2086_v31 = vadd.f32 %v2085_v28, %v4895_v37  ;;  %v2199_v21 = vadd.f32 %v2198_v58, %v4900_v4  ;;  %v2087_v47 = vpop.f32.mrb[95].mxu0  ;;  %v2200_v54 = vpop.f32.mrb[95].mxu1  ;;  %3675 = vmatprep.subr.bf16.mxu1 %v3899_v53 }
 0x30e   : > { %v2088_v63 = vadd.f32 %v2087_v47, %v4905_v45  ;;  %v2201_v3 = vadd.f32 %v2200_v54, %v4910_v52 }
 0x30f   : > { %v2355_v5 = vpack.c.bf16 %v2086_v31, %v2082_v19  ;;  %v2357_v13 = vpack.c.bf16 %v2199_v21, %v2195_v7 }
 0x310   : > { %v2356_v38 = vpack.c.bf16 %v2088_v63, %v2084_v56  ;;  %v2358_v60 = vpack.c.bf16 %v2201_v3, %v2197_v59  ;;  %3676 = vmatpush3.bf16.msra.mxu1 %v3899_v53 }
 0x311   : > { %3677 = vmatprep.subr.bf16.mxu1 %v3900_v55 }
 0x312   : > { %v2091_v8 = vpop.f32.mrb[96].mxu0  ;;  %v2204_v9 = vpop.f32.mrb[96].mxu1  ;;  %2763 = vmatprep.mubr.bf16.mxu1 %v2356_v38  ;;  %2860 = vmatprep.mubr.bf16.mxu0 %v2358_v60 }
 0x313   : > { %v2093_v61 = vpop.f32.mrb[97].mxu0  ;;  %v2206_v51 = vpop.f32.mrb[97].mxu1  ;;  %2764 = vmatmul.mubr.bf16.gmra.mrb[124].mxu1 %v2355_v5  ;;  %2861 = vmatmul.mubr.bf16.gmra.mrb[140].mxu0 %v2357_v13  ;;  %v2092_v11 = vadd.f32 %v2091_v8, %v4895_v37  ;;  %v2205_v6 = vadd.f32 %v2204_v9, %v4900_v4 }
 0x314   : > { %v2095_v57 = vpop.f32.mrb[98].mxu0  ;;  %v2208_v44 = vpop.f32.mrb[98].mxu1  ;;  %3678 = vmatpush3.bf16.msra.mxu1 %v3900_v55  ;;  %v2094_v22 = vadd.f32 %v2093_v61, %v4905_v45  ;;  %v2207_v10 = vadd.f32 %v2206_v51, %v4910_v52 }
 0x315   : > { %v2096_v1 = vadd.f32 %v2095_v57, %v4895_v37  ;;  %v2209_v17 = vadd.f32 %v2208_v44, %v4900_v4  ;;  %v2097_v18 = vpop.f32.mrb[99].mxu0  ;;  %v2210_v2 = vpop.f32.mrb[99].mxu1  ;;  %3679 = vmatprep.subr.bf16.mxu1 %v3901_v14 }
 0x316   : > { %v2098_v43 = vadd.f32 %v2097_v18, %v4905_v45  ;;  %v2211_v23 = vadd.f32 %v2210_v2, %v4910_v52 }
 0x317   : > { %v2360_v24 = vpack.c.bf16 %v2096_v1, %v2092_v11  ;;  %v2362_v25 = vpack.c.bf16 %v2209_v17, %v2205_v6 }
 0x318   : > { %v2361_v15 = vpack.c.bf16 %v2098_v43, %v2094_v22  ;;  %v2363_v26 = vpack.c.bf16 %v2211_v23, %v2207_v10  ;;  %3680 = vmatpush3.bf16.msra.mxu1 %v3901_v14 }
 0x31a   : > { %v2101_v29 = vpop.f32.mrb[100].mxu0  ;;  %v2214_v32 = vpop.f32.mrb[100].mxu1  ;;  %2771 = vmatprep.mubr.bf16.mxu1 %v2361_v15  ;;  %2868 = vmatprep.mubr.bf16.mxu0 %v2363_v26 }
 0x31b   : > { %v2103_v33 = vpop.f32.mrb[101].mxu0  ;;  %v2216_v34 = vpop.f32.mrb[101].mxu1  ;;  %2772 = vmatmul.mubr.bf16.gmra.mrb[128].mxu1 %v2360_v24  ;;  %2869 = vmatmul.mubr.bf16.gmra.mrb[144].mxu0 %v2362_v25  ;;  %v2102_v62 = vadd.f32 %v2101_v29, %v4895_v37  ;;  %v2215_v39 = vadd.f32 %v2214_v32, %v4900_v4  ;;  %v1882_v32 = vrot.slane %v4890_v30, %v604_v20 }
 0x31c   : > { %v2105_v35 = vpop.f32.mrb[102].mxu0  ;;  %v2218_v36 = vpop.f32.mrb[102].mxu1  ;;  %v2104_v48 = vadd.f32 %v2103_v33, %v4905_v45  ;;  %v2217_v46 = vadd.f32 %v2216_v34, %v4910_v52 }
 0x31d   : > { %v2106_v42 = vadd.f32 %v2105_v35, %v4895_v37  ;;  %v2219_v0 = vadd.f32 %v2218_v36, %v4900_v4  ;;  %v2107_v41 = vpop.f32.mrb[103].mxu0  ;;  %v2220_v12 = vpop.f32.mrb[103].mxu1 }
 0x31e   : > { %v2108_v53 = vadd.f32 %v2107_v41, %v4905_v45  ;;  %v2221_v49 = vadd.f32 %v2220_v12, %v4910_v52 }
 0x31f   : > { %v2365_v27 = vpack.c.bf16 %v2106_v42, %v2102_v62  ;;  %v2367_v50 = vpack.c.bf16 %v2219_v0, %v2215_v39 }
 0x320   : > { %v2366_v16 = vpack.c.bf16 %v2108_v53, %v2104_v48  ;;  %v2368_v28 = vpack.c.bf16 %v2221_v49, %v2217_v46 }
 0x322   : > { %v2111_v58 = vpop.f32.mrb[104].mxu0  ;;  %v2224_v19 = vpop.f32.mrb[104].mxu1  ;;  %2779 = vmatprep.mubr.bf16.mxu1 %v2366_v16  ;;  %2876 = vmatprep.mubr.bf16.mxu0 %v2368_v28 }
 0x323   : > { %v2113_v7 = vpop.f32.mrb[105].mxu0  ;;  %v2226_v31 = vpop.f32.mrb[105].mxu1  ;;  %2780 = vmatmul.mubr.bf16.gmra.mrb[132].mxu1 %v2365_v27  ;;  %2877 = vmatmul.mubr.bf16.gmra.mrb[148].mxu0 %v2367_v50  ;;  %v2112_v54 = vadd.f32 %v2111_v58, %v4895_v37  ;;  %v2225_v55 = vadd.f32 %v2224_v19, %v4900_v4 }
 0x324   : > { %v2115_v21 = vpop.f32.mrb[106].mxu0  ;;  %v2228_v47 = vpop.f32.mrb[106].mxu1  ;;  %v2114_v5 = vadd.f32 %v2113_v7, %v4905_v45  ;;  %v2227_v13 = vadd.f32 %v2226_v31, %v4910_v52 }
 0x325   : > { %v2116_v56 = vadd.f32 %v2115_v21, %v4895_v37  ;;  %v2229_v59 = vadd.f32 %v2228_v47, %v4900_v4  ;;  %v2117_v63 = vpop.f32.mrb[107].mxu0  ;;  %v2230_v3 = vpop.f32.mrb[107].mxu1 }
 0x326   : > { %v2118_v38 = vadd.f32 %v2117_v63, %v4905_v45  ;;  %v2231_v60 = vadd.f32 %v2230_v3, %v4910_v52 }
 0x327   : > { %v2370_v14 = vpack.c.bf16 %v2116_v56, %v2112_v54  ;;  %v2372_v8 = vpack.c.bf16 %v2229_v59, %v2225_v55 }
 0x328   : > { %v2371_v9 = vpack.c.bf16 %v2118_v38, %v2114_v5  ;;  %v2373_v61 = vpack.c.bf16 %v2231_v60, %v2227_v13 }
 0x32a   : > { %v2121_v51 = vpop.f32.mrb[108].mxu0  ;;  %v2234_v57 = vpop.f32.mrb[108].mxu1  ;;  %2787 = vmatprep.mubr.bf16.mxu1 %v2371_v9  ;;  %2884 = vmatprep.mubr.bf16.mxu0 %v2373_v61  ;;  %v5003_v61 = vld [vmem:[%s5141_s11] ss:$0 sm:$0xff] }
 0x32b   : > { %v2123_v44 = vpop.f32.mrb[109].mxu0  ;;  %v2236_v11 = vpop.f32.mrb[109].mxu1  ;;  %2788 = vmatmul.mubr.bf16.gmra.mrb[136].mxu1 %v2370_v14  ;;  %2885 = vmatmul.mubr.bf16.gmra.mrb[152].mxu0 %v2372_v8  ;;  %v2122_v17 = vadd.f32 %v2121_v51, %v4895_v37  ;;  %v2235_v18 = vadd.f32 %v2234_v57, %v4900_v4 }
 0x32c   : > { %v2125_v6 = vpop.f32.mrb[110].mxu0  ;;  %v2238_v1 = vpop.f32.mrb[110].mxu1  ;;  %v2124_v23 = vadd.f32 %v2123_v44, %v4905_v45  ;;  %v2237_v24 = vadd.f32 %v2236_v11, %v4910_v52 }
 0x32d   : > { %v2126_v2 = vadd.f32 %v2125_v6, %v4895_v37  ;;  %v2239_v22 = vadd.f32 %v2238_v1, %v4900_v4  ;;  %v2127_v10 = vpop.f32.mrb[111].mxu0  ;;  %v2240_v43 = vpop.f32.mrb[111].mxu1 }
 0x32e   : > { %v2128_v25 = vadd.f32 %v2127_v10, %v4905_v45  ;;  %v2241_v15 = vadd.f32 %v2240_v43, %v4910_v52 }
 0x32f   : > { %v2375_v26 = vpack.c.bf16 %v2126_v2, %v2122_v17  ;;  %v2377_v29 = vpack.c.bf16 %v2239_v22, %v2235_v18 }
 0x330   : > { %v2376_v33 = vpack.c.bf16 %v2128_v25, %v2124_v23  ;;  %v2378_v37 = vpack.c.bf16 %v2241_v15, %v2237_v24 }
 0x332   : > { %v3651_v34 = vpop.f32.mrb[112].mxu0  ;;  %2795 = vmatprep.mubr.bf16.mxu1 %v2376_v33  ;;  %2892 = vmatprep.mubr.bf16.mxu0 %v2378_v37 }
 0x333   : > { %v2286_v4 = vadd.f32 %v3651_v34, %v1882_v32  ;;  %v2277_v35 = vpop.f32.mrb[113].mxu0  ;;  %2796 = vmatmul.mubr.bf16.gmra.mrb[140].mxu1 %v2375_v26  ;;  %2893 = vmatmul.mubr.bf16.gmra.mrb[156].mxu0 %v2377_v29 }
 0x334   : > { %v2278_v36 = vadd.f32 %v2277_v35, %v1882_v32  ;;  %v3652_v62 = vpop.f32.mrb[114].mxu0 }
 0x335   : > { %v2289_v45 = vadd.f32 %v3652_v62, %v1882_v32  ;;  %v2280_v39 = vpop.f32.mrb[115].mxu0 }
 0x336   : > { %v2281_v52 = vadd.f32 %v2280_v39, %v1882_v32 }
 0x337   : > { %v2349_v42 = vpack.c.bf16 %v2289_v45, %v2286_v4 }
 0x338   : > { %v2344_v0 = vpack.c.bf16 %v2281_v52, %v2278_v36 }
 0x33a   : > { %v3655_v41 = vpop.f32.mrb[116].mxu0  ;;  %3681 = vmatprep.mubr.bf16.mxu1 %v2344_v0 }
 0x33b   : > { %v2302_v40 = vadd.f32 %v3655_v41, %v1882_v32  ;;  %v2293_v20 = vpop.f32.mrb[117].mxu0  ;;  %3682 = vmatmul.mubr.bf16.vlgmr.msra.gmra.mrb[144].mxu1 %v2349_v42 }
 0x33c   : > { %v2294_v30 = vadd.f32 %v2293_v20, %v1882_v32  ;;  %v3656_v12 = vpop.f32.mrb[118].mxu0 }
 0x33d   : > { %v2305_v48 = vadd.f32 %v3656_v12, %v1882_v32  ;;  %v2296_v46 = vpop.f32.mrb[119].mxu0 }
 0x33e   : > { %v2297_v53 = vadd.f32 %v2296_v46, %v1882_v32 }
 0x33f   : > { %v2359_v49 = vpack.c.bf16 %v2305_v48, %v2302_v40 }
 0x340   : > { %v2354_v27 = vpack.c.bf16 %v2297_v53, %v2294_v30 }
 0x342   : > { %v3659_v50 = vpop.f32.mrb[120].mxu0  ;;  %3685 = vmatprep.mubr.bf16.mxu1 %v2354_v27 }
 0x343   : > { %v2318_v16 = vadd.f32 %v3659_v50, %v1882_v32  ;;  %v2309_v28 = vpop.f32.mrb[121].mxu0  ;;  %3686 = vmatmul.mubr.bf16.gmra.mrb[148].mxu1 %v2359_v49 }
 0x344   : > { %v2310_v58 = vadd.f32 %v2309_v28, %v1882_v32  ;;  %v3660_v19 = vpop.f32.mrb[122].mxu0 }
 0x345   : > { %v2321_v7 = vadd.f32 %v3660_v19, %v1882_v32  ;;  %v2312_v31 = vpop.f32.mrb[123].mxu0 }
 0x346   : > { %v2313_v21 = vadd.f32 %v2312_v31, %v1882_v32 }
 0x347   : > { %v2369_v47 = vpack.c.bf16 %v2321_v7, %v2318_v16 }
 0x348   : > { %v2364_v54 = vpack.c.bf16 %v2313_v21, %v2310_v58 }
 0x34a   : > { %v3663_v55 = vpop.f32.mrb[124].mxu0  ;;  %3689 = vmatprep.mubr.bf16.mxu1 %v2364_v54 }
 0x34b   : > { %v2334_v56 = vadd.f32 %v3663_v55, %v1882_v32  ;;  %v2325_v59 = vpop.f32.mrb[125].mxu0  ;;  %3690 = vmatmul.mubr.bf16.gmra.mrb[152].mxu1 %v2369_v47 }
 0x34c   : > { %v2326_v63 = vadd.f32 %v2325_v59, %v1882_v32  ;;  %v3664_v3 = vpop.f32.mrb[126].mxu0 }
 0x34d   : > { %v2337_v5 = vadd.f32 %v3664_v3, %v1882_v32  ;;  %v2328_v13 = vpop.f32.mrb[127].mxu0 }
 0x34e   : > { %v2329_v38 = vadd.f32 %v2328_v13, %v1882_v32 }
 0x34f   : > { %v2379_v60 = vpack.c.bf16 %v2337_v5, %v2334_v56 }
 0x350   : > { %v2374_v14 = vpack.c.bf16 %v2329_v38, %v2326_v63 }
 0x352   : > { %3693 = vmatprep.mubr.bf16.mxu1 %v2374_v14 }
 0x353   : > { %3694 = vmatmul.mubr.bf16.gmra.mrb[156].mxu1 %v2379_v60 }
 0x3ce   : > { %v3461_v8 = vpop.f32.mrb[112].mxu1  ;;  %v3525_v9 = vpop.f32.mrb[128].mxu0 }
 0x3cf   : > { %v3462_v51 = vpop.f32.mrb[113].mxu1  ;;  %v3526_v57 = vpop.f32.mrb[129].mxu0 }
 0x3d0   : > { %v3463_v44 = vadd.f32 %v3462_v51, %v3461_v8  ;;  %v3527_v11 = vadd.f32 %v3526_v57, %v3525_v9  ;;  %v3464_v6 = vpop.f32.mrb[114].mxu1  ;;  %v3528_v1 = vpop.f32.mrb[130].mxu0 }
 0x3d1   : > { %v3465_v17 = vpop.f32.mrb[115].mxu1  ;;  %v3529_v18 = vpop.f32.mrb[131].mxu0 }
 0x3d2   : > { %v2742_v2 = vadd.f32 %v3463_v44, %v5003_v61  ;;  %v3466_v22 = vadd.f32 %v3465_v17, %v3464_v6  ;;  %v3530_v10 = vadd.f32 %v3529_v18, %v3528_v1 }
 0x3d4   : > { %v2745_v43 = vadd.f32 %v3466_v22, %v5003_v61  ;;  %v5007_v23 = vadd.f32 %v3527_v11, %v2742_v2 }
 0x3d6   : > { %v3467_v24 = vpop.f32.mrb[116].mxu1  ;;  %v3531_v25 = vpop.f32.mrb[132].mxu0  ;;  %v5009_v15 = vadd.f32 %v3530_v10, %v2745_v43 }
 0x3d7   : > { %v3468_v26 = vpop.f32.mrb[117].mxu1  ;;  %v3532_v29 = vpop.f32.mrb[133].mxu0 }
 0x3d8   : > { %v3469_v32 = vadd.f32 %v3468_v26, %v3467_v24  ;;  %v3533_v33 = vadd.f32 %v3532_v29, %v3531_v25  ;;  %v3470_v37 = vpop.f32.mrb[118].mxu1  ;;  %v3534_v34 = vpop.f32.mrb[134].mxu0 }
 0x3d9   : > { %v3471_v4 = vpop.f32.mrb[119].mxu1  ;;  %v3535_v35 = vpop.f32.mrb[135].mxu0 }
 0x3da   : > { %v2750_v36 = vadd.f32 %v3469_v32, %v5003_v61  ;;  %v3472_v62 = vadd.f32 %v3471_v4, %v3470_v37  ;;  %v3536_v45 = vadd.f32 %v3535_v35, %v3534_v34 }
 0x3dc   : > { %v2753_v39 = vadd.f32 %v3472_v62, %v5003_v61  ;;  %v5013_v52 = vadd.f32 %v3533_v33, %v2750_v36 }
 0x3de   : > { %v3473_v42 = vpop.f32.mrb[120].mxu1  ;;  %v3537_v0 = vpop.f32.mrb[136].mxu0  ;;  %v5015_v41 = vadd.f32 %v3536_v45, %v2753_v39 }
 0x3df   : > { %v3474_v40 = vpop.f32.mrb[121].mxu1  ;;  %v3538_v20 = vpop.f32.mrb[137].mxu0 }
 0x3e0   : > { %v3475_v30 = vadd.f32 %v3474_v40, %v3473_v42  ;;  %v3539_v12 = vadd.f32 %v3538_v20, %v3537_v0  ;;  %v3476_v48 = vpop.f32.mrb[122].mxu1  ;;  %v3540_v46 = vpop.f32.mrb[138].mxu0 }
 0x3e1   : > { %v3477_v53 = vpop.f32.mrb[123].mxu1  ;;  %v3541_v49 = vpop.f32.mrb[139].mxu0 }
 0x3e2   : > { %v2758_v27 = vadd.f32 %v3475_v30, %v5003_v61  ;;  %v3478_v50 = vadd.f32 %v3477_v53, %v3476_v48  ;;  %v3542_v16 = vadd.f32 %v3541_v49, %v3540_v46 }
 0x3e4   : > { %v2761_v28 = vadd.f32 %v3478_v50, %v5003_v61  ;;  %v5019_v58 = vadd.f32 %v3539_v12, %v2758_v27 }
 0x3e6   : > { %v3479_v19 = vpop.f32.mrb[124].mxu1  ;;  %v3543_v7 = vpop.f32.mrb[140].mxu0  ;;  %v5021_v31 = vadd.f32 %v3542_v16, %v2761_v28 }
 0x3e7   : > { %v3480_v21 = vpop.f32.mrb[125].mxu1  ;;  %v3544_v47 = vpop.f32.mrb[141].mxu0 }
 0x3e8   : > { %v3481_v54 = vadd.f32 %v3480_v21, %v3479_v19  ;;  %v3545_v55 = vadd.f32 %v3544_v47, %v3543_v7  ;;  %v3482_v56 = vpop.f32.mrb[126].mxu1  ;;  %v3546_v59 = vpop.f32.mrb[142].mxu0 }
 0x3e9   : > { %v3483_v63 = vpop.f32.mrb[127].mxu1  ;;  %v3547_v3 = vpop.f32.mrb[143].mxu0 }
 0x3ea   : > { %v2766_v5 = vadd.f32 %v3481_v54, %v5003_v61  ;;  %v3484_v13 = vadd.f32 %v3483_v63, %v3482_v56  ;;  %v3548_v38 = vadd.f32 %v3547_v3, %v3546_v59 }
 0x3ec   : > { %v2769_v60 = vadd.f32 %v3484_v13, %v5003_v61  ;;  %v5025_v14 = vadd.f32 %v3545_v55, %v2766_v5 }
 0x3ee   : > { %v3485_v8 = vpop.f32.mrb[128].mxu1  ;;  %v3549_v9 = vpop.f32.mrb[144].mxu0  ;;  %v5027_v51 = vadd.f32 %v3548_v38, %v2769_v60 }
 0x3ef   : > { %v3486_v57 = vpop.f32.mrb[129].mxu1  ;;  %v3550_v44 = vpop.f32.mrb[145].mxu0 }
 0x3f0   : > { %v3487_v11 = vadd.f32 %v3486_v57, %v3485_v8  ;;  %v3551_v6 = vadd.f32 %v3550_v44, %v3549_v9  ;;  %v3488_v1 = vpop.f32.mrb[130].mxu1  ;;  %v3552_v17 = vpop.f32.mrb[146].mxu0 }
 0x3f1   : > { %v3489_v18 = vpop.f32.mrb[131].mxu1  ;;  %v3553_v2 = vpop.f32.mrb[147].mxu0 }
 0x3f2   : > { %v2774_v22 = vadd.f32 %v3487_v11, %v5003_v61  ;;  %v3490_v10 = vadd.f32 %v3489_v18, %v3488_v1  ;;  %v3554_v43 = vadd.f32 %v3553_v2, %v3552_v17 }
 0x3f4   : > { %v2777_v24 = vadd.f32 %v3490_v10, %v5003_v61  ;;  %v5031_v25 = vadd.f32 %v3551_v6, %v2774_v22 }
 0x3f6   : > { %v3491_v26 = vpop.f32.mrb[132].mxu1  ;;  %v3555_v29 = vpop.f32.mrb[148].mxu0  ;;  %v5033_v32 = vadd.f32 %v3554_v43, %v2777_v24 }
 0x3f7   : > { %v3492_v33 = vpop.f32.mrb[133].mxu1  ;;  %v3556_v37 = vpop.f32.mrb[149].mxu0 }
 0x3f8   : > { %v3493_v34 = vadd.f32 %v3492_v33, %v3491_v26  ;;  %v3557_v4 = vadd.f32 %v3556_v37, %v3555_v29  ;;  %v3494_v35 = vpop.f32.mrb[134].mxu1  ;;  %v3558_v36 = vpop.f32.mrb[150].mxu0 }
 0x3f9   : > { %v3495_v62 = vpop.f32.mrb[135].mxu1  ;;  %v3559_v45 = vpop.f32.mrb[151].mxu0 }
 0x3fa   : > { %v2782_v39 = vadd.f32 %v3493_v34, %v5003_v61  ;;  %v3496_v42 = vadd.f32 %v3495_v62, %v3494_v35  ;;  %v3560_v0 = vadd.f32 %v3559_v45, %v3558_v36 }
 0x3fc   : > { %v2785_v40 = vadd.f32 %v3496_v42, %v5003_v61  ;;  %v2879_v20 = vadd.f32 %v3557_v4, %v2782_v39 }
 0x3fe   : > { %v3497_v30 = vpop.f32.mrb[136].mxu1  ;;  %v3561_v12 = vpop.f32.mrb[152].mxu0  ;;  %v5037_v48 = vadd.f32 %v3560_v0, %v2785_v40 }
 0x3ff   : > { %v3498_v46 = vpop.f32.mrb[137].mxu1  ;;  %v3562_v53 = vpop.f32.mrb[153].mxu0 }
 0x400   : > { %v3499_v49 = vadd.f32 %v3498_v46, %v3497_v30  ;;  %v3563_v27 = vadd.f32 %v3562_v53, %v3561_v12  ;;  %v3500_v50 = vpop.f32.mrb[138].mxu1  ;;  %v3564_v16 = vpop.f32.mrb[154].mxu0 }
 0x401   : > { %v3501_v28 = vpop.f32.mrb[139].mxu1  ;;  %v3565_v19 = vpop.f32.mrb[155].mxu0 }
 0x402   : > { %v2790_v7 = vadd.f32 %v3499_v49, %v5003_v61  ;;  %v3502_v21 = vadd.f32 %v3501_v28, %v3500_v50  ;;  %v3566_v47 = vadd.f32 %v3565_v19, %v3564_v16 }
 0x404   : > { %v2793_v54 = vadd.f32 %v3502_v21, %v5003_v61  ;;  %v2887_v55 = vadd.f32 %v3563_v27, %v2790_v7 }
 0x406   : > { %v3503_v56 = vpop.f32.mrb[140].mxu1  ;;  %v3567_v59 = vpop.f32.mrb[156].mxu0  ;;  %v5041_v63 = vadd.f32 %v3566_v47, %v2793_v54 }
 0x407   : > { %v3504_v3 = vpop.f32.mrb[141].mxu1  ;;  %v3568_v5 = vpop.f32.mrb[157].mxu0 }
 0x408   : > { %v3505_v13 = vadd.f32 %v3504_v3, %v3503_v56  ;;  %v3569_v38 = vadd.f32 %v3568_v5, %v3567_v59  ;;  %v3506_v60 = vpop.f32.mrb[142].mxu1  ;;  %v3570_v8 = vpop.f32.mrb[158].mxu0 }
 0x409   : > { %v3507_v9 = vpop.f32.mrb[143].mxu1  ;;  %v3571_v57 = vpop.f32.mrb[159].mxu0 }
 0x40a   : > { %v2798_v44 = vadd.f32 %v3505_v13, %v5003_v61  ;;  %v3508_v11 = vadd.f32 %v3507_v9, %v3506_v60  ;;  %v3572_v6 = vadd.f32 %v3571_v57, %v3570_v8 }
 0x40c   : > { %v2801_v1 = vadd.f32 %v3508_v11, %v5003_v61  ;;  %v2895_v17 = vadd.f32 %v3569_v38, %v2798_v44 }
 0x40e   : > { %v3683_v18 = vpop.f32.mrb[144].mxu1  ;;  %v2898_v2 = vadd.f32 %v3572_v6, %v2801_v1 }
 0x40f   : > { %v2944_v22 = vadd.f32 %v3683_v18, %v5013_v52  ;;  %v2935_v10 = vpop.f32.mrb[145].mxu1 }
 0x410   : > { %v2936_v43 = vadd.f32 %v2935_v10, %v5007_v23  ;;  %v3684_v24 = vpop.f32.mrb[146].mxu1 }
 0x411   : > { %3000 = vst [vmem:[%s5050_s19 + $0x10] sm:$0xff] %v2944_v22  ;;  %v2947_v61 = vadd.f32 %v3684_v24, %v5015_v41  ;;  %v2938_v26 = vpop.f32.mrb[147].mxu1 }
 0x412   : > { %2998 = vst [vmem:[%s5050_s19] sm:$0xff] %v2936_v43  ;;  %v2939_v52 = vadd.f32 %v2938_v26, %v5009_v15 }
 0x413   : > { %3001 = vst [vmem:[%s5050_s19 + $0x18] sm:$0xff] %v2947_v61 }
 0x414   : > { %2999 = vst [vmem:[%s5050_s19 + $0x8] sm:$0xff] %v2939_v52 }
 0x416   : > { %v3687_v23 = vpop.f32.mrb[148].mxu1 }
 0x417   : > { %v2960_v29 = vadd.f32 %v3687_v23, %v5025_v14  ;;  %v2951_v33 = vpop.f32.mrb[149].mxu1 }
 0x418   : > { %v2952_v37 = vadd.f32 %v2951_v33, %v5019_v58  ;;  %v3688_v34 = vpop.f32.mrb[150].mxu1 }
 0x419   : > { %3004 = vst [vmem:[%s5050_s19 + $0x30] sm:$0xff] %v2960_v29  ;;  %v2963_v41 = vadd.f32 %v3688_v34, %v5027_v51  ;;  %v2954_v4 = vpop.f32.mrb[151].mxu1 }
 0x41a   : > { %3002 = vst [vmem:[%s5050_s19 + $0x20] sm:$0xff] %v2952_v37  ;;  %v2955_v15 = vadd.f32 %v2954_v4, %v5021_v31 }
 0x41b   : > { %3005 = vst [vmem:[%s5050_s19 + $0x38] sm:$0xff] %v2963_v41 }
 0x41c   : > { %3003 = vst [vmem:[%s5050_s19 + $0x28] sm:$0xff] %v2955_v15 }
 0x41e   : > { %v3691_v14 = vpop.f32.mrb[152].mxu1 }
 0x41f   : > { %v2976_v35 = vadd.f32 %v3691_v14, %v2879_v20  ;;  %v2967_v36 = vpop.f32.mrb[153].mxu1 }
 0x420   : > { %v2968_v58 = vadd.f32 %v2967_v36, %v5031_v25  ;;  %v3692_v62 = vpop.f32.mrb[154].mxu1 }
 0x421   : > { %3008 = vst [vmem:[%s5050_s19 + $0x50] sm:$0xff] %v2976_v35  ;;  %v2979_v51 = vadd.f32 %v3692_v62, %v5037_v48  ;;  %v2970_v45 = vpop.f32.mrb[155].mxu1 }
 0x422   : > { %3006 = vst [vmem:[%s5050_s19 + $0x40] sm:$0xff] %v2968_v58  ;;  %v2971_v39 = vadd.f32 %v2970_v45, %v5033_v32 }
 0x423   : > { %3009 = vst [vmem:[%s5050_s19 + $0x58] sm:$0xff] %v2979_v51 }
 0x424   : > { %3007 = vst [vmem:[%s5050_s19 + $0x48] sm:$0xff] %v2971_v39 }
 0x426   : > { %v3695_v31 = vpop.f32.mrb[156].mxu1 }
 0x427   : > { %v2992_v42 = vadd.f32 %v3695_v31, %v2895_v17  ;;  %v2983_v25 = vpop.f32.mrb[157].mxu1 }
 0x428   : > { %v2984_v0 = vadd.f32 %v2983_v25, %v2887_v55  ;;  %v3696_v40 = vpop.f32.mrb[158].mxu1 }
 0x429   : > { %3012 = vst [vmem:[%s5050_s19 + $0x70] sm:$0xff] %v2992_v42  ;;  %v2995_v20 = vadd.f32 %v3696_v40, %v2898_v2  ;;  %v2986_v30 = vpop.f32.mrb[159].mxu1 }
 0x42a   : > { %3010 = vst [vmem:[%s5050_s19 + $0x60] sm:$0xff] %v2984_v0  ;;  %v2987_v32 = vadd.f32 %v2986_v30, %v5041_v63 }
 0x42b   : > { %3013 = vst [vmem:[%s5050_s19 + $0x78] sm:$0xff] %v2995_v20 }
 0x42c   : > { %3011 = vst [vmem:[%s5050_s19 + $0x68] sm:$0xff] %v2987_v32 }
 0x42d   : > { %3915 = shalt.err (!%p3912_p3)
}
 0x42e   : > { %s3916_s18 = scalar_lea.hbm %s5079_s29, 2048  ;;  %s3920_s19 = scalar_lea.hbm %s5142_s12, 4096 }
 0x42f   : > { %p3917_p4 = scmp.ne.s32.totalorder %s5079_s29, %s3916_s18  ;;  %p3921_p9 = scmp.lt.u32.totalorder %s5079_s29, %s5142_s12 }
 0x430   : > { %p3922_p10 = scmp.lt.u32.totalorder %s3920_s19, %s3916_s18  ;;  %p3924_p12 = scmp.lt.u32.totalorder %s3916_s18, %s5079_s29 }
 0x431   : > { %p3918_p7 = pnand %p3917_p4, %p4074_p5 }
 0x432   : > { %p3923_p11 = por %p3922_p10, %p3921_p9 }
 0x433   : > { %p3919_p8 = pneg %p3918_p7 }
 0x434   : > { %p3925_p13 = por %p3924_p12, %p3923_p11 }
 0x436   : > { %p3926_p0 = pnand %p3925_p13, %p3919_p8 }
 0x438   : > { %3929 = shalt.err (!%p3926_p0)
}
 0x439   : > { %s3969_s28 = smov 128   ;;  %s3970_s27 = smov 8  }
 0x43a   : > { %3697 = dma.vmem_to_hbm [thread:$0]  (%p4074_p5), %s5081_s17, 2048, %s5079_s29, %s5089_s25, %s3969_s28, %s3969_s28, %s3970_s27  }
 0x43b PF: > { %p3703_p1 = scmp.ge.s32.totalorder %s3964_s24, 2  ;;  %s3043_s15 = sand.u32 1, %s3952_s21  }
 0x43c   : > { %s3044_s16 = scalar_lea.sflag [#allocation3], %s3043_s15 }
 0x43d   : > { %p3700_p2 = pnand %p3703_p1, %p4078_p6 }
 0x43f   : > { %3947 = dma.done.wait (!%p3700_p2), %s3044_s16, 2048  }
 0x440   : > { %3949 = vsyncadd (!%p3700_p2), %s3044_s16, 4294965248  ;;  %s5154_s24 = sld [smem:[#allocation6_spill]]  ;;  %s5155_s18 = sld [smem:[#allocation5_spill]] }
 0x441   : > { %s5156_s23 = sld [smem:[#allocation7_spill]]  ;;  %s5157_s21 = smov %s3956_s22 }
 0x446   : > { %p22_p3 = scmp.ge.s32.totalorder %s5154_s24, 4   ;;  %s5158_s22 = smov %s5155_s18 }
 0x448   :  { %24 = sbr.rel (!%p22_p3) target bundleno = 3 (0x3), region = 106 }
 0x44f   :  { %3049 = vsyncpa [#allocation3], 1 }
 0x450   :  { %3051 = vsyncpa [#allocation3 + $0x1], 1 }

</bundles_post_ra>
